<compile_context>
chip_gen: v5e
topology: v5e:2x2
jax: 0.10.0
libtpu: 0.0.40
codegen_flags: <defaults>
</compile_context>

<pallas_src>
import functools
import math

import jax
import jax.numpy as jnp
from jax.experimental import pallas as pl
from jax.experimental.pallas import tpu as pltpu

_BT = 8  # padded batch tile (f32 sublane width)


def _lstm_recursive_kernel(num_layers, num_steps, n_in, hidden_dim, *refs):
    """Fused autoregressive rollout for one 8-row batch tile.

    refs = [proj_hist,                       # (n_in*8, 4H) f32  layer-0 pre-acts of history
            w_hh_0,                          # (H, 4H) bf16
            (w_ih_l, w_hh_l, bias_l) l>=1,   # bias_l = b_ih + b_hh, (1, 4H) f32
            w_out, b_out,                    # fused head: (H, 4H+D) bf16, (1, 4H+D) f32
            out,                             # (num_steps*8, 4H+D) f32
            proj_scr, pre_scr, hseq_scr]     # VMEM scratch
    """
    H = hidden_dim
    G = 4 * H
    BT = _BT

    idx = 0
    proj_hist_ref = refs[idx]; idx += 1
    w_hh0_ref = refs[idx]; idx += 1
    upper = []
    for _ in range(num_layers - 1):
        upper.append((refs[idx], refs[idx + 1], refs[idx + 2])); idx += 3
    w_out_ref = refs[idx]; idx += 1
    b_out_ref = refs[idx]; idx += 1
    out_ref = refs[idx]; idx += 1
    proj_scr = refs[idx]; idx += 1    # ((n_in+num_steps-1)*8, 4H) f32: layer-0 pre-acts
    pre_scr = refs[idx]; idx += 1     # (n_in*8, 4H) f32: current-layer window pre-acts
    hseq_scr = refs[idx]; idx += 1    # (n_in*8, H)  f32: previous-layer hidden sequence

    # History pre-activations (computed once in the wrapper) -> scratch.
    proj_scr[0:n_in * BT, :] = proj_hist_ref[...]

    def cell(gates, c):
        # Two full-width EUP pushes instead of four quarter-width ones.
        sig = jax.nn.sigmoid(gates)
        tnh = jnp.tanh(gates)
        i_g = sig[:, 0 * H:1 * H]
        f_g = sig[:, 1 * H:2 * H]
        g_g = tnh[:, 2 * H:3 * H]
        o_g = sig[:, 3 * H:4 * H]
        c = f_g * c + i_g * g_g
        h_f32 = o_g * jnp.tanh(c)
        return h_f32, c

    for t in range(num_steps):                    # fully unrolled (small config)
        L = n_in - t                              # window length (PyTorch end clamping)
        base = 2 * t                              # first layer-0 slot of this window

        h_bf = None
        for l in range(num_layers):
            if l == 0:
                w_hh = w_hh0_ref[...]

                def pre(s, _base=base):
                    return proj_scr[(_base + s) * BT:(_base + s + 1) * BT, :]
            else:
                w_ih_ref, w_hh_ref, b_ref = upper[l - 1]
                w_hh = w_hh_ref[...]
                # Batched layer-l input projection over the whole window: ONE matmul.
                hs = hseq_scr[0:L * BT, :].astype(w_ih_ref.dtype)
                pre_scr[0:L * BT, :] = (
                    jnp.dot(hs, w_ih_ref[...], preferred_element_type=jnp.float32)
                    + b_ref[...])

                def pre(s):
                    return pre_scr[s * BT:(s + 1) * BT, :]

            c = jnp.zeros((BT, H), jnp.float32)
            for s in range(L):                    # unrolled short recurrence
                if s == 0:
                    gates = pre(0)                # h0 == 0 -> skip zero matmul
                else:
                    gates = pre(s) + jnp.dot(h_bf, w_hh,
                                             preferred_element_type=jnp.float32)
                h_f32, c = cell(gates, c)
                h_bf = h_f32.astype(w_hh.dtype)   # single cast, reused by all matmuls
                if l + 1 < num_layers:
                    hseq_scr[s * BT:(s + 1) * BT, :] = h_f32

        # Fused head: one matmul -> [next layer-0 pre-act | y].
        z = (jnp.dot(h_bf, w_out_ref[...], preferred_element_type=jnp.float32)
             + b_out_ref[...])
        out_ref[t * BT:(t + 1) * BT, :] = z
        if t + 1 < num_steps:
            proj_scr[(n_in + t) * BT:(n_in + t + 1) * BT, :] = z[:, 0:G]


def lstm_recursive_forward(x, params, *, n_timesteps_in, input_dim, hidden_dim,
                           num_layers, num_steps, matmul_dtype=jnp.bfloat16):
    """Exact semantics of LSTM_recursive.forward for the module's intended regime
    (num_steps <= n_timesteps_in <= x.shape[1]); PyTorch end-index clamping makes
    step t's window have length n_timesteps_in - t starting at T0 - n_timesteps_in + 2t."""
    B, T0, D = x.shape
    H = hidden_dim
    G = 4 * H
    assert D == input_dim
    assert num_steps <= n_timesteps_in <= T0, "unsupported window configuration"

    n_in = n_timesteps_in
    BT = _BT
    nbt = -(-B // BT)
    B_pad = nbt * BT

    cast = lambda a: a.astype(matmul_dtype)
    biases = [(params[f"b_ih_{l}"] + params[f"b_hh_{l}"]).astype(jnp.float32)
              for l in range(num_layers)]
    w_ih0 = params["w_ih_0"]           # (D, 4H)
    fc_w = params["fc_w"]              # (H, D)
    fc_b = params["fc_b"]              # (1, D)

    # History layer-0 pre-activations (degenerate K=D matmul kept out of the kernel),
    # batch padded to the 8-row tile, time-major per batch tile, flattened to 2D.
    hist = x[:, T0 - n_in:, :]                                     # (B, n_in, D)
    hist = jnp.pad(hist, ((0, B_pad - B), (0, 0), (0, 0)))
    hist_tm = jnp.transpose(hist, (1, 0, 2)).reshape(n_in * B_pad, D)
    proj_hist = (jnp.dot(cast(hist_tm), cast(w_ih0),
                         preferred_element_type=jnp.float32)
                 + biases[0]).reshape(n_in, nbt, BT, G)
    proj_hist = proj_hist.transpose(1, 0, 2, 3).reshape(nbt * n_in * BT, G)

    # Fused prediction head: lanes [0:4H] = next layer-0 pre-activation, [4H:4H+D] = y.
    w_out = jnp.concatenate(
        [jnp.dot(fc_w, w_ih0, preferred_element_type=jnp.float32), fc_w], axis=1)
    b_out = jnp.concatenate(
        [jnp.dot(fc_b, w_ih0, preferred_element_type=jnp.float32) + biases[0], fc_b],
        axis=1).astype(jnp.float32)

    inputs = [proj_hist, cast(params["w_hh_0"])]
    for l in range(1, num_layers):
        inputs += [cast(params[f"w_ih_{l}"]), cast(params[f"w_hh_{l}"]), biases[l]]
    inputs += [cast(w_out), b_out]

    def full(shape):
        return pl.BlockSpec(shape, lambda b, _n=len(shape): (0,) * _n)

    in_specs = [pl.BlockSpec((n_in * BT, G), lambda b: (b, 0)),    # proj_hist, per batch tile
                full((H, G))]                                      # w_hh_0
    for _ in range(1, num_layers):
        in_specs += [full((H, G)), full((H, G)), full((1, G))]
    in_specs += [full((H, G + D)), full((1, G + D))]

    out_specs = pl.BlockSpec((num_steps * BT, G + D), lambda b: (b, 0))

    kernel = functools.partial(_lstm_recursive_kernel, num_layers, num_steps, n_in, H)
    out2d = pl.pallas_call(
        kernel,
        out_shape=jax.ShapeDtypeStruct((nbt * num_steps * BT, G + D), jnp.float32),
        grid=(nbt,),
        in_specs=in_specs,
        out_specs=out_specs,
        scratch_shapes=[
            pltpu.VMEM(((n_in + num_steps - 1) * BT, G), jnp.float32),   # proj sequence
            pltpu.VMEM((n_in * BT, G), jnp.float32),                     # per-layer pre-acts
            pltpu.VMEM((n_in * BT, H), jnp.float32),                     # hidden sequence
        ],
        compiler_params=pltpu.CompilerParams(
            dimension_semantics=("parallel",),          # batch tiles shard across TCs (v7x)
            vmem_limit_bytes=16 * 1024 * 1024),
    )(*inputs)

    out = (out2d.reshape(nbt, num_steps, BT, G + D)
           .transpose(1, 0, 2, 3)
           .reshape(num_steps, B_pad, G + D))
    y = out[:, :B, G:G + D]                              # (num_steps, B, D)
    return jnp.transpose(y, (1, 0, 2))                   # (B, num_steps, D)


def lstm_recursive_reference(x, params, *, n_timesteps_in, hidden_dim, num_layers,
                             num_steps, matmul_dtype=jnp.bfloat16):
    """Plain-JAX transcription of the PyTorch forward (bf16-operand matmuls, un-fused head)."""
    B, _, D = x.shape
    H = hidden_dim
    cast = lambda a: a.astype(matmul_dtype)
    outs = []
    for t in range(num_steps):
        cur_len = x.shape[1]
        s0, e0, _ = slice(cur_len - n_timesteps_in + t, cur_len + t).indices(cur_len)
        win = x[:, s0:e0, :]
        L = win.shape[1]
        seq = [win[:, s, :] for s in range(L)]
        for l in range(num_layers):
            w_ih = cast(params[f"w_ih_{l}"])
            w_hh = cast(params[f"w_hh_{l}"])
            b = (params[f"b_ih_{l}"] + params[f"b_hh_{l}"]).astype(jnp.float32)
            h = jnp.zeros((B, H), jnp.float32)
            c = jnp.zeros((B, H), jnp.float32)
            new_seq = []
            for s in range(L):
                gates = (jnp.dot(cast(seq[s]), w_ih, preferred_element_type=jnp.float32)
                         + jnp.dot(cast(h), w_hh, preferred_element_type=jnp.float32) + b)
                i_g = jax.nn.sigmoid(gates[:, 0:H])
                f_g = jax.nn.sigmoid(gates[:, H:2 * H])
                g_g = jnp.tanh(gates[:, 2 * H:3 * H])
                o_g = jax.nn.sigmoid(gates[:, 3 * H:4 * H])
                c = f_g * c + i_g * g_g
                h = o_g * jnp.tanh(c)
                new_seq.append(h)
            seq = new_seq
        y = (jnp.dot(cast(seq[-1]), cast(params["fc_w"]),
                     preferred_element_type=jnp.float32) + params["fc_b"])
        outs.append(y)
        x = jnp.concatenate([x, y[:, None, :]], axis=1)
    return jnp.stack(outs, axis=1)


def init_params(key, input_dim, hidden_dim, num_layers):
    """Deterministic synthetic init (PyTorch-style U(-1/sqrt(H), 1/sqrt(H)))."""
    params = {}
    bound = 1.0 / math.sqrt(hidden_dim)
    keys = jax.random.split(key, 4 * num_layers + 2)
    ki = 0
    for l in range(num_layers):
        in_dim = input_dim if l == 0 else hidden_dim
        params[f"w_ih_{l}"] = jax.random.uniform(
            keys[ki], (in_dim, 4 * hidden_dim), jnp.float32, -bound, bound); ki += 1
        params[f"w_hh_{l}"] = jax.random.uniform(
            keys[ki], (hidden_dim, 4 * hidden_dim), jnp.float32, -bound, bound); ki += 1
        params[f"b_ih_{l}"] = jax.random.uniform(
            keys[ki], (1, 4 * hidden_dim), jnp.float32, -bound, bound); ki += 1
        params[f"b_hh_{l}"] = jax.random.uniform(
            keys[ki], (1, 4 * hidden_dim), jnp.float32, -bound, bound); ki += 1
    params["fc_w"] = jax.random.uniform(
        keys[ki], (hidden_dim, input_dim), jnp.float32, -bound, bound); ki += 1
    params["fc_b"] = jax.random.uniform(
        keys[ki], (1, input_dim), jnp.float32, -bound, bound); ki += 1
    return params


if __name__ == "__main__":
    B = 2
    input_dim = 4
    hidden_dim = 32
    num_layers = 2
    num_steps = 4
    T0 = 8              # initial number of timesteps in x
    n_timesteps_in = 6  # num_steps <= n_timesteps_in <= T0

    key = jax.random.PRNGKey(0)
    k_x, k_p = jax.random.split(key)
    x = jax.random.normal(k_x, (B, T0, input_dim), jnp.float32)
    params = init_params(k_p, input_dim, hidden_dim, num_layers)

    fwd = jax.jit(functools.partial(
        lstm_recursive_forward,
        n_timesteps_in=n_timesteps_in, input_dim=input_dim, hidden_dim=hidden_dim,
        num_layers=num_layers, num_steps=num_steps))
    out = jax.block_until_ready(fwd(x, params))

    assert out.shape == (B, num_steps, input_dim)
    assert out.dtype == jnp.float32

    ref = lstm_recursive_reference(
        x, params, n_timesteps_in=n_timesteps_in, hidden_dim=hidden_dim,
        num_layers=num_layers, num_steps=num_steps)
    # Fused head skips the intermediate bf16 rounding of y before re-projection
    # (~1e-3 drift); everything else is bit-matched to the bf16 reference.
    assert jnp.allclose(out, ref, atol=2e-2, rtol=2e-2)

    print("KERNEL_OK")
</pallas_src>

<mosaic_0001>
module attributes {stable_mosaic.version = 11 : i64} {
  func.func @_lstm_recursive_kernel(%arg0: i32, %arg1: memref<48x128xf32, #tpu.memory_space<vmem>>, %arg2: memref<32x128xbf16, #tpu.memory_space<vmem>>, %arg3: memref<32x128xbf16, #tpu.memory_space<vmem>>, %arg4: memref<32x128xbf16, #tpu.memory_space<vmem>>, %arg5: memref<1x128xf32, #tpu.memory_space<vmem>>, %arg6: memref<32x132xbf16, #tpu.memory_space<vmem>>, %arg7: memref<1x132xf32, #tpu.memory_space<vmem>>, %arg8: memref<32x132xf32, #tpu.memory_space<vmem>>, %arg9: memref<72x128xf32, #tpu.memory_space<vmem>>, %arg10: memref<48x128xf32, #tpu.memory_space<vmem>>, %arg11: memref<48x32xf32, #tpu.memory_space<vmem>>) attributes {dimension_semantics = [#tpu.dimension_semantics<parallel>], iteration_bounds = array<i64: 1>, scalar_prefetch = 0 : i64, scratch_operands = 3 : i64, tpu.core_type = #tpu.core_type<tc>, window_params = [{transform_indices = @transform_0, window_bounds = array<i64: 48, 128>}, {pipeline_mode = #tpu.pipeline_mode<synchronous>, transform_indices = @transform_1, window_bounds = array<i64: 32, 128>}, {pipeline_mode = #tpu.pipeline_mode<synchronous>, transform_indices = @transform_2, window_bounds = array<i64: 32, 128>}, {pipeline_mode = #tpu.pipeline_mode<synchronous>, transform_indices = @transform_3, window_bounds = array<i64: 32, 128>}, {pipeline_mode = #tpu.pipeline_mode<synchronous>, transform_indices = @transform_4, window_bounds = array<i64: 1, 128>}, {pipeline_mode = #tpu.pipeline_mode<synchronous>, transform_indices = @transform_5, window_bounds = array<i64: 32, 132>}, {pipeline_mode = #tpu.pipeline_mode<synchronous>, transform_indices = @transform_6, window_bounds = array<i64: 1, 132>}, {transform_indices = @transform_7, window_bounds = array<i64: 32, 132>}]} {
    %c0 = arith.constant 0 : index
    %c0_0 = arith.constant 0 : index
    %0 = vector.load %arg1[%c0, %c0_0] : memref<48x128xf32, #tpu.memory_space<vmem>>, vector<48x128xf32>
    %c0_1 = arith.constant 0 : index
    %c0_2 = arith.constant 0 : index
    %1 = vector.load %arg9[%c0_1, %c0_2] : memref<72x128xf32, #tpu.memory_space<vmem>>, vector<48x128xf32>
    tpu.vector_store %arg9[%c0_1, %c0_2], %0 {strides = array<i32>} : memref<72x128xf32, #tpu.memory_space<vmem>>, vector<48x128xf32>,
    %c0_3 = arith.constant 0 : index
    %c0_4 = arith.constant 0 : index
    %2 = vector.load %arg2[%c0_3, %c0_4] : memref<32x128xbf16, #tpu.memory_space<vmem>>, vector<32x128xbf16>
    %cst = arith.constant 0.000000e+00 : f32
    %3 = vector.broadcast %cst : f32 to vector<8x32xf32>
    %c0_5 = arith.constant 0 : index
    %c0_6 = arith.constant 0 : index
    %4 = vector.load %arg9[%c0_5, %c0_6] : memref<72x128xf32, #tpu.memory_space<vmem>>, vector<8x128xf32>
    %5 = arith.negf %4 : vector<8x128xf32>
    %6 = math.exp %5 : vector<8x128xf32>
    %cst_7 = arith.constant 1.000000e+00 : f32
    %7 = vector.broadcast %cst_7 : f32 to vector<8x128xf32>
    %8 = arith.addf %7, %6 : vector<8x128xf32>
    %9 = arith.divf %7, %8 : vector<8x128xf32>
    %10 = math.tanh %4 : vector<8x128xf32>
    %11 = vector.extract_strided_slice %9 {offsets = [0, 0], sizes = [8, 32], strides = [1, 1]} : vector<8x128xf32> to vector<8x32xf32>
    %12 = vector.extract_strided_slice %9 {offsets = [0, 32], sizes = [8, 32], strides = [1, 1]} : vector<8x128xf32> to vector<8x32xf32>
    %13 = vector.extract_strided_slice %10 {offsets = [0, 64], sizes = [8, 32], strides = [1, 1]} : vector<8x128xf32> to vector<8x32xf32>
    %14 = vector.extract_strided_slice %9 {offsets = [0, 96], sizes = [8, 32], strides = [1, 1]} : vector<8x128xf32> to vector<8x32xf32>
    %15 = arith.mulf %12, %3 : vector<8x32xf32>
    %16 = arith.mulf %11, %13 : vector<8x32xf32>
    %17 = arith.addf %15, %16 : vector<8x32xf32>
    %18 = math.tanh %17 : vector<8x32xf32>
    %19 = arith.mulf %14, %18 : vector<8x32xf32>
    %20 = arith.truncf %19 : vector<8x32xf32> to vector<8x32xbf16>
    %c0_8 = arith.constant 0 : index
    %c0_9 = arith.constant 0 : index
    %21 = vector.load %arg11[%c0_8, %c0_9] : memref<48x32xf32, #tpu.memory_space<vmem>>, vector<8x32xf32>
    tpu.vector_store %arg11[%c0_8, %c0_9], %19 {strides = array<i32>} : memref<48x32xf32, #tpu.memory_space<vmem>>, vector<8x32xf32>,
    %c8 = arith.constant 8 : index
    %c0_10 = arith.constant 0 : index
    %22 = vector.load %arg9[%c8, %c0_10] : memref<72x128xf32, #tpu.memory_space<vmem>>, vector<8x128xf32>
    %cst_11 = arith.constant dense<0.000000e+00> : vector<8x128xf32>
    %23 = tpu.matmul %20, %2, %cst_11 {dimension_numbers = #tpu.dot_dimension_numbers<[1], [0], [0], [1], [0, 0, 1, 1], [], []>} : vector<8x32xbf16>, vector<32x128xbf16>, vector<8x128xf32> -> vector<8x128xf32>
    %24 = arith.addf %22, %23 : vector<8x128xf32>
    %25 = arith.negf %24 : vector<8x128xf32>
    %26 = math.exp %25 : vector<8x128xf32>
    %cst_12 = arith.constant 1.000000e+00 : f32
    %27 = vector.broadcast %cst_12 : f32 to vector<8x128xf32>
    %28 = arith.addf %27, %26 : vector<8x128xf32>
    %29 = arith.divf %27, %28 : vector<8x128xf32>
    %30 = math.tanh %24 : vector<8x128xf32>
    %31 = vector.extract_strided_slice %29 {offsets = [0, 0], sizes = [8, 32], strides = [1, 1]} : vector<8x128xf32> to vector<8x32xf32>
    %32 = vector.extract_strided_slice %29 {offsets = [0, 32], sizes = [8, 32], strides = [1, 1]} : vector<8x128xf32> to vector<8x32xf32>
    %33 = vector.extract_strided_slice %30 {offsets = [0, 64], sizes = [8, 32], strides = [1, 1]} : vector<8x128xf32> to vector<8x32xf32>
    %34 = vector.extract_strided_slice %29 {offsets = [0, 96], sizes = [8, 32], strides = [1, 1]} : vector<8x128xf32> to vector<8x32xf32>
    %35 = arith.mulf %32, %17 : vector<8x32xf32>
    %36 = arith.mulf %31, %33 : vector<8x32xf32>
    %37 = arith.addf %35, %36 : vector<8x32xf32>
    %38 = math.tanh %37 : vector<8x32xf32>
    %39 = arith.mulf %34, %38 : vector<8x32xf32>
    %40 = arith.truncf %39 : vector<8x32xf32> to vector<8x32xbf16>
    %c8_13 = arith.constant 8 : index
    %c0_14 = arith.constant 0 : index
    %41 = vector.load %arg11[%c8_13, %c0_14] : memref<48x32xf32, #tpu.memory_space<vmem>>, vector<8x32xf32>
    tpu.vector_store %arg11[%c8_13, %c0_14], %39 {strides = array<i32>} : memref<48x32xf32, #tpu.memory_space<vmem>>, vector<8x32xf32>,
    %c16 = arith.constant 16 : index
    %c0_15 = arith.constant 0 : index
    %42 = vector.load %arg9[%c16, %c0_15] : memref<72x128xf32, #tpu.memory_space<vmem>>, vector<8x128xf32>
    %cst_16 = arith.constant dense<0.000000e+00> : vector<8x128xf32>
    %43 = tpu.matmul %40, %2, %cst_16 {dimension_numbers = #tpu.dot_dimension_numbers<[1], [0], [0], [1], [0, 0, 1, 1], [], []>} : vector<8x32xbf16>, vector<32x128xbf16>, vector<8x128xf32> -> vector<8x128xf32>
    %44 = arith.addf %42, %43 : vector<8x128xf32>
    %45 = arith.negf %44 : vector<8x128xf32>
    %46 = math.exp %45 : vector<8x128xf32>
    %cst_17 = arith.constant 1.000000e+00 : f32
    %47 = vector.broadcast %cst_17 : f32 to vector<8x128xf32>
    %48 = arith.addf %47, %46 : vector<8x128xf32>
    %49 = arith.divf %47, %48 : vector<8x128xf32>
    %50 = math.tanh %44 : vector<8x128xf32>
    %51 = vector.extract_strided_slice %49 {offsets = [0, 0], sizes = [8, 32], strides = [1, 1]} : vector<8x128xf32> to vector<8x32xf32>
    %52 = vector.extract_strided_slice %49 {offsets = [0, 32], sizes = [8, 32], strides = [1, 1]} : vector<8x128xf32> to vector<8x32xf32>
    %53 = vector.extract_strided_slice %50 {offsets = [0, 64], sizes = [8, 32], strides = [1, 1]} : vector<8x128xf32> to vector<8x32xf32>
    %54 = vector.extract_strided_slice %49 {offsets = [0, 96], sizes = [8, 32], strides = [1, 1]} : vector<8x128xf32> to vector<8x32xf32>
    %55 = arith.mulf %52, %37 : vector<8x32xf32>
    %56 = arith.mulf %51, %53 : vector<8x32xf32>
    %57 = arith.addf %55, %56 : vector<8x32xf32>
    %58 = math.tanh %57 : vector<8x32xf32>
    %59 = arith.mulf %54, %58 : vector<8x32xf32>
    %60 = arith.truncf %59 : vector<8x32xf32> to vector<8x32xbf16>
    %c16_18 = arith.constant 16 : index
    %c0_19 = arith.constant 0 : index
    %61 = vector.load %arg11[%c16_18, %c0_19] : memref<48x32xf32, #tpu.memory_space<vmem>>, vector<8x32xf32>
    tpu.vector_store %arg11[%c16_18, %c0_19], %59 {strides = array<i32>} : memref<48x32xf32, #tpu.memory_space<vmem>>, vector<8x32xf32>,
    %c24 = arith.constant 24 : index
    %c0_20 = arith.constant 0 : index
    %62 = vector.load %arg9[%c24, %c0_20] : memref<72x128xf32, #tpu.memory_space<vmem>>, vector<8x128xf32>
    %cst_21 = arith.constant dense<0.000000e+00> : vector<8x128xf32>
    %63 = tpu.matmul %60, %2, %cst_21 {dimension_numbers = #tpu.dot_dimension_numbers<[1], [0], [0], [1], [0, 0, 1, 1], [], []>} : vector<8x32xbf16>, vector<32x128xbf16>, vector<8x128xf32> -> vector<8x128xf32>
    %64 = arith.addf %62, %63 : vector<8x128xf32>
    %65 = arith.negf %64 : vector<8x128xf32>
    %66 = math.exp %65 : vector<8x128xf32>
    %cst_22 = arith.constant 1.000000e+00 : f32
    %67 = vector.broadcast %cst_22 : f32 to vector<8x128xf32>
    %68 = arith.addf %67, %66 : vector<8x128xf32>
    %69 = arith.divf %67, %68 : vector<8x128xf32>
    %70 = math.tanh %64 : vector<8x128xf32>
    %71 = vector.extract_strided_slice %69 {offsets = [0, 0], sizes = [8, 32], strides = [1, 1]} : vector<8x128xf32> to vector<8x32xf32>
    %72 = vector.extract_strided_slice %69 {offsets = [0, 32], sizes = [8, 32], strides = [1, 1]} : vector<8x128xf32> to vector<8x32xf32>
    %73 = vector.extract_strided_slice %70 {offsets = [0, 64], sizes = [8, 32], strides = [1, 1]} : vector<8x128xf32> to vector<8x32xf32>
    %74 = vector.extract_strided_slice %69 {offsets = [0, 96], sizes = [8, 32], strides = [1, 1]} : vector<8x128xf32> to vector<8x32xf32>
    %75 = arith.mulf %72, %57 : vector<8x32xf32>
    %76 = arith.mulf %71, %73 : vector<8x32xf32>
    %77 = arith.addf %75, %76 : vector<8x32xf32>
    %78 = math.tanh %77 : vector<8x32xf32>
    %79 = arith.mulf %74, %78 : vector<8x32xf32>
    %80 = arith.truncf %79 : vector<8x32xf32> to vector<8x32xbf16>
    %c24_23 = arith.constant 24 : index
    %c0_24 = arith.constant 0 : index
    %81 = vector.load %arg11[%c24_23, %c0_24] : memref<48x32xf32, #tpu.memory_space<vmem>>, vector<8x32xf32>
    tpu.vector_store %arg11[%c24_23, %c0_24], %79 {strides = array<i32>} : memref<48x32xf32, #tpu.memory_space<vmem>>, vector<8x32xf32>,
    %c32 = arith.constant 32 : index
    %c0_25 = arith.constant 0 : index
    %82 = vector.load %arg9[%c32, %c0_25] : memref<72x128xf32, #tpu.memory_space<vmem>>, vector<8x128xf32>
    %cst_26 = arith.constant dense<0.000000e+00> : vector<8x128xf32>
    %83 = tpu.matmul %80, %2, %cst_26 {dimension_numbers = #tpu.dot_dimension_numbers<[1], [0], [0], [1], [0, 0, 1, 1], [], []>} : vector<8x32xbf16>, vector<32x128xbf16>, vector<8x128xf32> -> vector<8x128xf32>
    %84 = arith.addf %82, %83 : vector<8x128xf32>
    %85 = arith.negf %84 : vector<8x128xf32>
    %86 = math.exp %85 : vector<8x128xf32>
    %cst_27 = arith.constant 1.000000e+00 : f32
    %87 = vector.broadcast %cst_27 : f32 to vector<8x128xf32>
    %88 = arith.addf %87, %86 : vector<8x128xf32>
    %89 = arith.divf %87, %88 : vector<8x128xf32>
    %90 = math.tanh %84 : vector<8x128xf32>
    %91 = vector.extract_strided_slice %89 {offsets = [0, 0], sizes = [8, 32], strides = [1, 1]} : vector<8x128xf32> to vector<8x32xf32>
    %92 = vector.extract_strided_slice %89 {offsets = [0, 32], sizes = [8, 32], strides = [1, 1]} : vector<8x128xf32> to vector<8x32xf32>
    %93 = vector.extract_strided_slice %90 {offsets = [0, 64], sizes = [8, 32], strides = [1, 1]} : vector<8x128xf32> to vector<8x32xf32>
    %94 = vector.extract_strided_slice %89 {offsets = [0, 96], sizes = [8, 32], strides = [1, 1]} : vector<8x128xf32> to vector<8x32xf32>
    %95 = arith.mulf %92, %77 : vector<8x32xf32>
    %96 = arith.mulf %91, %93 : vector<8x32xf32>
    %97 = arith.addf %95, %96 : vector<8x32xf32>
    %98 = math.tanh %97 : vector<8x32xf32>
    %99 = arith.mulf %94, %98 : vector<8x32xf32>
    %100 = arith.truncf %99 : vector<8x32xf32> to vector<8x32xbf16>
    %c32_28 = arith.constant 32 : index
    %c0_29 = arith.constant 0 : index
    %101 = vector.load %arg11[%c32_28, %c0_29] : memref<48x32xf32, #tpu.memory_space<vmem>>, vector<8x32xf32>
    tpu.vector_store %arg11[%c32_28, %c0_29], %99 {strides = array<i32>} : memref<48x32xf32, #tpu.memory_space<vmem>>, vector<8x32xf32>,
    %c40 = arith.constant 40 : index
    %c0_30 = arith.constant 0 : index
    %102 = vector.load %arg9[%c40, %c0_30] : memref<72x128xf32, #tpu.memory_space<vmem>>, vector<8x128xf32>
    %cst_31 = arith.constant dense<0.000000e+00> : vector<8x128xf32>
    %103 = tpu.matmul %100, %2, %cst_31 {dimension_numbers = #tpu.dot_dimension_numbers<[1], [0], [0], [1], [0, 0, 1, 1], [], []>} : vector<8x32xbf16>, vector<32x128xbf16>, vector<8x128xf32> -> vector<8x128xf32>
    %104 = arith.addf %102, %103 : vector<8x128xf32>
    %105 = arith.negf %104 : vector<8x128xf32>
    %106 = math.exp %105 : vector<8x128xf32>
    %cst_32 = arith.constant 1.000000e+00 : f32
    %107 = vector.broadcast %cst_32 : f32 to vector<8x128xf32>
    %108 = arith.addf %107, %106 : vector<8x128xf32>
    %109 = arith.divf %107, %108 : vector<8x128xf32>
    %110 = math.tanh %104 : vector<8x128xf32>
    %111 = vector.extract_strided_slice %109 {offsets = [0, 0], sizes = [8, 32], strides = [1, 1]} : vector<8x128xf32> to vector<8x32xf32>
    %112 = vector.extract_strided_slice %109 {offsets = [0, 32], sizes = [8, 32], strides = [1, 1]} : vector<8x128xf32> to vector<8x32xf32>
    %113 = vector.extract_strided_slice %110 {offsets = [0, 64], sizes = [8, 32], strides = [1, 1]} : vector<8x128xf32> to vector<8x32xf32>
    %114 = vector.extract_strided_slice %109 {offsets = [0, 96], sizes = [8, 32], strides = [1, 1]} : vector<8x128xf32> to vector<8x32xf32>
    %115 = arith.mulf %112, %97 : vector<8x32xf32>
    %116 = arith.mulf %111, %113 : vector<8x32xf32>
    %117 = arith.addf %115, %116 : vector<8x32xf32>
    %118 = math.tanh %117 : vector<8x32xf32>
    %119 = arith.mulf %114, %118 : vector<8x32xf32>
    %c40_33 = arith.constant 40 : index
    %c0_34 = arith.constant 0 : index
    %120 = vector.load %arg11[%c40_33, %c0_34] : memref<48x32xf32, #tpu.memory_space<vmem>>, vector<8x32xf32>
    tpu.vector_store %arg11[%c40_33, %c0_34], %119 {strides = array<i32>} : memref<48x32xf32, #tpu.memory_space<vmem>>, vector<8x32xf32>,
    %c0_35 = arith.constant 0 : index
    %c0_36 = arith.constant 0 : index
    %121 = vector.load %arg4[%c0_35, %c0_36] : memref<32x128xbf16, #tpu.memory_space<vmem>>, vector<32x128xbf16>
    %c0_37 = arith.constant 0 : index
    %c0_38 = arith.constant 0 : index
    %122 = vector.load %arg11[%c0_37, %c0_38] : memref<48x32xf32, #tpu.memory_space<vmem>>, vector<48x32xf32>
    %123 = arith.truncf %122 : vector<48x32xf32> to vector<48x32xbf16>
    %c0_39 = arith.constant 0 : index
    %c0_40 = arith.constant 0 : index
    %124 = vector.load %arg3[%c0_39, %c0_40] : memref<32x128xbf16, #tpu.memory_space<vmem>>, vector<32x128xbf16>
    %cst_41 = arith.constant dense<0.000000e+00> : vector<48x128xf32>
    %125 = tpu.matmul %123, %124, %cst_41 {dimension_numbers = #tpu.dot_dimension_numbers<[1], [0], [0], [1], [0, 0, 1, 1], [], []>} : vector<48x32xbf16>, vector<32x128xbf16>, vector<48x128xf32> -> vector<48x128xf32>
    %c0_42 = arith.constant 0 : index
    %c0_43 = arith.constant 0 : index
    %126 = vector.load %arg5[%c0_42, %c0_43] : memref<1x128xf32, #tpu.memory_space<vmem>>, vector<1x128xf32>
    %127 = vector.broadcast %126 : vector<1x128xf32> to vector<48x128xf32>
    %128 = arith.addf %125, %127 : vector<48x128xf32>
    %c0_44 = arith.constant 0 : index
    %c0_45 = arith.constant 0 : index
    %129 = vector.load %arg10[%c0_44, %c0_45] : memref<48x128xf32, #tpu.memory_space<vmem>>, vector<48x128xf32>
    tpu.vector_store %arg10[%c0_44, %c0_45], %128 {strides = array<i32>} : memref<48x128xf32, #tpu.memory_space<vmem>>, vector<48x128xf32>,
    %cst_46 = arith.constant 0.000000e+00 : f32
    %130 = vector.broadcast %cst_46 : f32 to vector<8x32xf32>
    %c0_47 = arith.constant 0 : index
    %c0_48 = arith.constant 0 : index
    %131 = vector.load %arg10[%c0_47, %c0_48] : memref<48x128xf32, #tpu.memory_space<vmem>>, vector<8x128xf32>
    %132 = arith.negf %131 : vector<8x128xf32>
    %133 = math.exp %132 : vector<8x128xf32>
    %cst_49 = arith.constant 1.000000e+00 : f32
    %134 = vector.broadcast %cst_49 : f32 to vector<8x128xf32>
    %135 = arith.addf %134, %133 : vector<8x128xf32>
    %136 = arith.divf %134, %135 : vector<8x128xf32>
    %137 = math.tanh %131 : vector<8x128xf32>
    %138 = vector.extract_strided_slice %136 {offsets = [0, 0], sizes = [8, 32], strides = [1, 1]} : vector<8x128xf32> to vector<8x32xf32>
    %139 = vector.extract_strided_slice %136 {offsets = [0, 32], sizes = [8, 32], strides = [1, 1]} : vector<8x128xf32> to vector<8x32xf32>
    %140 = vector.extract_strided_slice %137 {offsets = [0, 64], sizes = [8, 32], strides = [1, 1]} : vector<8x128xf32> to vector<8x32xf32>
    %141 = vector.extract_strided_slice %136 {offsets = [0, 96], sizes = [8, 32], strides = [1, 1]} : vector<8x128xf32> to vector<8x32xf32>
    %142 = arith.mulf %139, %130 : vector<8x32xf32>
    %143 = arith.mulf %138, %140 : vector<8x32xf32>
    %144 = arith.addf %142, %143 : vector<8x32xf32>
    %145 = math.tanh %144 : vector<8x32xf32>
    %146 = arith.mulf %141, %145 : vector<8x32xf32>
    %147 = arith.truncf %146 : vector<8x32xf32> to vector<8x32xbf16>
    %c8_50 = arith.constant 8 : index
    %c0_51 = arith.constant 0 : index
    %148 = vector.load %arg10[%c8_50, %c0_51] : memref<48x128xf32, #tpu.memory_space<vmem>>, vector<8x128xf32>
    %cst_52 = arith.constant dense<0.000000e+00> : vector<8x128xf32>
    %149 = tpu.matmul %147, %121, %cst_52 {dimension_numbers = #tpu.dot_dimension_numbers<[1], [0], [0], [1], [0, 0, 1, 1], [], []>} : vector<8x32xbf16>, vector<32x128xbf16>, vector<8x128xf32> -> vector<8x128xf32>
    %150 = arith.addf %148, %149 : vector<8x128xf32>
    %151 = arith.negf %150 : vector<8x128xf32>
    %152 = math.exp %151 : vector<8x128xf32>
    %cst_53 = arith.constant 1.000000e+00 : f32
    %153 = vector.broadcast %cst_53 : f32 to vector<8x128xf32>
    %154 = arith.addf %153, %152 : vector<8x128xf32>
    %155 = arith.divf %153, %154 : vector<8x128xf32>
    %156 = math.tanh %150 : vector<8x128xf32>
    %157 = vector.extract_strided_slice %155 {offsets = [0, 0], sizes = [8, 32], strides = [1, 1]} : vector<8x128xf32> to vector<8x32xf32>
    %158 = vector.extract_strided_slice %155 {offsets = [0, 32], sizes = [8, 32], strides = [1, 1]} : vector<8x128xf32> to vector<8x32xf32>
    %159 = vector.extract_strided_slice %156 {offsets = [0, 64], sizes = [8, 32], strides = [1, 1]} : vector<8x128xf32> to vector<8x32xf32>
    %160 = vector.extract_strided_slice %155 {offsets = [0, 96], sizes = [8, 32], strides = [1, 1]} : vector<8x128xf32> to vector<8x32xf32>
    %161 = arith.mulf %158, %144 : vector<8x32xf32>
    %162 = arith.mulf %157, %159 : vector<8x32xf32>
    %163 = arith.addf %161, %162 : vector<8x32xf32>
    %164 = math.tanh %163 : vector<8x32xf32>
    %165 = arith.mulf %160, %164 : vector<8x32xf32>
    %166 = arith.truncf %165 : vector<8x32xf32> to vector<8x32xbf16>
    %c16_54 = arith.constant 16 : index
    %c0_55 = arith.constant 0 : index
    %167 = vector.load %arg10[%c16_54, %c0_55] : memref<48x128xf32, #tpu.memory_space<vmem>>, vector<8x128xf32>
    %cst_56 = arith.constant dense<0.000000e+00> : vector<8x128xf32>
    %168 = tpu.matmul %166, %121, %cst_56 {dimension_numbers = #tpu.dot_dimension_numbers<[1], [0], [0], [1], [0, 0, 1, 1], [], []>} : vector<8x32xbf16>, vector<32x128xbf16>, vector<8x128xf32> -> vector<8x128xf32>
    %169 = arith.addf %167, %168 : vector<8x128xf32>
    %170 = arith.negf %169 : vector<8x128xf32>
    %171 = math.exp %170 : vector<8x128xf32>
    %cst_57 = arith.constant 1.000000e+00 : f32
    %172 = vector.broadcast %cst_57 : f32 to vector<8x128xf32>
    %173 = arith.addf %172, %171 : vector<8x128xf32>
    %174 = arith.divf %172, %173 : vector<8x128xf32>
    %175 = math.tanh %169 : vector<8x128xf32>
    %176 = vector.extract_strided_slice %174 {offsets = [0, 0], sizes = [8, 32], strides = [1, 1]} : vector<8x128xf32> to vector<8x32xf32>
    %177 = vector.extract_strided_slice %174 {offsets = [0, 32], sizes = [8, 32], strides = [1, 1]} : vector<8x128xf32> to vector<8x32xf32>
    %178 = vector.extract_strided_slice %175 {offsets = [0, 64], sizes = [8, 32], strides = [1, 1]} : vector<8x128xf32> to vector<8x32xf32>
    %179 = vector.extract_strided_slice %174 {offsets = [0, 96], sizes = [8, 32], strides = [1, 1]} : vector<8x128xf32> to vector<8x32xf32>
    %180 = arith.mulf %177, %163 : vector<8x32xf32>
    %181 = arith.mulf %176, %178 : vector<8x32xf32>
    %182 = arith.addf %180, %181 : vector<8x32xf32>
    %183 = math.tanh %182 : vector<8x32xf32>
    %184 = arith.mulf %179, %183 : vector<8x32xf32>
    %185 = arith.truncf %184 : vector<8x32xf32> to vector<8x32xbf16>
    %c24_58 = arith.constant 24 : index
    %c0_59 = arith.constant 0 : index
    %186 = vector.load %arg10[%c24_58, %c0_59] : memref<48x128xf32, #tpu.memory_space<vmem>>, vector<8x128xf32>
    %cst_60 = arith.constant dense<0.000000e+00> : vector<8x128xf32>
    %187 = tpu.matmul %185, %121, %cst_60 {dimension_numbers = #tpu.dot_dimension_numbers<[1], [0], [0], [1], [0, 0, 1, 1], [], []>} : vector<8x32xbf16>, vector<32x128xbf16>, vector<8x128xf32> -> vector<8x128xf32>
    %188 = arith.addf %186, %187 : vector<8x128xf32>
    %189 = arith.negf %188 : vector<8x128xf32>
    %190 = math.exp %189 : vector<8x128xf32>
    %cst_61 = arith.constant 1.000000e+00 : f32
    %191 = vector.broadcast %cst_61 : f32 to vector<8x128xf32>
    %192 = arith.addf %191, %190 : vector<8x128xf32>
    %193 = arith.divf %191, %192 : vector<8x128xf32>
    %194 = math.tanh %188 : vector<8x128xf32>
    %195 = vector.extract_strided_slice %193 {offsets = [0, 0], sizes = [8, 32], strides = [1, 1]} : vector<8x128xf32> to vector<8x32xf32>
    %196 = vector.extract_strided_slice %193 {offsets = [0, 32], sizes = [8, 32], strides = [1, 1]} : vector<8x128xf32> to vector<8x32xf32>
    %197 = vector.extract_strided_slice %194 {offsets = [0, 64], sizes = [8, 32], strides = [1, 1]} : vector<8x128xf32> to vector<8x32xf32>
    %198 = vector.extract_strided_slice %193 {offsets = [0, 96], sizes = [8, 32], strides = [1, 1]} : vector<8x128xf32> to vector<8x32xf32>
    %199 = arith.mulf %196, %182 : vector<8x32xf32>
    %200 = arith.mulf %195, %197 : vector<8x32xf32>
    %201 = arith.addf %199, %200 : vector<8x32xf32>
    %202 = math.tanh %201 : vector<8x32xf32>
    %203 = arith.mulf %198, %202 : vector<8x32xf32>
    %204 = arith.truncf %203 : vector<8x32xf32> to vector<8x32xbf16>
    %c32_62 = arith.constant 32 : index
    %c0_63 = arith.constant 0 : index
    %205 = vector.load %arg10[%c32_62, %c0_63] : memref<48x128xf32, #tpu.memory_space<vmem>>, vector<8x128xf32>
    %cst_64 = arith.constant dense<0.000000e+00> : vector<8x128xf32>
    %206 = tpu.matmul %204, %121, %cst_64 {dimension_numbers = #tpu.dot_dimension_numbers<[1], [0], [0], [1], [0, 0, 1, 1], [], []>} : vector<8x32xbf16>, vector<32x128xbf16>, vector<8x128xf32> -> vector<8x128xf32>
    %207 = arith.addf %205, %206 : vector<8x128xf32>
    %208 = arith.negf %207 : vector<8x128xf32>
    %209 = math.exp %208 : vector<8x128xf32>
    %cst_65 = arith.constant 1.000000e+00 : f32
    %210 = vector.broadcast %cst_65 : f32 to vector<8x128xf32>
    %211 = arith.addf %210, %209 : vector<8x128xf32>
    %212 = arith.divf %210, %211 : vector<8x128xf32>
    %213 = math.tanh %207 : vector<8x128xf32>
    %214 = vector.extract_strided_slice %212 {offsets = [0, 0], sizes = [8, 32], strides = [1, 1]} : vector<8x128xf32> to vector<8x32xf32>
    %215 = vector.extract_strided_slice %212 {offsets = [0, 32], sizes = [8, 32], strides = [1, 1]} : vector<8x128xf32> to vector<8x32xf32>
    %216 = vector.extract_strided_slice %213 {offsets = [0, 64], sizes = [8, 32], strides = [1, 1]} : vector<8x128xf32> to vector<8x32xf32>
    %217 = vector.extract_strided_slice %212 {offsets = [0, 96], sizes = [8, 32], strides = [1, 1]} : vector<8x128xf32> to vector<8x32xf32>
    %218 = arith.mulf %215, %201 : vector<8x32xf32>
    %219 = arith.mulf %214, %216 : vector<8x32xf32>
    %220 = arith.addf %218, %219 : vector<8x32xf32>
    %221 = math.tanh %220 : vector<8x32xf32>
    %222 = arith.mulf %217, %221 : vector<8x32xf32>
    %223 = arith.truncf %222 : vector<8x32xf32> to vector<8x32xbf16>
    %c40_66 = arith.constant 40 : index
    %c0_67 = arith.constant 0 : index
    %224 = vector.load %arg10[%c40_66, %c0_67] : memref<48x128xf32, #tpu.memory_space<vmem>>, vector<8x128xf32>
    %cst_68 = arith.constant dense<0.000000e+00> : vector<8x128xf32>
    %225 = tpu.matmul %223, %121, %cst_68 {dimension_numbers = #tpu.dot_dimension_numbers<[1], [0], [0], [1], [0, 0, 1, 1], [], []>} : vector<8x32xbf16>, vector<32x128xbf16>, vector<8x128xf32> -> vector<8x128xf32>
    %226 = arith.addf %224, %225 : vector<8x128xf32>
    %227 = arith.negf %226 : vector<8x128xf32>
    %228 = math.exp %227 : vector<8x128xf32>
    %cst_69 = arith.constant 1.000000e+00 : f32
    %229 = vector.broadcast %cst_69 : f32 to vector<8x128xf32>
    %230 = arith.addf %229, %228 : vector<8x128xf32>
    %231 = arith.divf %229, %230 : vector<8x128xf32>
    %232 = math.tanh %226 : vector<8x128xf32>
    %233 = vector.extract_strided_slice %231 {offsets = [0, 0], sizes = [8, 32], strides = [1, 1]} : vector<8x128xf32> to vector<8x32xf32>
    %234 = vector.extract_strided_slice %231 {offsets = [0, 32], sizes = [8, 32], strides = [1, 1]} : vector<8x128xf32> to vector<8x32xf32>
    %235 = vector.extract_strided_slice %232 {offsets = [0, 64], sizes = [8, 32], strides = [1, 1]} : vector<8x128xf32> to vector<8x32xf32>
    %236 = vector.extract_strided_slice %231 {offsets = [0, 96], sizes = [8, 32], strides = [1, 1]} : vector<8x128xf32> to vector<8x32xf32>
    %237 = arith.mulf %234, %220 : vector<8x32xf32>
    %238 = arith.mulf %233, %235 : vector<8x32xf32>
    %239 = arith.addf %237, %238 : vector<8x32xf32>
    %240 = math.tanh %239 : vector<8x32xf32>
    %241 = arith.mulf %236, %240 : vector<8x32xf32>
    %242 = arith.truncf %241 : vector<8x32xf32> to vector<8x32xbf16>
    %c0_70 = arith.constant 0 : index
    %c0_71 = arith.constant 0 : index
    %243 = vector.load %arg6[%c0_70, %c0_71] : memref<32x132xbf16, #tpu.memory_space<vmem>>, vector<32x132xbf16>
    %cst_72 = arith.constant dense<0.000000e+00> : vector<8x132xf32>
    %244 = tpu.matmul %242, %243, %cst_72 {dimension_numbers = #tpu.dot_dimension_numbers<[1], [0], [0], [1], [0, 0, 1, 1], [], []>} : vector<8x32xbf16>, vector<32x132xbf16>, vector<8x132xf32> -> vector<8x132xf32>
    %c0_73 = arith.constant 0 : index
    %c0_74 = arith.constant 0 : index
    %245 = vector.load %arg7[%c0_73, %c0_74] : memref<1x132xf32, #tpu.memory_space<vmem>>, vector<1x132xf32>
    %246 = vector.broadcast %245 : vector<1x132xf32> to vector<8x132xf32>
    %247 = arith.addf %244, %246 : vector<8x132xf32>
    %c0_75 = arith.constant 0 : index
    %c0_76 = arith.constant 0 : index
    %248 = vector.load %arg8[%c0_75, %c0_76] : memref<32x132xf32, #tpu.memory_space<vmem>>, vector<8x132xf32>
    tpu.vector_store %arg8[%c0_75, %c0_76], %247 {strides = array<i32>} : memref<32x132xf32, #tpu.memory_space<vmem>>, vector<8x132xf32>,
    %249 = vector.extract_strided_slice %247 {offsets = [0, 0], sizes = [8, 128], strides = [1, 1]} : vector<8x132xf32> to vector<8x128xf32>
    %c48 = arith.constant 48 : index
    %c0_77 = arith.constant 0 : index
    %250 = vector.load %arg9[%c48, %c0_77] : memref<72x128xf32, #tpu.memory_space<vmem>>, vector<8x128xf32>
    tpu.vector_store %arg9[%c48, %c0_77], %249 {strides = array<i32>} : memref<72x128xf32, #tpu.memory_space<vmem>>, vector<8x128xf32>,
    %c0_78 = arith.constant 0 : index
    %c0_79 = arith.constant 0 : index
    %251 = vector.load %arg2[%c0_78, %c0_79] : memref<32x128xbf16, #tpu.memory_space<vmem>>, vector<32x128xbf16>
    %cst_80 = arith.constant 0.000000e+00 : f32
    %252 = vector.broadcast %cst_80 : f32 to vector<8x32xf32>
    %c16_81 = arith.constant 16 : index
    %c0_82 = arith.constant 0 : index
    %253 = vector.load %arg9[%c16_81, %c0_82] : memref<72x128xf32, #tpu.memory_space<vmem>>, vector<8x128xf32>
    %254 = arith.negf %253 : vector<8x128xf32>
    %255 = math.exp %254 : vector<8x128xf32>
    %cst_83 = arith.constant 1.000000e+00 : f32
    %256 = vector.broadcast %cst_83 : f32 to vector<8x128xf32>
    %257 = arith.addf %256, %255 : vector<8x128xf32>
    %258 = arith.divf %256, %257 : vector<8x128xf32>
    %259 = math.tanh %253 : vector<8x128xf32>
    %260 = vector.extract_strided_slice %258 {offsets = [0, 0], sizes = [8, 32], strides = [1, 1]} : vector<8x128xf32> to vector<8x32xf32>
    %261 = vector.extract_strided_slice %258 {offsets = [0, 32], sizes = [8, 32], strides = [1, 1]} : vector<8x128xf32> to vector<8x32xf32>
    %262 = vector.extract_strided_slice %259 {offsets = [0, 64], sizes = [8, 32], strides = [1, 1]} : vector<8x128xf32> to vector<8x32xf32>
    %263 = vector.extract_strided_slice %258 {offsets = [0, 96], sizes = [8, 32], strides = [1, 1]} : vector<8x128xf32> to vector<8x32xf32>
    %264 = arith.mulf %261, %252 : vector<8x32xf32>
    %265 = arith.mulf %260, %262 : vector<8x32xf32>
    %266 = arith.addf %264, %265 : vector<8x32xf32>
    %267 = math.tanh %266 : vector<8x32xf32>
    %268 = arith.mulf %263, %267 : vector<8x32xf32>
    %269 = arith.truncf %268 : vector<8x32xf32> to vector<8x32xbf16>
    %c0_84 = arith.constant 0 : index
    %c0_85 = arith.constant 0 : index
    %270 = vector.load %arg11[%c0_84, %c0_85] : memref<48x32xf32, #tpu.memory_space<vmem>>, vector<8x32xf32>
    tpu.vector_store %arg11[%c0_84, %c0_85], %268 {strides = array<i32>} : memref<48x32xf32, #tpu.memory_space<vmem>>, vector<8x32xf32>,
    %c24_86 = arith.constant 24 : index
    %c0_87 = arith.constant 0 : index
    %271 = vector.load %arg9[%c24_86, %c0_87] : memref<72x128xf32, #tpu.memory_space<vmem>>, vector<8x128xf32>
    %cst_88 = arith.constant dense<0.000000e+00> : vector<8x128xf32>
    %272 = tpu.matmul %269, %251, %cst_88 {dimension_numbers = #tpu.dot_dimension_numbers<[1], [0], [0], [1], [0, 0, 1, 1], [], []>} : vector<8x32xbf16>, vector<32x128xbf16>, vector<8x128xf32> -> vector<8x128xf32>
    %273 = arith.addf %271, %272 : vector<8x128xf32>
    %274 = arith.negf %273 : vector<8x128xf32>
    %275 = math.exp %274 : vector<8x128xf32>
    %cst_89 = arith.constant 1.000000e+00 : f32
    %276 = vector.broadcast %cst_89 : f32 to vector<8x128xf32>
    %277 = arith.addf %276, %275 : vector<8x128xf32>
    %278 = arith.divf %276, %277 : vector<8x128xf32>
    %279 = math.tanh %273 : vector<8x128xf32>
    %280 = vector.extract_strided_slice %278 {offsets = [0, 0], sizes = [8, 32], strides = [1, 1]} : vector<8x128xf32> to vector<8x32xf32>
    %281 = vector.extract_strided_slice %278 {offsets = [0, 32], sizes = [8, 32], strides = [1, 1]} : vector<8x128xf32> to vector<8x32xf32>
    %282 = vector.extract_strided_slice %279 {offsets = [0, 64], sizes = [8, 32], strides = [1, 1]} : vector<8x128xf32> to vector<8x32xf32>
    %283 = vector.extract_strided_slice %278 {offsets = [0, 96], sizes = [8, 32], strides = [1, 1]} : vector<8x128xf32> to vector<8x32xf32>
    %284 = arith.mulf %281, %266 : vector<8x32xf32>
    %285 = arith.mulf %280, %282 : vector<8x32xf32>
    %286 = arith.addf %284, %285 : vector<8x32xf32>
    %287 = math.tanh %286 : vector<8x32xf32>
    %288 = arith.mulf %283, %287 : vector<8x32xf32>
    %289 = arith.truncf %288 : vector<8x32xf32> to vector<8x32xbf16>
    %c8_90 = arith.constant 8 : index
    %c0_91 = arith.constant 0 : index
    %290 = vector.load %arg11[%c8_90, %c0_91] : memref<48x32xf32, #tpu.memory_space<vmem>>, vector<8x32xf32>
    tpu.vector_store %arg11[%c8_90, %c0_91], %288 {strides = array<i32>} : memref<48x32xf32, #tpu.memory_space<vmem>>, vector<8x32xf32>,
    %c32_92 = arith.constant 32 : index
    %c0_93 = arith.constant 0 : index
    %291 = vector.load %arg9[%c32_92, %c0_93] : memref<72x128xf32, #tpu.memory_space<vmem>>, vector<8x128xf32>
    %cst_94 = arith.constant dense<0.000000e+00> : vector<8x128xf32>
    %292 = tpu.matmul %289, %251, %cst_94 {dimension_numbers = #tpu.dot_dimension_numbers<[1], [0], [0], [1], [0, 0, 1, 1], [], []>} : vector<8x32xbf16>, vector<32x128xbf16>, vector<8x128xf32> -> vector<8x128xf32>
    %293 = arith.addf %291, %292 : vector<8x128xf32>
    %294 = arith.negf %293 : vector<8x128xf32>
    %295 = math.exp %294 : vector<8x128xf32>
    %cst_95 = arith.constant 1.000000e+00 : f32
    %296 = vector.broadcast %cst_95 : f32 to vector<8x128xf32>
    %297 = arith.addf %296, %295 : vector<8x128xf32>
    %298 = arith.divf %296, %297 : vector<8x128xf32>
    %299 = math.tanh %293 : vector<8x128xf32>
    %300 = vector.extract_strided_slice %298 {offsets = [0, 0], sizes = [8, 32], strides = [1, 1]} : vector<8x128xf32> to vector<8x32xf32>
    %301 = vector.extract_strided_slice %298 {offsets = [0, 32], sizes = [8, 32], strides = [1, 1]} : vector<8x128xf32> to vector<8x32xf32>
    %302 = vector.extract_strided_slice %299 {offsets = [0, 64], sizes = [8, 32], strides = [1, 1]} : vector<8x128xf32> to vector<8x32xf32>
    %303 = vector.extract_strided_slice %298 {offsets = [0, 96], sizes = [8, 32], strides = [1, 1]} : vector<8x128xf32> to vector<8x32xf32>
    %304 = arith.mulf %301, %286 : vector<8x32xf32>
    %305 = arith.mulf %300, %302 : vector<8x32xf32>
    %306 = arith.addf %304, %305 : vector<8x32xf32>
    %307 = math.tanh %306 : vector<8x32xf32>
    %308 = arith.mulf %303, %307 : vector<8x32xf32>
    %309 = arith.truncf %308 : vector<8x32xf32> to vector<8x32xbf16>
    %c16_96 = arith.constant 16 : index
    %c0_97 = arith.constant 0 : index
    %310 = vector.load %arg11[%c16_96, %c0_97] : memref<48x32xf32, #tpu.memory_space<vmem>>, vector<8x32xf32>
    tpu.vector_store %arg11[%c16_96, %c0_97], %308 {strides = array<i32>} : memref<48x32xf32, #tpu.memory_space<vmem>>, vector<8x32xf32>,
    %c40_98 = arith.constant 40 : index
    %c0_99 = arith.constant 0 : index
    %311 = vector.load %arg9[%c40_98, %c0_99] : memref<72x128xf32, #tpu.memory_space<vmem>>, vector<8x128xf32>
    %cst_100 = arith.constant dense<0.000000e+00> : vector<8x128xf32>
    %312 = tpu.matmul %309, %251, %cst_100 {dimension_numbers = #tpu.dot_dimension_numbers<[1], [0], [0], [1], [0, 0, 1, 1], [], []>} : vector<8x32xbf16>, vector<32x128xbf16>, vector<8x128xf32> -> vector<8x128xf32>
    %313 = arith.addf %311, %312 : vector<8x128xf32>
    %314 = arith.negf %313 : vector<8x128xf32>
    %315 = math.exp %314 : vector<8x128xf32>
    %cst_101 = arith.constant 1.000000e+00 : f32
    %316 = vector.broadcast %cst_101 : f32 to vector<8x128xf32>
    %317 = arith.addf %316, %315 : vector<8x128xf32>
    %318 = arith.divf %316, %317 : vector<8x128xf32>
    %319 = math.tanh %313 : vector<8x128xf32>
    %320 = vector.extract_strided_slice %318 {offsets = [0, 0], sizes = [8, 32], strides = [1, 1]} : vector<8x128xf32> to vector<8x32xf32>
    %321 = vector.extract_strided_slice %318 {offsets = [0, 32], sizes = [8, 32], strides = [1, 1]} : vector<8x128xf32> to vector<8x32xf32>
    %322 = vector.extract_strided_slice %319 {offsets = [0, 64], sizes = [8, 32], strides = [1, 1]} : vector<8x128xf32> to vector<8x32xf32>
    %323 = vector.extract_strided_slice %318 {offsets = [0, 96], sizes = [8, 32], strides = [1, 1]} : vector<8x128xf32> to vector<8x32xf32>
    %324 = arith.mulf %321, %306 : vector<8x32xf32>
    %325 = arith.mulf %320, %322 : vector<8x32xf32>
    %326 = arith.addf %324, %325 : vector<8x32xf32>
    %327 = math.tanh %326 : vector<8x32xf32>
    %328 = arith.mulf %323, %327 : vector<8x32xf32>
    %329 = arith.truncf %328 : vector<8x32xf32> to vector<8x32xbf16>
    %c24_102 = arith.constant 24 : index
    %c0_103 = arith.constant 0 : index
    %330 = vector.load %arg11[%c24_102, %c0_103] : memref<48x32xf32, #tpu.memory_space<vmem>>, vector<8x32xf32>
    tpu.vector_store %arg11[%c24_102, %c0_103], %328 {strides = array<i32>} : memref<48x32xf32, #tpu.memory_space<vmem>>, vector<8x32xf32>,
    %c48_104 = arith.constant 48 : index
    %c0_105 = arith.constant 0 : index
    %331 = vector.load %arg9[%c48_104, %c0_105] : memref<72x128xf32, #tpu.memory_space<vmem>>, vector<8x128xf32>
    %cst_106 = arith.constant dense<0.000000e+00> : vector<8x128xf32>
    %332 = tpu.matmul %329, %251, %cst_106 {dimension_numbers = #tpu.dot_dimension_numbers<[1], [0], [0], [1], [0, 0, 1, 1], [], []>} : vector<8x32xbf16>, vector<32x128xbf16>, vector<8x128xf32> -> vector<8x128xf32>
    %333 = arith.addf %331, %332 : vector<8x128xf32>
    %334 = arith.negf %333 : vector<8x128xf32>
    %335 = math.exp %334 : vector<8x128xf32>
    %cst_107 = arith.constant 1.000000e+00 : f32
    %336 = vector.broadcast %cst_107 : f32 to vector<8x128xf32>
    %337 = arith.addf %336, %335 : vector<8x128xf32>
    %338 = arith.divf %336, %337 : vector<8x128xf32>
    %339 = math.tanh %333 : vector<8x128xf32>
    %340 = vector.extract_strided_slice %338 {offsets = [0, 0], sizes = [8, 32], strides = [1, 1]} : vector<8x128xf32> to vector<8x32xf32>
    %341 = vector.extract_strided_slice %338 {offsets = [0, 32], sizes = [8, 32], strides = [1, 1]} : vector<8x128xf32> to vector<8x32xf32>
    %342 = vector.extract_strided_slice %339 {offsets = [0, 64], sizes = [8, 32], strides = [1, 1]} : vector<8x128xf32> to vector<8x32xf32>
    %343 = vector.extract_strided_slice %338 {offsets = [0, 96], sizes = [8, 32], strides = [1, 1]} : vector<8x128xf32> to vector<8x32xf32>
    %344 = arith.mulf %341, %326 : vector<8x32xf32>
    %345 = arith.mulf %340, %342 : vector<8x32xf32>
    %346 = arith.addf %344, %345 : vector<8x32xf32>
    %347 = math.tanh %346 : vector<8x32xf32>
    %348 = arith.mulf %343, %347 : vector<8x32xf32>
    %c32_108 = arith.constant 32 : index
    %c0_109 = arith.constant 0 : index
    %349 = vector.load %arg11[%c32_108, %c0_109] : memref<48x32xf32, #tpu.memory_space<vmem>>, vector<8x32xf32>
    tpu.vector_store %arg11[%c32_108, %c0_109], %348 {strides = array<i32>} : memref<48x32xf32, #tpu.memory_space<vmem>>, vector<8x32xf32>,
    %c0_110 = arith.constant 0 : index
    %c0_111 = arith.constant 0 : index
    %350 = vector.load %arg4[%c0_110, %c0_111] : memref<32x128xbf16, #tpu.memory_space<vmem>>, vector<32x128xbf16>
    %c0_112 = arith.constant 0 : index
    %c0_113 = arith.constant 0 : index
    %351 = vector.load %arg11[%c0_112, %c0_113] : memref<48x32xf32, #tpu.memory_space<vmem>>, vector<40x32xf32>
    %352 = arith.truncf %351 : vector<40x32xf32> to vector<40x32xbf16>
    %c0_114 = arith.constant 0 : index
    %c0_115 = arith.constant 0 : index
    %353 = vector.load %arg3[%c0_114, %c0_115] : memref<32x128xbf16, #tpu.memory_space<vmem>>, vector<32x128xbf16>
    %cst_116 = arith.constant dense<0.000000e+00> : vector<40x128xf32>
    %354 = tpu.matmul %352, %353, %cst_116 {dimension_numbers = #tpu.dot_dimension_numbers<[1], [0], [0], [1], [0, 0, 1, 1], [], []>} : vector<40x32xbf16>, vector<32x128xbf16>, vector<40x128xf32> -> vector<40x128xf32>
    %c0_117 = arith.constant 0 : index
    %c0_118 = arith.constant 0 : index
    %355 = vector.load %arg5[%c0_117, %c0_118] : memref<1x128xf32, #tpu.memory_space<vmem>>, vector<1x128xf32>
    %356 = vector.broadcast %355 : vector<1x128xf32> to vector<40x128xf32>
    %357 = arith.addf %354, %356 : vector<40x128xf32>
    %c0_119 = arith.constant 0 : index
    %c0_120 = arith.constant 0 : index
    %358 = vector.load %arg10[%c0_119, %c0_120] : memref<48x128xf32, #tpu.memory_space<vmem>>, vector<40x128xf32>
    tpu.vector_store %arg10[%c0_119, %c0_120], %357 {strides = array<i32>} : memref<48x128xf32, #tpu.memory_space<vmem>>, vector<40x128xf32>,
    %cst_121 = arith.constant 0.000000e+00 : f32
    %359 = vector.broadcast %cst_121 : f32 to vector<8x32xf32>
    %c0_122 = arith.constant 0 : index
    %c0_123 = arith.constant 0 : index
    %360 = vector.load %arg10[%c0_122, %c0_123] : memref<48x128xf32, #tpu.memory_space<vmem>>, vector<8x128xf32>
    %361 = arith.negf %360 : vector<8x128xf32>
    %362 = math.exp %361 : vector<8x128xf32>
    %cst_124 = arith.constant 1.000000e+00 : f32
    %363 = vector.broadcast %cst_124 : f32 to vector<8x128xf32>
    %364 = arith.addf %363, %362 : vector<8x128xf32>
    %365 = arith.divf %363, %364 : vector<8x128xf32>
    %366 = math.tanh %360 : vector<8x128xf32>
    %367 = vector.extract_strided_slice %365 {offsets = [0, 0], sizes = [8, 32], strides = [1, 1]} : vector<8x128xf32> to vector<8x32xf32>
    %368 = vector.extract_strided_slice %365 {offsets = [0, 32], sizes = [8, 32], strides = [1, 1]} : vector<8x128xf32> to vector<8x32xf32>
    %369 = vector.extract_strided_slice %366 {offsets = [0, 64], sizes = [8, 32], strides = [1, 1]} : vector<8x128xf32> to vector<8x32xf32>
    %370 = vector.extract_strided_slice %365 {offsets = [0, 96], sizes = [8, 32], strides = [1, 1]} : vector<8x128xf32> to vector<8x32xf32>
    %371 = arith.mulf %368, %359 : vector<8x32xf32>
    %372 = arith.mulf %367, %369 : vector<8x32xf32>
    %373 = arith.addf %371, %372 : vector<8x32xf32>
    %374 = math.tanh %373 : vector<8x32xf32>
    %375 = arith.mulf %370, %374 : vector<8x32xf32>
    %376 = arith.truncf %375 : vector<8x32xf32> to vector<8x32xbf16>
    %c8_125 = arith.constant 8 : index
    %c0_126 = arith.constant 0 : index
    %377 = vector.load %arg10[%c8_125, %c0_126] : memref<48x128xf32, #tpu.memory_space<vmem>>, vector<8x128xf32>
    %cst_127 = arith.constant dense<0.000000e+00> : vector<8x128xf32>
    %378 = tpu.matmul %376, %350, %cst_127 {dimension_numbers = #tpu.dot_dimension_numbers<[1], [0], [0], [1], [0, 0, 1, 1], [], []>} : vector<8x32xbf16>, vector<32x128xbf16>, vector<8x128xf32> -> vector<8x128xf32>
    %379 = arith.addf %377, %378 : vector<8x128xf32>
    %380 = arith.negf %379 : vector<8x128xf32>
    %381 = math.exp %380 : vector<8x128xf32>
    %cst_128 = arith.constant 1.000000e+00 : f32
    %382 = vector.broadcast %cst_128 : f32 to vector<8x128xf32>
    %383 = arith.addf %382, %381 : vector<8x128xf32>
    %384 = arith.divf %382, %383 : vector<8x128xf32>
    %385 = math.tanh %379 : vector<8x128xf32>
    %386 = vector.extract_strided_slice %384 {offsets = [0, 0], sizes = [8, 32], strides = [1, 1]} : vector<8x128xf32> to vector<8x32xf32>
    %387 = vector.extract_strided_slice %384 {offsets = [0, 32], sizes = [8, 32], strides = [1, 1]} : vector<8x128xf32> to vector<8x32xf32>
    %388 = vector.extract_strided_slice %385 {offsets = [0, 64], sizes = [8, 32], strides = [1, 1]} : vector<8x128xf32> to vector<8x32xf32>
    %389 = vector.extract_strided_slice %384 {offsets = [0, 96], sizes = [8, 32], strides = [1, 1]} : vector<8x128xf32> to vector<8x32xf32>
    %390 = arith.mulf %387, %373 : vector<8x32xf32>
    %391 = arith.mulf %386, %388 : vector<8x32xf32>
    %392 = arith.addf %390, %391 : vector<8x32xf32>
    %393 = math.tanh %392 : vector<8x32xf32>
    %394 = arith.mulf %389, %393 : vector<8x32xf32>
    %395 = arith.truncf %394 : vector<8x32xf32> to vector<8x32xbf16>
    %c16_129 = arith.constant 16 : index
    %c0_130 = arith.constant 0 : index
    %396 = vector.load %arg10[%c16_129, %c0_130] : memref<48x128xf32, #tpu.memory_space<vmem>>, vector<8x128xf32>
    %cst_131 = arith.constant dense<0.000000e+00> : vector<8x128xf32>
    %397 = tpu.matmul %395, %350, %cst_131 {dimension_numbers = #tpu.dot_dimension_numbers<[1], [0], [0], [1], [0, 0, 1, 1], [], []>} : vector<8x32xbf16>, vector<32x128xbf16>, vector<8x128xf32> -> vector<8x128xf32>
    %398 = arith.addf %396, %397 : vector<8x128xf32>
    %399 = arith.negf %398 : vector<8x128xf32>
    %400 = math.exp %399 : vector<8x128xf32>
    %cst_132 = arith.constant 1.000000e+00 : f32
    %401 = vector.broadcast %cst_132 : f32 to vector<8x128xf32>
    %402 = arith.addf %401, %400 : vector<8x128xf32>
    %403 = arith.divf %401, %402 : vector<8x128xf32>
    %404 = math.tanh %398 : vector<8x128xf32>
    %405 = vector.extract_strided_slice %403 {offsets = [0, 0], sizes = [8, 32], strides = [1, 1]} : vector<8x128xf32> to vector<8x32xf32>
    %406 = vector.extract_strided_slice %403 {offsets = [0, 32], sizes = [8, 32], strides = [1, 1]} : vector<8x128xf32> to vector<8x32xf32>
    %407 = vector.extract_strided_slice %404 {offsets = [0, 64], sizes = [8, 32], strides = [1, 1]} : vector<8x128xf32> to vector<8x32xf32>
    %408 = vector.extract_strided_slice %403 {offsets = [0, 96], sizes = [8, 32], strides = [1, 1]} : vector<8x128xf32> to vector<8x32xf32>
    %409 = arith.mulf %406, %392 : vector<8x32xf32>
    %410 = arith.mulf %405, %407 : vector<8x32xf32>
    %411 = arith.addf %409, %410 : vector<8x32xf32>
    %412 = math.tanh %411 : vector<8x32xf32>
    %413 = arith.mulf %408, %412 : vector<8x32xf32>
    %414 = arith.truncf %413 : vector<8x32xf32> to vector<8x32xbf16>
    %c24_133 = arith.constant 24 : index
    %c0_134 = arith.constant 0 : index
    %415 = vector.load %arg10[%c24_133, %c0_134] : memref<48x128xf32, #tpu.memory_space<vmem>>, vector<8x128xf32>
    %cst_135 = arith.constant dense<0.000000e+00> : vector<8x128xf32>
    %416 = tpu.matmul %414, %350, %cst_135 {dimension_numbers = #tpu.dot_dimension_numbers<[1], [0], [0], [1], [0, 0, 1, 1], [], []>} : vector<8x32xbf16>, vector<32x128xbf16>, vector<8x128xf32> -> vector<8x128xf32>
    %417 = arith.addf %415, %416 : vector<8x128xf32>
    %418 = arith.negf %417 : vector<8x128xf32>
    %419 = math.exp %418 : vector<8x128xf32>
    %cst_136 = arith.constant 1.000000e+00 : f32
    %420 = vector.broadcast %cst_136 : f32 to vector<8x128xf32>
    %421 = arith.addf %420, %419 : vector<8x128xf32>
    %422 = arith.divf %420, %421 : vector<8x128xf32>
    %423 = math.tanh %417 : vector<8x128xf32>
    %424 = vector.extract_strided_slice %422 {offsets = [0, 0], sizes = [8, 32], strides = [1, 1]} : vector<8x128xf32> to vector<8x32xf32>
    %425 = vector.extract_strided_slice %422 {offsets = [0, 32], sizes = [8, 32], strides = [1, 1]} : vector<8x128xf32> to vector<8x32xf32>
    %426 = vector.extract_strided_slice %423 {offsets = [0, 64], sizes = [8, 32], strides = [1, 1]} : vector<8x128xf32> to vector<8x32xf32>
    %427 = vector.extract_strided_slice %422 {offsets = [0, 96], sizes = [8, 32], strides = [1, 1]} : vector<8x128xf32> to vector<8x32xf32>
    %428 = arith.mulf %425, %411 : vector<8x32xf32>
    %429 = arith.mulf %424, %426 : vector<8x32xf32>
    %430 = arith.addf %428, %429 : vector<8x32xf32>
    %431 = math.tanh %430 : vector<8x32xf32>
    %432 = arith.mulf %427, %431 : vector<8x32xf32>
    %433 = arith.truncf %432 : vector<8x32xf32> to vector<8x32xbf16>
    %c32_137 = arith.constant 32 : index
    %c0_138 = arith.constant 0 : index
    %434 = vector.load %arg10[%c32_137, %c0_138] : memref<48x128xf32, #tpu.memory_space<vmem>>, vector<8x128xf32>
    %cst_139 = arith.constant dense<0.000000e+00> : vector<8x128xf32>
    %435 = tpu.matmul %433, %350, %cst_139 {dimension_numbers = #tpu.dot_dimension_numbers<[1], [0], [0], [1], [0, 0, 1, 1], [], []>} : vector<8x32xbf16>, vector<32x128xbf16>, vector<8x128xf32> -> vector<8x128xf32>
    %436 = arith.addf %434, %435 : vector<8x128xf32>
    %437 = arith.negf %436 : vector<8x128xf32>
    %438 = math.exp %437 : vector<8x128xf32>
    %cst_140 = arith.constant 1.000000e+00 : f32
    %439 = vector.broadcast %cst_140 : f32 to vector<8x128xf32>
    %440 = arith.addf %439, %438 : vector<8x128xf32>
    %441 = arith.divf %439, %440 : vector<8x128xf32>
    %442 = math.tanh %436 : vector<8x128xf32>
    %443 = vector.extract_strided_slice %441 {offsets = [0, 0], sizes = [8, 32], strides = [1, 1]} : vector<8x128xf32> to vector<8x32xf32>
    %444 = vector.extract_strided_slice %441 {offsets = [0, 32], sizes = [8, 32], strides = [1, 1]} : vector<8x128xf32> to vector<8x32xf32>
    %445 = vector.extract_strided_slice %442 {offsets = [0, 64], sizes = [8, 32], strides = [1, 1]} : vector<8x128xf32> to vector<8x32xf32>
    %446 = vector.extract_strided_slice %441 {offsets = [0, 96], sizes = [8, 32], strides = [1, 1]} : vector<8x128xf32> to vector<8x32xf32>
    %447 = arith.mulf %444, %430 : vector<8x32xf32>
    %448 = arith.mulf %443, %445 : vector<8x32xf32>
    %449 = arith.addf %447, %448 : vector<8x32xf32>
    %450 = math.tanh %449 : vector<8x32xf32>
    %451 = arith.mulf %446, %450 : vector<8x32xf32>
    %452 = arith.truncf %451 : vector<8x32xf32> to vector<8x32xbf16>
    %c0_141 = arith.constant 0 : index
    %c0_142 = arith.constant 0 : index
    %453 = vector.load %arg6[%c0_141, %c0_142] : memref<32x132xbf16, #tpu.memory_space<vmem>>, vector<32x132xbf16>
    %cst_143 = arith.constant dense<0.000000e+00> : vector<8x132xf32>
    %454 = tpu.matmul %452, %453, %cst_143 {dimension_numbers = #tpu.dot_dimension_numbers<[1], [0], [0], [1], [0, 0, 1, 1], [], []>} : vector<8x32xbf16>, vector<32x132xbf16>, vector<8x132xf32> -> vector<8x132xf32>
    %c0_144 = arith.constant 0 : index
    %c0_145 = arith.constant 0 : index
    %455 = vector.load %arg7[%c0_144, %c0_145] : memref<1x132xf32, #tpu.memory_space<vmem>>, vector<1x132xf32>
    %456 = vector.broadcast %455 : vector<1x132xf32> to vector<8x132xf32>
    %457 = arith.addf %454, %456 : vector<8x132xf32>
    %c8_146 = arith.constant 8 : index
    %c0_147 = arith.constant 0 : index
    %458 = vector.load %arg8[%c8_146, %c0_147] : memref<32x132xf32, #tpu.memory_space<vmem>>, vector<8x132xf32>
    tpu.vector_store %arg8[%c8_146, %c0_147], %457 {strides = array<i32>} : memref<32x132xf32, #tpu.memory_space<vmem>>, vector<8x132xf32>,
    %459 = vector.extract_strided_slice %457 {offsets = [0, 0], sizes = [8, 128], strides = [1, 1]} : vector<8x132xf32> to vector<8x128xf32>
    %c56 = arith.constant 56 : index
    %c0_148 = arith.constant 0 : index
    %460 = vector.load %arg9[%c56, %c0_148] : memref<72x128xf32, #tpu.memory_space<vmem>>, vector<8x128xf32>
    tpu.vector_store %arg9[%c56, %c0_148], %459 {strides = array<i32>} : memref<72x128xf32, #tpu.memory_space<vmem>>, vector<8x128xf32>,
    %c0_149 = arith.constant 0 : index
    %c0_150 = arith.constant 0 : index
    %461 = vector.load %arg2[%c0_149, %c0_150] : memref<32x128xbf16, #tpu.memory_space<vmem>>, vector<32x128xbf16>
    %cst_151 = arith.constant 0.000000e+00 : f32
    %462 = vector.broadcast %cst_151 : f32 to vector<8x32xf32>
    %c32_152 = arith.constant 32 : index
    %c0_153 = arith.constant 0 : index
    %463 = vector.load %arg9[%c32_152, %c0_153] : memref<72x128xf32, #tpu.memory_space<vmem>>, vector<8x128xf32>
    %464 = arith.negf %463 : vector<8x128xf32>
    %465 = math.exp %464 : vector<8x128xf32>
    %cst_154 = arith.constant 1.000000e+00 : f32
    %466 = vector.broadcast %cst_154 : f32 to vector<8x128xf32>
    %467 = arith.addf %466, %465 : vector<8x128xf32>
    %468 = arith.divf %466, %467 : vector<8x128xf32>
    %469 = math.tanh %463 : vector<8x128xf32>
    %470 = vector.extract_strided_slice %468 {offsets = [0, 0], sizes = [8, 32], strides = [1, 1]} : vector<8x128xf32> to vector<8x32xf32>
    %471 = vector.extract_strided_slice %468 {offsets = [0, 32], sizes = [8, 32], strides = [1, 1]} : vector<8x128xf32> to vector<8x32xf32>
    %472 = vector.extract_strided_slice %469 {offsets = [0, 64], sizes = [8, 32], strides = [1, 1]} : vector<8x128xf32> to vector<8x32xf32>
    %473 = vector.extract_strided_slice %468 {offsets = [0, 96], sizes = [8, 32], strides = [1, 1]} : vector<8x128xf32> to vector<8x32xf32>
    %474 = arith.mulf %471, %462 : vector<8x32xf32>
    %475 = arith.mulf %470, %472 : vector<8x32xf32>
    %476 = arith.addf %474, %475 : vector<8x32xf32>
    %477 = math.tanh %476 : vector<8x32xf32>
    %478 = arith.mulf %473, %477 : vector<8x32xf32>
    %479 = arith.truncf %478 : vector<8x32xf32> to vector<8x32xbf16>
    %c0_155 = arith.constant 0 : index
    %c0_156 = arith.constant 0 : index
    %480 = vector.load %arg11[%c0_155, %c0_156] : memref<48x32xf32, #tpu.memory_space<vmem>>, vector<8x32xf32>
    tpu.vector_store %arg11[%c0_155, %c0_156], %478 {strides = array<i32>} : memref<48x32xf32, #tpu.memory_space<vmem>>, vector<8x32xf32>,
    %c40_157 = arith.constant 40 : index
    %c0_158 = arith.constant 0 : index
    %481 = vector.load %arg9[%c40_157, %c0_158] : memref<72x128xf32, #tpu.memory_space<vmem>>, vector<8x128xf32>
    %cst_159 = arith.constant dense<0.000000e+00> : vector<8x128xf32>
    %482 = tpu.matmul %479, %461, %cst_159 {dimension_numbers = #tpu.dot_dimension_numbers<[1], [0], [0], [1], [0, 0, 1, 1], [], []>} : vector<8x32xbf16>, vector<32x128xbf16>, vector<8x128xf32> -> vector<8x128xf32>
    %483 = arith.addf %481, %482 : vector<8x128xf32>
    %484 = arith.negf %483 : vector<8x128xf32>
    %485 = math.exp %484 : vector<8x128xf32>
    %cst_160 = arith.constant 1.000000e+00 : f32
    %486 = vector.broadcast %cst_160 : f32 to vector<8x128xf32>
    %487 = arith.addf %486, %485 : vector<8x128xf32>
    %488 = arith.divf %486, %487 : vector<8x128xf32>
    %489 = math.tanh %483 : vector<8x128xf32>
    %490 = vector.extract_strided_slice %488 {offsets = [0, 0], sizes = [8, 32], strides = [1, 1]} : vector<8x128xf32> to vector<8x32xf32>
    %491 = vector.extract_strided_slice %488 {offsets = [0, 32], sizes = [8, 32], strides = [1, 1]} : vector<8x128xf32> to vector<8x32xf32>
    %492 = vector.extract_strided_slice %489 {offsets = [0, 64], sizes = [8, 32], strides = [1, 1]} : vector<8x128xf32> to vector<8x32xf32>
    %493 = vector.extract_strided_slice %488 {offsets = [0, 96], sizes = [8, 32], strides = [1, 1]} : vector<8x128xf32> to vector<8x32xf32>
    %494 = arith.mulf %491, %476 : vector<8x32xf32>
    %495 = arith.mulf %490, %492 : vector<8x32xf32>
    %496 = arith.addf %494, %495 : vector<8x32xf32>
    %497 = math.tanh %496 : vector<8x32xf32>
    %498 = arith.mulf %493, %497 : vector<8x32xf32>
    %499 = arith.truncf %498 : vector<8x32xf32> to vector<8x32xbf16>
    %c8_161 = arith.constant 8 : index
    %c0_162 = arith.constant 0 : index
    %500 = vector.load %arg11[%c8_161, %c0_162] : memref<48x32xf32, #tpu.memory_space<vmem>>, vector<8x32xf32>
    tpu.vector_store %arg11[%c8_161, %c0_162], %498 {strides = array<i32>} : memref<48x32xf32, #tpu.memory_space<vmem>>, vector<8x32xf32>,
    %c48_163 = arith.constant 48 : index
    %c0_164 = arith.constant 0 : index
    %501 = vector.load %arg9[%c48_163, %c0_164] : memref<72x128xf32, #tpu.memory_space<vmem>>, vector<8x128xf32>
    %cst_165 = arith.constant dense<0.000000e+00> : vector<8x128xf32>
    %502 = tpu.matmul %499, %461, %cst_165 {dimension_numbers = #tpu.dot_dimension_numbers<[1], [0], [0], [1], [0, 0, 1, 1], [], []>} : vector<8x32xbf16>, vector<32x128xbf16>, vector<8x128xf32> -> vector<8x128xf32>
    %503 = arith.addf %501, %502 : vector<8x128xf32>
    %504 = arith.negf %503 : vector<8x128xf32>
    %505 = math.exp %504 : vector<8x128xf32>
    %cst_166 = arith.constant 1.000000e+00 : f32
    %506 = vector.broadcast %cst_166 : f32 to vector<8x128xf32>
    %507 = arith.addf %506, %505 : vector<8x128xf32>
    %508 = arith.divf %506, %507 : vector<8x128xf32>
    %509 = math.tanh %503 : vector<8x128xf32>
    %510 = vector.extract_strided_slice %508 {offsets = [0, 0], sizes = [8, 32], strides = [1, 1]} : vector<8x128xf32> to vector<8x32xf32>
    %511 = vector.extract_strided_slice %508 {offsets = [0, 32], sizes = [8, 32], strides = [1, 1]} : vector<8x128xf32> to vector<8x32xf32>
    %512 = vector.extract_strided_slice %509 {offsets = [0, 64], sizes = [8, 32], strides = [1, 1]} : vector<8x128xf32> to vector<8x32xf32>
    %513 = vector.extract_strided_slice %508 {offsets = [0, 96], sizes = [8, 32], strides = [1, 1]} : vector<8x128xf32> to vector<8x32xf32>
    %514 = arith.mulf %511, %496 : vector<8x32xf32>
    %515 = arith.mulf %510, %512 : vector<8x32xf32>
    %516 = arith.addf %514, %515 : vector<8x32xf32>
    %517 = math.tanh %516 : vector<8x32xf32>
    %518 = arith.mulf %513, %517 : vector<8x32xf32>
    %519 = arith.truncf %518 : vector<8x32xf32> to vector<8x32xbf16>
    %c16_167 = arith.constant 16 : index
    %c0_168 = arith.constant 0 : index
    %520 = vector.load %arg11[%c16_167, %c0_168] : memref<48x32xf32, #tpu.memory_space<vmem>>, vector<8x32xf32>
    tpu.vector_store %arg11[%c16_167, %c0_168], %518 {strides = array<i32>} : memref<48x32xf32, #tpu.memory_space<vmem>>, vector<8x32xf32>,
    %c56_169 = arith.constant 56 : index
    %c0_170 = arith.constant 0 : index
    %521 = vector.load %arg9[%c56_169, %c0_170] : memref<72x128xf32, #tpu.memory_space<vmem>>, vector<8x128xf32>
    %cst_171 = arith.constant dense<0.000000e+00> : vector<8x128xf32>
    %522 = tpu.matmul %519, %461, %cst_171 {dimension_numbers = #tpu.dot_dimension_numbers<[1], [0], [0], [1], [0, 0, 1, 1], [], []>} : vector<8x32xbf16>, vector<32x128xbf16>, vector<8x128xf32> -> vector<8x128xf32>
    %523 = arith.addf %521, %522 : vector<8x128xf32>
    %524 = arith.negf %523 : vector<8x128xf32>
    %525 = math.exp %524 : vector<8x128xf32>
    %cst_172 = arith.constant 1.000000e+00 : f32
    %526 = vector.broadcast %cst_172 : f32 to vector<8x128xf32>
    %527 = arith.addf %526, %525 : vector<8x128xf32>
    %528 = arith.divf %526, %527 : vector<8x128xf32>
    %529 = math.tanh %523 : vector<8x128xf32>
    %530 = vector.extract_strided_slice %528 {offsets = [0, 0], sizes = [8, 32], strides = [1, 1]} : vector<8x128xf32> to vector<8x32xf32>
    %531 = vector.extract_strided_slice %528 {offsets = [0, 32], sizes = [8, 32], strides = [1, 1]} : vector<8x128xf32> to vector<8x32xf32>
    %532 = vector.extract_strided_slice %529 {offsets = [0, 64], sizes = [8, 32], strides = [1, 1]} : vector<8x128xf32> to vector<8x32xf32>
    %533 = vector.extract_strided_slice %528 {offsets = [0, 96], sizes = [8, 32], strides = [1, 1]} : vector<8x128xf32> to vector<8x32xf32>
    %534 = arith.mulf %531, %516 : vector<8x32xf32>
    %535 = arith.mulf %530, %532 : vector<8x32xf32>
    %536 = arith.addf %534, %535 : vector<8x32xf32>
    %537 = math.tanh %536 : vector<8x32xf32>
    %538 = arith.mulf %533, %537 : vector<8x32xf32>
    %c24_173 = arith.constant 24 : index
    %c0_174 = arith.constant 0 : index
    %539 = vector.load %arg11[%c24_173, %c0_174] : memref<48x32xf32, #tpu.memory_space<vmem>>, vector<8x32xf32>
    tpu.vector_store %arg11[%c24_173, %c0_174], %538 {strides = array<i32>} : memref<48x32xf32, #tpu.memory_space<vmem>>, vector<8x32xf32>,
    %c0_175 = arith.constant 0 : index
    %c0_176 = arith.constant 0 : index
    %540 = vector.load %arg4[%c0_175, %c0_176] : memref<32x128xbf16, #tpu.memory_space<vmem>>, vector<32x128xbf16>
    %c0_177 = arith.constant 0 : index
    %c0_178 = arith.constant 0 : index
    %541 = vector.load %arg11[%c0_177, %c0_178] : memref<48x32xf32, #tpu.memory_space<vmem>>, vector<32x32xf32>
    %542 = arith.truncf %541 : vector<32x32xf32> to vector<32x32xbf16>
    %c0_179 = arith.constant 0 : index
    %c0_180 = arith.constant 0 : index
    %543 = vector.load %arg3[%c0_179, %c0_180] : memref<32x128xbf16, #tpu.memory_space<vmem>>, vector<32x128xbf16>
    %cst_181 = arith.constant dense<0.000000e+00> : vector<32x128xf32>
    %544 = tpu.matmul %542, %543, %cst_181 {dimension_numbers = #tpu.dot_dimension_numbers<[1], [0], [0], [1], [0, 0, 1, 1], [], []>} : vector<32x32xbf16>, vector<32x128xbf16>, vector<32x128xf32> -> vector<32x128xf32>
    %c0_182 = arith.constant 0 : index
    %c0_183 = arith.constant 0 : index
    %545 = vector.load %arg5[%c0_182, %c0_183] : memref<1x128xf32, #tpu.memory_space<vmem>>, vector<1x128xf32>
    %546 = vector.broadcast %545 : vector<1x128xf32> to vector<32x128xf32>
    %547 = arith.addf %544, %546 : vector<32x128xf32>
    %c0_184 = arith.constant 0 : index
    %c0_185 = arith.constant 0 : index
    %548 = vector.load %arg10[%c0_184, %c0_185] : memref<48x128xf32, #tpu.memory_space<vmem>>, vector<32x128xf32>
    tpu.vector_store %arg10[%c0_184, %c0_185], %547 {strides = array<i32>} : memref<48x128xf32, #tpu.memory_space<vmem>>, vector<32x128xf32>,
    %cst_186 = arith.constant 0.000000e+00 : f32
    %549 = vector.broadcast %cst_186 : f32 to vector<8x32xf32>
    %c0_187 = arith.constant 0 : index
    %c0_188 = arith.constant 0 : index
    %550 = vector.load %arg10[%c0_187, %c0_188] : memref<48x128xf32, #tpu.memory_space<vmem>>, vector<8x128xf32>
    %551 = arith.negf %550 : vector<8x128xf32>
    %552 = math.exp %551 : vector<8x128xf32>
    %cst_189 = arith.constant 1.000000e+00 : f32
    %553 = vector.broadcast %cst_189 : f32 to vector<8x128xf32>
    %554 = arith.addf %553, %552 : vector<8x128xf32>
    %555 = arith.divf %553, %554 : vector<8x128xf32>
    %556 = math.tanh %550 : vector<8x128xf32>
    %557 = vector.extract_strided_slice %555 {offsets = [0, 0], sizes = [8, 32], strides = [1, 1]} : vector<8x128xf32> to vector<8x32xf32>
    %558 = vector.extract_strided_slice %555 {offsets = [0, 32], sizes = [8, 32], strides = [1, 1]} : vector<8x128xf32> to vector<8x32xf32>
    %559 = vector.extract_strided_slice %556 {offsets = [0, 64], sizes = [8, 32], strides = [1, 1]} : vector<8x128xf32> to vector<8x32xf32>
    %560 = vector.extract_strided_slice %555 {offsets = [0, 96], sizes = [8, 32], strides = [1, 1]} : vector<8x128xf32> to vector<8x32xf32>
    %561 = arith.mulf %558, %549 : vector<8x32xf32>
    %562 = arith.mulf %557, %559 : vector<8x32xf32>
    %563 = arith.addf %561, %562 : vector<8x32xf32>
    %564 = math.tanh %563 : vector<8x32xf32>
    %565 = arith.mulf %560, %564 : vector<8x32xf32>
    %566 = arith.truncf %565 : vector<8x32xf32> to vector<8x32xbf16>
    %c8_190 = arith.constant 8 : index
    %c0_191 = arith.constant 0 : index
    %567 = vector.load %arg10[%c8_190, %c0_191] : memref<48x128xf32, #tpu.memory_space<vmem>>, vector<8x128xf32>
    %cst_192 = arith.constant dense<0.000000e+00> : vector<8x128xf32>
    %568 = tpu.matmul %566, %540, %cst_192 {dimension_numbers = #tpu.dot_dimension_numbers<[1], [0], [0], [1], [0, 0, 1, 1], [], []>} : vector<8x32xbf16>, vector<32x128xbf16>, vector<8x128xf32> -> vector<8x128xf32>
    %569 = arith.addf %567, %568 : vector<8x128xf32>
    %570 = arith.negf %569 : vector<8x128xf32>
    %571 = math.exp %570 : vector<8x128xf32>
    %cst_193 = arith.constant 1.000000e+00 : f32
    %572 = vector.broadcast %cst_193 : f32 to vector<8x128xf32>
    %573 = arith.addf %572, %571 : vector<8x128xf32>
    %574 = arith.divf %572, %573 : vector<8x128xf32>
    %575 = math.tanh %569 : vector<8x128xf32>
    %576 = vector.extract_strided_slice %574 {offsets = [0, 0], sizes = [8, 32], strides = [1, 1]} : vector<8x128xf32> to vector<8x32xf32>
    %577 = vector.extract_strided_slice %574 {offsets = [0, 32], sizes = [8, 32], strides = [1, 1]} : vector<8x128xf32> to vector<8x32xf32>
    %578 = vector.extract_strided_slice %575 {offsets = [0, 64], sizes = [8, 32], strides = [1, 1]} : vector<8x128xf32> to vector<8x32xf32>
    %579 = vector.extract_strided_slice %574 {offsets = [0, 96], sizes = [8, 32], strides = [1, 1]} : vector<8x128xf32> to vector<8x32xf32>
    %580 = arith.mulf %577, %563 : vector<8x32xf32>
    %581 = arith.mulf %576, %578 : vector<8x32xf32>
    %582 = arith.addf %580, %581 : vector<8x32xf32>
    %583 = math.tanh %582 : vector<8x32xf32>
    %584 = arith.mulf %579, %583 : vector<8x32xf32>
    %585 = arith.truncf %584 : vector<8x32xf32> to vector<8x32xbf16>
    %c16_194 = arith.constant 16 : index
    %c0_195 = arith.constant 0 : index
    %586 = vector.load %arg10[%c16_194, %c0_195] : memref<48x128xf32, #tpu.memory_space<vmem>>, vector<8x128xf32>
    %cst_196 = arith.constant dense<0.000000e+00> : vector<8x128xf32>
    %587 = tpu.matmul %585, %540, %cst_196 {dimension_numbers = #tpu.dot_dimension_numbers<[1], [0], [0], [1], [0, 0, 1, 1], [], []>} : vector<8x32xbf16>, vector<32x128xbf16>, vector<8x128xf32> -> vector<8x128xf32>
    %588 = arith.addf %586, %587 : vector<8x128xf32>
    %589 = arith.negf %588 : vector<8x128xf32>
    %590 = math.exp %589 : vector<8x128xf32>
    %cst_197 = arith.constant 1.000000e+00 : f32
    %591 = vector.broadcast %cst_197 : f32 to vector<8x128xf32>
    %592 = arith.addf %591, %590 : vector<8x128xf32>
    %593 = arith.divf %591, %592 : vector<8x128xf32>
    %594 = math.tanh %588 : vector<8x128xf32>
    %595 = vector.extract_strided_slice %593 {offsets = [0, 0], sizes = [8, 32], strides = [1, 1]} : vector<8x128xf32> to vector<8x32xf32>
    %596 = vector.extract_strided_slice %593 {offsets = [0, 32], sizes = [8, 32], strides = [1, 1]} : vector<8x128xf32> to vector<8x32xf32>
    %597 = vector.extract_strided_slice %594 {offsets = [0, 64], sizes = [8, 32], strides = [1, 1]} : vector<8x128xf32> to vector<8x32xf32>
    %598 = vector.extract_strided_slice %593 {offsets = [0, 96], sizes = [8, 32], strides = [1, 1]} : vector<8x128xf32> to vector<8x32xf32>
    %599 = arith.mulf %596, %582 : vector<8x32xf32>
    %600 = arith.mulf %595, %597 : vector<8x32xf32>
    %601 = arith.addf %599, %600 : vector<8x32xf32>
    %602 = math.tanh %601 : vector<8x32xf32>
    %603 = arith.mulf %598, %602 : vector<8x32xf32>
    %604 = arith.truncf %603 : vector<8x32xf32> to vector<8x32xbf16>
    %c24_198 = arith.constant 24 : index
    %c0_199 = arith.constant 0 : index
    %605 = vector.load %arg10[%c24_198, %c0_199] : memref<48x128xf32, #tpu.memory_space<vmem>>, vector<8x128xf32>
    %cst_200 = arith.constant dense<0.000000e+00> : vector<8x128xf32>
    %606 = tpu.matmul %604, %540, %cst_200 {dimension_numbers = #tpu.dot_dimension_numbers<[1], [0], [0], [1], [0, 0, 1, 1], [], []>} : vector<8x32xbf16>, vector<32x128xbf16>, vector<8x128xf32> -> vector<8x128xf32>
    %607 = arith.addf %605, %606 : vector<8x128xf32>
    %608 = arith.negf %607 : vector<8x128xf32>
    %609 = math.exp %608 : vector<8x128xf32>
    %cst_201 = arith.constant 1.000000e+00 : f32
    %610 = vector.broadcast %cst_201 : f32 to vector<8x128xf32>
    %611 = arith.addf %610, %609 : vector<8x128xf32>
    %612 = arith.divf %610, %611 : vector<8x128xf32>
    %613 = math.tanh %607 : vector<8x128xf32>
    %614 = vector.extract_strided_slice %612 {offsets = [0, 0], sizes = [8, 32], strides = [1, 1]} : vector<8x128xf32> to vector<8x32xf32>
    %615 = vector.extract_strided_slice %612 {offsets = [0, 32], sizes = [8, 32], strides = [1, 1]} : vector<8x128xf32> to vector<8x32xf32>
    %616 = vector.extract_strided_slice %613 {offsets = [0, 64], sizes = [8, 32], strides = [1, 1]} : vector<8x128xf32> to vector<8x32xf32>
    %617 = vector.extract_strided_slice %612 {offsets = [0, 96], sizes = [8, 32], strides = [1, 1]} : vector<8x128xf32> to vector<8x32xf32>
    %618 = arith.mulf %615, %601 : vector<8x32xf32>
    %619 = arith.mulf %614, %616 : vector<8x32xf32>
    %620 = arith.addf %618, %619 : vector<8x32xf32>
    %621 = math.tanh %620 : vector<8x32xf32>
    %622 = arith.mulf %617, %621 : vector<8x32xf32>
    %623 = arith.truncf %622 : vector<8x32xf32> to vector<8x32xbf16>
    %c0_202 = arith.constant 0 : index
    %c0_203 = arith.constant 0 : index
    %624 = vector.load %arg6[%c0_202, %c0_203] : memref<32x132xbf16, #tpu.memory_space<vmem>>, vector<32x132xbf16>
    %cst_204 = arith.constant dense<0.000000e+00> : vector<8x132xf32>
    %625 = tpu.matmul %623, %624, %cst_204 {dimension_numbers = #tpu.dot_dimension_numbers<[1], [0], [0], [1], [0, 0, 1, 1], [], []>} : vector<8x32xbf16>, vector<32x132xbf16>, vector<8x132xf32> -> vector<8x132xf32>
    %c0_205 = arith.constant 0 : index
    %c0_206 = arith.constant 0 : index
    %626 = vector.load %arg7[%c0_205, %c0_206] : memref<1x132xf32, #tpu.memory_space<vmem>>, vector<1x132xf32>
    %627 = vector.broadcast %626 : vector<1x132xf32> to vector<8x132xf32>
    %628 = arith.addf %625, %627 : vector<8x132xf32>
    %c16_207 = arith.constant 16 : index
    %c0_208 = arith.constant 0 : index
    %629 = vector.load %arg8[%c16_207, %c0_208] : memref<32x132xf32, #tpu.memory_space<vmem>>, vector<8x132xf32>
    tpu.vector_store %arg8[%c16_207, %c0_208], %628 {strides = array<i32>} : memref<32x132xf32, #tpu.memory_space<vmem>>, vector<8x132xf32>,
    %630 = vector.extract_strided_slice %628 {offsets = [0, 0], sizes = [8, 128], strides = [1, 1]} : vector<8x132xf32> to vector<8x128xf32>
    %c64 = arith.constant 64 : index
    %c0_209 = arith.constant 0 : index
    %631 = vector.load %arg9[%c64, %c0_209] : memref<72x128xf32, #tpu.memory_space<vmem>>, vector<8x128xf32>
    tpu.vector_store %arg9[%c64, %c0_209], %630 {strides = array<i32>} : memref<72x128xf32, #tpu.memory_space<vmem>>, vector<8x128xf32>,
    %c0_210 = arith.constant 0 : index
    %c0_211 = arith.constant 0 : index
    %632 = vector.load %arg2[%c0_210, %c0_211] : memref<32x128xbf16, #tpu.memory_space<vmem>>, vector<32x128xbf16>
    %cst_212 = arith.constant 0.000000e+00 : f32
    %633 = vector.broadcast %cst_212 : f32 to vector<8x32xf32>
    %c48_213 = arith.constant 48 : index
    %c0_214 = arith.constant 0 : index
    %634 = vector.load %arg9[%c48_213, %c0_214] : memref<72x128xf32, #tpu.memory_space<vmem>>, vector<8x128xf32>
    %635 = arith.negf %634 : vector<8x128xf32>
    %636 = math.exp %635 : vector<8x128xf32>
    %cst_215 = arith.constant 1.000000e+00 : f32
    %637 = vector.broadcast %cst_215 : f32 to vector<8x128xf32>
    %638 = arith.addf %637, %636 : vector<8x128xf32>
    %639 = arith.divf %637, %638 : vector<8x128xf32>
    %640 = math.tanh %634 : vector<8x128xf32>
    %641 = vector.extract_strided_slice %639 {offsets = [0, 0], sizes = [8, 32], strides = [1, 1]} : vector<8x128xf32> to vector<8x32xf32>
    %642 = vector.extract_strided_slice %639 {offsets = [0, 32], sizes = [8, 32], strides = [1, 1]} : vector<8x128xf32> to vector<8x32xf32>
    %643 = vector.extract_strided_slice %640 {offsets = [0, 64], sizes = [8, 32], strides = [1, 1]} : vector<8x128xf32> to vector<8x32xf32>
    %644 = vector.extract_strided_slice %639 {offsets = [0, 96], sizes = [8, 32], strides = [1, 1]} : vector<8x128xf32> to vector<8x32xf32>
    %645 = arith.mulf %642, %633 : vector<8x32xf32>
    %646 = arith.mulf %641, %643 : vector<8x32xf32>
    %647 = arith.addf %645, %646 : vector<8x32xf32>
    %648 = math.tanh %647 : vector<8x32xf32>
    %649 = arith.mulf %644, %648 : vector<8x32xf32>
    %650 = arith.truncf %649 : vector<8x32xf32> to vector<8x32xbf16>
    %c0_216 = arith.constant 0 : index
    %c0_217 = arith.constant 0 : index
    %651 = vector.load %arg11[%c0_216, %c0_217] : memref<48x32xf32, #tpu.memory_space<vmem>>, vector<8x32xf32>
    tpu.vector_store %arg11[%c0_216, %c0_217], %649 {strides = array<i32>} : memref<48x32xf32, #tpu.memory_space<vmem>>, vector<8x32xf32>,
    %c56_218 = arith.constant 56 : index
    %c0_219 = arith.constant 0 : index
    %652 = vector.load %arg9[%c56_218, %c0_219] : memref<72x128xf32, #tpu.memory_space<vmem>>, vector<8x128xf32>
    %cst_220 = arith.constant dense<0.000000e+00> : vector<8x128xf32>
    %653 = tpu.matmul %650, %632, %cst_220 {dimension_numbers = #tpu.dot_dimension_numbers<[1], [0], [0], [1], [0, 0, 1, 1], [], []>} : vector<8x32xbf16>, vector<32x128xbf16>, vector<8x128xf32> -> vector<8x128xf32>
    %654 = arith.addf %652, %653 : vector<8x128xf32>
    %655 = arith.negf %654 : vector<8x128xf32>
    %656 = math.exp %655 : vector<8x128xf32>
    %cst_221 = arith.constant 1.000000e+00 : f32
    %657 = vector.broadcast %cst_221 : f32 to vector<8x128xf32>
    %658 = arith.addf %657, %656 : vector<8x128xf32>
    %659 = arith.divf %657, %658 : vector<8x128xf32>
    %660 = math.tanh %654 : vector<8x128xf32>
    %661 = vector.extract_strided_slice %659 {offsets = [0, 0], sizes = [8, 32], strides = [1, 1]} : vector<8x128xf32> to vector<8x32xf32>
    %662 = vector.extract_strided_slice %659 {offsets = [0, 32], sizes = [8, 32], strides = [1, 1]} : vector<8x128xf32> to vector<8x32xf32>
    %663 = vector.extract_strided_slice %660 {offsets = [0, 64], sizes = [8, 32], strides = [1, 1]} : vector<8x128xf32> to vector<8x32xf32>
    %664 = vector.extract_strided_slice %659 {offsets = [0, 96], sizes = [8, 32], strides = [1, 1]} : vector<8x128xf32> to vector<8x32xf32>
    %665 = arith.mulf %662, %647 : vector<8x32xf32>
    %666 = arith.mulf %661, %663 : vector<8x32xf32>
    %667 = arith.addf %665, %666 : vector<8x32xf32>
    %668 = math.tanh %667 : vector<8x32xf32>
    %669 = arith.mulf %664, %668 : vector<8x32xf32>
    %670 = arith.truncf %669 : vector<8x32xf32> to vector<8x32xbf16>
    %c8_222 = arith.constant 8 : index
    %c0_223 = arith.constant 0 : index
    %671 = vector.load %arg11[%c8_222, %c0_223] : memref<48x32xf32, #tpu.memory_space<vmem>>, vector<8x32xf32>
    tpu.vector_store %arg11[%c8_222, %c0_223], %669 {strides = array<i32>} : memref<48x32xf32, #tpu.memory_space<vmem>>, vector<8x32xf32>,
    %c64_224 = arith.constant 64 : index
    %c0_225 = arith.constant 0 : index
    %672 = vector.load %arg9[%c64_224, %c0_225] : memref<72x128xf32, #tpu.memory_space<vmem>>, vector<8x128xf32>
    %cst_226 = arith.constant dense<0.000000e+00> : vector<8x128xf32>
    %673 = tpu.matmul %670, %632, %cst_226 {dimension_numbers = #tpu.dot_dimension_numbers<[1], [0], [0], [1], [0, 0, 1, 1], [], []>} : vector<8x32xbf16>, vector<32x128xbf16>, vector<8x128xf32> -> vector<8x128xf32>
    %674 = arith.addf %672, %673 : vector<8x128xf32>
    %675 = arith.negf %674 : vector<8x128xf32>
    %676 = math.exp %675 : vector<8x128xf32>
    %cst_227 = arith.constant 1.000000e+00 : f32
    %677 = vector.broadcast %cst_227 : f32 to vector<8x128xf32>
    %678 = arith.addf %677, %676 : vector<8x128xf32>
    %679 = arith.divf %677, %678 : vector<8x128xf32>
    %680 = math.tanh %674 : vector<8x128xf32>
    %681 = vector.extract_strided_slice %679 {offsets = [0, 0], sizes = [8, 32], strides = [1, 1]} : vector<8x128xf32> to vector<8x32xf32>
    %682 = vector.extract_strided_slice %679 {offsets = [0, 32], sizes = [8, 32], strides = [1, 1]} : vector<8x128xf32> to vector<8x32xf32>
    %683 = vector.extract_strided_slice %680 {offsets = [0, 64], sizes = [8, 32], strides = [1, 1]} : vector<8x128xf32> to vector<8x32xf32>
    %684 = vector.extract_strided_slice %679 {offsets = [0, 96], sizes = [8, 32], strides = [1, 1]} : vector<8x128xf32> to vector<8x32xf32>
    %685 = arith.mulf %682, %667 : vector<8x32xf32>
    %686 = arith.mulf %681, %683 : vector<8x32xf32>
    %687 = arith.addf %685, %686 : vector<8x32xf32>
    %688 = math.tanh %687 : vector<8x32xf32>
    %689 = arith.mulf %684, %688 : vector<8x32xf32>
    %c16_228 = arith.constant 16 : index
    %c0_229 = arith.constant 0 : index
    %690 = vector.load %arg11[%c16_228, %c0_229] : memref<48x32xf32, #tpu.memory_space<vmem>>, vector<8x32xf32>
    tpu.vector_store %arg11[%c16_228, %c0_229], %689 {strides = array<i32>} : memref<48x32xf32, #tpu.memory_space<vmem>>, vector<8x32xf32>,
    %c0_230 = arith.constant 0 : index
    %c0_231 = arith.constant 0 : index
    %691 = vector.load %arg4[%c0_230, %c0_231] : memref<32x128xbf16, #tpu.memory_space<vmem>>, vector<32x128xbf16>
    %c0_232 = arith.constant 0 : index
    %c0_233 = arith.constant 0 : index
    %692 = vector.load %arg11[%c0_232, %c0_233] : memref<48x32xf32, #tpu.memory_space<vmem>>, vector<24x32xf32>
    %693 = arith.truncf %692 : vector<24x32xf32> to vector<24x32xbf16>
    %c0_234 = arith.constant 0 : index
    %c0_235 = arith.constant 0 : index
    %694 = vector.load %arg3[%c0_234, %c0_235] : memref<32x128xbf16, #tpu.memory_space<vmem>>, vector<32x128xbf16>
    %cst_236 = arith.constant dense<0.000000e+00> : vector<24x128xf32>
    %695 = tpu.matmul %693, %694, %cst_236 {dimension_numbers = #tpu.dot_dimension_numbers<[1], [0], [0], [1], [0, 0, 1, 1], [], []>} : vector<24x32xbf16>, vector<32x128xbf16>, vector<24x128xf32> -> vector<24x128xf32>
    %c0_237 = arith.constant 0 : index
    %c0_238 = arith.constant 0 : index
    %696 = vector.load %arg5[%c0_237, %c0_238] : memref<1x128xf32, #tpu.memory_space<vmem>>, vector<1x128xf32>
    %697 = vector.broadcast %696 : vector<1x128xf32> to vector<24x128xf32>
    %698 = arith.addf %695, %697 : vector<24x128xf32>
    %c0_239 = arith.constant 0 : index
    %c0_240 = arith.constant 0 : index
    %699 = vector.load %arg10[%c0_239, %c0_240] : memref<48x128xf32, #tpu.memory_space<vmem>>, vector<24x128xf32>
    tpu.vector_store %arg10[%c0_239, %c0_240], %698 {strides = array<i32>} : memref<48x128xf32, #tpu.memory_space<vmem>>, vector<24x128xf32>,
    %cst_241 = arith.constant 0.000000e+00 : f32
    %700 = vector.broadcast %cst_241 : f32 to vector<8x32xf32>
    %c0_242 = arith.constant 0 : index
    %c0_243 = arith.constant 0 : index
    %701 = vector.load %arg10[%c0_242, %c0_243] : memref<48x128xf32, #tpu.memory_space<vmem>>, vector<8x128xf32>
    %702 = arith.negf %701 : vector<8x128xf32>
    %703 = math.exp %702 : vector<8x128xf32>
    %cst_244 = arith.constant 1.000000e+00 : f32
    %704 = vector.broadcast %cst_244 : f32 to vector<8x128xf32>
    %705 = arith.addf %704, %703 : vector<8x128xf32>
    %706 = arith.divf %704, %705 : vector<8x128xf32>
    %707 = math.tanh %701 : vector<8x128xf32>
    %708 = vector.extract_strided_slice %706 {offsets = [0, 0], sizes = [8, 32], strides = [1, 1]} : vector<8x128xf32> to vector<8x32xf32>
    %709 = vector.extract_strided_slice %706 {offsets = [0, 32], sizes = [8, 32], strides = [1, 1]} : vector<8x128xf32> to vector<8x32xf32>
    %710 = vector.extract_strided_slice %707 {offsets = [0, 64], sizes = [8, 32], strides = [1, 1]} : vector<8x128xf32> to vector<8x32xf32>
    %711 = vector.extract_strided_slice %706 {offsets = [0, 96], sizes = [8, 32], strides = [1, 1]} : vector<8x128xf32> to vector<8x32xf32>
    %712 = arith.mulf %709, %700 : vector<8x32xf32>
    %713 = arith.mulf %708, %710 : vector<8x32xf32>
    %714 = arith.addf %712, %713 : vector<8x32xf32>
    %715 = math.tanh %714 : vector<8x32xf32>
    %716 = arith.mulf %711, %715 : vector<8x32xf32>
    %717 = arith.truncf %716 : vector<8x32xf32> to vector<8x32xbf16>
    %c8_245 = arith.constant 8 : index
    %c0_246 = arith.constant 0 : index
    %718 = vector.load %arg10[%c8_245, %c0_246] : memref<48x128xf32, #tpu.memory_space<vmem>>, vector<8x128xf32>
    %cst_247 = arith.constant dense<0.000000e+00> : vector<8x128xf32>
    %719 = tpu.matmul %717, %691, %cst_247 {dimension_numbers = #tpu.dot_dimension_numbers<[1], [0], [0], [1], [0, 0, 1, 1], [], []>} : vector<8x32xbf16>, vector<32x128xbf16>, vector<8x128xf32> -> vector<8x128xf32>
    %720 = arith.addf %718, %719 : vector<8x128xf32>
    %721 = arith.negf %720 : vector<8x128xf32>
    %722 = math.exp %721 : vector<8x128xf32>
    %cst_248 = arith.constant 1.000000e+00 : f32
    %723 = vector.broadcast %cst_248 : f32 to vector<8x128xf32>
    %724 = arith.addf %723, %722 : vector<8x128xf32>
    %725 = arith.divf %723, %724 : vector<8x128xf32>
    %726 = math.tanh %720 : vector<8x128xf32>
    %727 = vector.extract_strided_slice %725 {offsets = [0, 0], sizes = [8, 32], strides = [1, 1]} : vector<8x128xf32> to vector<8x32xf32>
    %728 = vector.extract_strided_slice %725 {offsets = [0, 32], sizes = [8, 32], strides = [1, 1]} : vector<8x128xf32> to vector<8x32xf32>
    %729 = vector.extract_strided_slice %726 {offsets = [0, 64], sizes = [8, 32], strides = [1, 1]} : vector<8x128xf32> to vector<8x32xf32>
    %730 = vector.extract_strided_slice %725 {offsets = [0, 96], sizes = [8, 32], strides = [1, 1]} : vector<8x128xf32> to vector<8x32xf32>
    %731 = arith.mulf %728, %714 : vector<8x32xf32>
    %732 = arith.mulf %727, %729 : vector<8x32xf32>
    %733 = arith.addf %731, %732 : vector<8x32xf32>
    %734 = math.tanh %733 : vector<8x32xf32>
    %735 = arith.mulf %730, %734 : vector<8x32xf32>
    %736 = arith.truncf %735 : vector<8x32xf32> to vector<8x32xbf16>
    %c16_249 = arith.constant 16 : index
    %c0_250 = arith.constant 0 : index
    %737 = vector.load %arg10[%c16_249, %c0_250] : memref<48x128xf32, #tpu.memory_space<vmem>>, vector<8x128xf32>
    %cst_251 = arith.constant dense<0.000000e+00> : vector<8x128xf32>
    %738 = tpu.matmul %736, %691, %cst_251 {dimension_numbers = #tpu.dot_dimension_numbers<[1], [0], [0], [1], [0, 0, 1, 1], [], []>} : vector<8x32xbf16>, vector<32x128xbf16>, vector<8x128xf32> -> vector<8x128xf32>
    %739 = arith.addf %737, %738 : vector<8x128xf32>
    %740 = arith.negf %739 : vector<8x128xf32>
    %741 = math.exp %740 : vector<8x128xf32>
    %cst_252 = arith.constant 1.000000e+00 : f32
    %742 = vector.broadcast %cst_252 : f32 to vector<8x128xf32>
    %743 = arith.addf %742, %741 : vector<8x128xf32>
    %744 = arith.divf %742, %743 : vector<8x128xf32>
    %745 = math.tanh %739 : vector<8x128xf32>
    %746 = vector.extract_strided_slice %744 {offsets = [0, 0], sizes = [8, 32], strides = [1, 1]} : vector<8x128xf32> to vector<8x32xf32>
    %747 = vector.extract_strided_slice %744 {offsets = [0, 32], sizes = [8, 32], strides = [1, 1]} : vector<8x128xf32> to vector<8x32xf32>
    %748 = vector.extract_strided_slice %745 {offsets = [0, 64], sizes = [8, 32], strides = [1, 1]} : vector<8x128xf32> to vector<8x32xf32>
    %749 = vector.extract_strided_slice %744 {offsets = [0, 96], sizes = [8, 32], strides = [1, 1]} : vector<8x128xf32> to vector<8x32xf32>
    %750 = arith.mulf %747, %733 : vector<8x32xf32>
    %751 = arith.mulf %746, %748 : vector<8x32xf32>
    %752 = arith.addf %750, %751 : vector<8x32xf32>
    %753 = math.tanh %752 : vector<8x32xf32>
    %754 = arith.mulf %749, %753 : vector<8x32xf32>
    %755 = arith.truncf %754 : vector<8x32xf32> to vector<8x32xbf16>
    %c0_253 = arith.constant 0 : index
    %c0_254 = arith.constant 0 : index
    %756 = vector.load %arg6[%c0_253, %c0_254] : memref<32x132xbf16, #tpu.memory_space<vmem>>, vector<32x132xbf16>
    %cst_255 = arith.constant dense<0.000000e+00> : vector<8x132xf32>
    %757 = tpu.matmul %755, %756, %cst_255 {dimension_numbers = #tpu.dot_dimension_numbers<[1], [0], [0], [1], [0, 0, 1, 1], [], []>} : vector<8x32xbf16>, vector<32x132xbf16>, vector<8x132xf32> -> vector<8x132xf32>
    %c0_256 = arith.constant 0 : index
    %c0_257 = arith.constant 0 : index
    %758 = vector.load %arg7[%c0_256, %c0_257] : memref<1x132xf32, #tpu.memory_space<vmem>>, vector<1x132xf32>
    %759 = vector.broadcast %758 : vector<1x132xf32> to vector<8x132xf32>
    %760 = arith.addf %757, %759 : vector<8x132xf32>
    %c24_258 = arith.constant 24 : index
    %c0_259 = arith.constant 0 : index
    %761 = vector.load %arg8[%c24_258, %c0_259] : memref<32x132xf32, #tpu.memory_space<vmem>>, vector<8x132xf32>
    tpu.vector_store %arg8[%c24_258, %c0_259], %760 {strides = array<i32>} : memref<32x132xf32, #tpu.memory_space<vmem>>, vector<8x132xf32>,
    return
  }
  func.func @transform_0(%arg0: i32) -> (i32, i32) {
    %c0_i32 = arith.constant 0 : i32
    %c0_i32_0 = arith.constant 0 : i32
    return %arg0, %c0_i32 : i32, i32
  }
  func.func @transform_1(%arg0: i32) -> (i32, i32) {
    %c0_i32 = arith.constant 0 : i32
    %c0_i32_0 = arith.constant 0 : i32
    %c0_i32_1 = arith.constant 0 : i32
    return %c0_i32, %c0_i32_0 : i32, i32
  }
  func.func @transform_2(%arg0: i32) -> (i32, i32) {
    %c0_i32 = arith.constant 0 : i32
    %c0_i32_0 = arith.constant 0 : i32
    %c0_i32_1 = arith.constant 0 : i32
    return %c0_i32, %c0_i32_0 : i32, i32
  }
  func.func @transform_3(%arg0: i32) -> (i32, i32) {
    %c0_i32 = arith.constant 0 : i32
    %c0_i32_0 = arith.constant 0 : i32
    %c0_i32_1 = arith.constant 0 : i32
    return %c0_i32, %c0_i32_0 : i32, i32
  }
  func.func @transform_4(%arg0: i32) -> (i32, i32) {
    %c0_i32 = arith.constant 0 : i32
    %c0_i32_0 = arith.constant 0 : i32
    %c0_i32_1 = arith.constant 0 : i32
    return %c0_i32, %c0_i32_0 : i32, i32
  }
  func.func @transform_5(%arg0: i32) -> (i32, i32) {
    %c0_i32 = arith.constant 0 : i32
    %c0_i32_0 = arith.constant 0 : i32
    %c0_i32_1 = arith.constant 0 : i32
    return %c0_i32, %c0_i32_0 : i32, i32
  }
  func.func @transform_6(%arg0: i32) -> (i32, i32) {
    %c0_i32 = arith.constant 0 : i32
    %c0_i32_0 = arith.constant 0 : i32
    %c0_i32_1 = arith.constant 0 : i32
    return %c0_i32, %c0_i32_0 : i32, i32
  }
  func.func @transform_7(%arg0: i32) -> (i32, i32) {
    %c0_i32 = arith.constant 0 : i32
    %c0_i32_0 = arith.constant 0 : i32
    return %arg0, %c0_i32 : i32, i32
  }
}

</mosaic_0001>

<bundles_post_ra>
// kernel: lstm_recursive_forward.1
= control target key start
LH: loop header
LB: loop body
LE: loop exit
PB: predicated region body
PF: predicated region fallthrough
CT: control target
= control target key end

     0   :  { %s3301_s26 = smov 64   ;;  %s3302_s27 = smov 32   ;;  %vm86_vm4 = vcmask 261120   ;;  %s4036_s0 = inlined_call_operand.vmem [shape: f32[48,128], index: 0, kind: input, shape index: {}]   ;;  %s4037_s1 = inlined_call_operand.vmem [shape: bf16[32,128], index: 1, kind: input, shape index: {}]   ;;  %s4038_s2 = inlined_call_operand.vmem [shape: bf16[32,128], index: 2, kind: input, shape index: {}]   ;;  %s4039_s4 = inlined_call_operand.vmem [shape: f32[1,128], index: 4, kind: input, shape index: {}]   ;;  %s4040_s3 = inlined_call_operand.vmem [shape: bf16[32,128], index: 3, kind: input, shape index: {}]   ;;  %s4041_s5 = inlined_call_operand.vmem [shape: bf16[32,132], index: 5, kind: input, shape index: {}]   ;;  %s4042_s6 = inlined_call_operand.vmem [shape: f32[1,132], index: 6, kind: input, shape index: {}]   ;;  %s4043_s7 = inlined_call_operand.vmem [shape: f32[32,132], index: 7, kind: output, shape index: {}]  }
   0x1   :  { %v27_v0 = vld [vmem:[%s4036_s0] sm:$0xff]  ;;  %v2965_v21 = vld [vmem:[%s4037_s1 + $0x8] sm:$0xff]  ;;  %v3382_v62 = vld [vmem:[%s4036_s0 + $0x10] sm:$0xff] }
   0x2   :  { %3010 = vtanh.f32 %v27_v0  ;;  %v2722_v2 = vmul.f32 -1.442695, %v27_v0  ;;  %113 = vmatpush.bf16.msra.mxu0 %v2965_v21  ;;  %v2964_v22 = vld [vmem:[%s4037_s1] sm:$0xff]  ;;  %177 = vmatpush.bf16.msra.mxu1 %v2965_v21  ;;  %v28_v27 = vld [vmem:[%s4036_s0 + $0x8] sm:$0xff] }
   0x3   :  { %241 = vmatpush.bf16.msra.mxu2 %v2965_v21  ;;  %305 = vmatpush.bf16.msra.mxu3 %v2965_v21  ;;  %v2969_v55 = vld [vmem:[%s4038_s2 + $0x8] sm:$0xff]  ;;  %v2968_v56 = vld [vmem:[%s4038_s2] sm:$0xff] }
   0x4   :  { %3012 = vpow2.f32 %v2722_v2 }
   0x6   :  { %114 = vmatpush.bf16.msra.mxu0 %v2964_v22  ;;  %178 = vmatpush.bf16.msra.mxu1 %v2964_v22 }
   0x7   :  { %242 = vmatpush.bf16.msra.mxu2 %v2964_v22  ;;  %306 = vmatpush.bf16.msra.mxu3 %v2964_v22 }
   0x8   :  { %v3011_v1 = vpop.eup %3010 }
   0x9   :  { %66 = vrot.lane.b32.xlu0 %v3011_v1, %s3301_s26 }
   0xa   :  { %v3013_v3 = vpop.eup %3012  ;;  %369 = vmatpush.bf16.msrb.mxu0 %v2965_v21  ;;  %467 = vmatpush.bf16.msrb.mxu1 %v2969_v55  ;;  %v3433_v55 = vld [vmem:[%s4036_s0 + $0x18] sm:$0xff] }
   0xb   :  { %v47_v4 = vadd.f32 1.0, %v3013_v3  ;;  %v3389_v3 = vld [vmem:[%s4039_s4] ss:$0 sm:$0xff] }
   0xd   :  { %3014 = vrcp.f32 %v47_v4  ;;  %vm53_vm0 = vweird.f32 %v47_v4  ;;  %v59_v9 = vand.u32 2147483648, %v47_v4  ;;  %v57_v11 = vand.u32 2147483647, %v47_v4 }
   0xe   :  { %370 = vmatpush.bf16.msrb.mxu0 %v2964_v22  ;;  %468 = vmatpush.bf16.msrb.mxu1 %v2968_v56 }
   0xf   :  { %v60_v12 = vor.u32 1.1754944e-38, %v59_v9  ;;  %vm58_vm3 = vcmp.eq.f32.partialorder %v57_v11, 8.507059e+37 }
  0x13   :  { %v3015_v5 = vpop.eup %3014 }
  0x14   :  { %v49_v6 = vmul.f32 %v3015_v5, %v47_v4  ;;  %vm54_vm1 = vweird.f32 %v3015_v5 }
  0x15   :  { %vm55_vm2 = vmor %vm53_vm0, %vm54_vm1 }
  0x16   :  { %v50_v7 = vsub.f32 1.0, %v49_v6 }
  0x18   :  { %v51_v8 = vmul.f32 %v3015_v5, %v50_v7 }
  0x1a   :  { %v52_v10 = vadd.f32 %v3015_v5, %v51_v8 }
  0x1c   :  { %v56_v13 = vsel %vm55_vm2, %v3015_v5, %v52_v10 }
  0x1d   :  { %v61_v14 = vsel %vm58_vm3, %v60_v12, %v56_v13 }
  0x1e   :  { %v64_v17 = vmul.f32 0.0, %v61_v14 }
  0x7b   :  { %v67_v15 = vpop.permute.xlu0 %66 }
  0x7c   :  { %v69_v16 = vmul.f32 %v67_v15, %v61_v14 }
  0x7e   :  { %71 = vrot.lane.b32.xlu0 %v69_v16, %s3302_s27 }
  0xf0   :  { %v72_v18 = vpop.permute.xlu0 %71 }
  0xf1   :  { %v74_v19 = vadd.f32 %v72_v18, %v64_v17 }
  0xf3   :  { %3016 = vtanh.f32 %v74_v19 }
  0xf9   :  { %v3017_v20 = vpop.eup %3016 }
  0xfa   :  { %77 = vrot.lane.b32.xlu1 %v3017_v20, %s3301_s26 }
 0x16c   :  { %v78_v23 = vpop.permute.xlu1 %77 }
 0x16d   :  { %v80_v24 = vmul.f32 %v78_v23, %v61_v14 }
 0x16f   :  { %v81_v25 = vpack.c.bf16 %v80_v24, %v80_v24 }
 0x171   :  { %90 = vrot.lane.b32.xlu1 %v81_v25, %s3302_s27 }
 0x1e3   :  { %v91_v26 = vpop.permute.xlu1 %90 }
 0x1e4   :  { %2731 = vmatmul.msk.bf16.vlgmr.msra.gmra.mxu0 %vm86_vm4, %v91_v26 }
 0x261   :  { %v116_v28 = vpop.f32.mrf.mxu0 }
 0x262   :  { %v120_v29 = vadd.f32 %v116_v28, %v28_v27 }
 0x264   :  { %3018 = vtanh.f32 %v120_v29  ;;  %v2732_v32 = vmul.f32 -1.442695, %v120_v29 }
 0x266   :  { %3020 = vpow2.f32 %v2732_v32 }
 0x269   :  { %v118_v30 = vpop.f32.mrf.mxu0 }
 0x26a   :  { %v3019_v31 = vpop.eup %3018 }
 0x26b   :  { %143 = vrot.lane.b32.xlu2 %v3019_v31, %s3301_s26 }
 0x26c   :  { %v3021_v33 = vpop.eup %3020 }
 0x26d   :  { %v124_v34 = vadd.f32 1.0, %v3021_v33 }
 0x26f   :  { %3022 = vrcp.f32 %v124_v34  ;;  %v136_v40 = vand.u32 2147483648, %v124_v34  ;;  %vm130_vm6 = vweird.f32 %v124_v34  ;;  %v134_v41 = vand.u32 2147483647, %v124_v34 }
 0x271   :  { %v137_v43 = vor.u32 1.1754944e-38, %v136_v40  ;;  %vm135_vm8 = vcmp.eq.f32.partialorder %v134_v41, 8.507059e+37 }
 0x275   :  { %v3023_v35 = vpop.eup %3022 }
 0x276   :  { %v126_v36 = vmul.f32 %v3023_v35, %v124_v34  ;;  %vm131_vm5 = vweird.f32 %v3023_v35 }
 0x277   :  { %vm132_vm7 = vmor %vm130_vm6, %vm131_vm5 }
 0x278   :  { %v127_v37 = vsub.f32 1.0, %v126_v36 }
 0x27a   :  { %v128_v38 = vmul.f32 %v3023_v35, %v127_v37 }
 0x27c   :  { %v129_v39 = vadd.f32 %v3023_v35, %v128_v38 }
 0x27e   :  { %v133_v42 = vsel %vm132_vm7, %v3023_v35, %v129_v39 }
 0x27f   :  { %v138_v45 = vsel %vm135_vm8, %v137_v43, %v133_v42 }
 0x280   :  { %v141_v47 = vmul.f32 %v138_v45, %v74_v19 }
 0x2c5   :  { %v144_v44 = vpop.permute.xlu2 %143 }
 0x2c6   :  { %v146_v46 = vmul.f32 %v144_v44, %v138_v45 }
 0x2c8   :  { %148 = vrot.lane.b32.xlu2 %v146_v46, %s3302_s27 }
 0x2d0   :  { %83 = vrot.lane.b32.xlu2 %v80_v24, %s3302_s27 }
 0x322   :  { %v149_v48 = vpop.permute.xlu2 %148 }
 0x323   :  { %v3363_v49 = vadd.f32 %v149_v48, %v141_v47 }
 0x325   :  { %3024 = vtanh.f32 %v3363_v49 }
 0x32a   :  { %v84_v50 = vpop.permute.xlu2 %83 }
 0x32b   :  { %v3025_v51 = vpop.eup %3024  ;;  %87 = vst.msk [vmem:[#allocation4] sm:$0xff] %vm86_vm4, %v84_v50 }
 0x32c   :  { %154 = vrot.lane.b32.xlu0 %v3025_v51, %s3301_s26  ;;  %v3413_v51 = vld [vmem:[%s4040_s3 + $0x8] sm:$0xff] }
 0x32d   :  { %555 = vmatpush.bf16.msrb.mxu2 %v3413_v51  ;;  %614 = vmatpush.bf16.msrb.mxu3 %v3413_v51 }
 0x32e   :  { %673 = vmatpush.bf16.msra.mxu0 %v3413_v51 }
 0x332   :  { %v423_v60 = vld [vmem:[#allocation4] sm:$0xff] }
 0x39e   :  { %v155_v52 = vpop.permute.xlu0 %154 }
 0x39f   :  { %v157_v53 = vmul.f32 %v155_v52, %v138_v45  ;;  %v3419_v52 = vld [vmem:[%s4040_s3] sm:$0xff] }
 0x3a0   :  { %556 = vmatpush.bf16.msrb.mxu2 %v3419_v52  ;;  %615 = vmatpush.bf16.msrb.mxu3 %v3419_v52 }
 0x3a1   :  { %v158_v54 = vpack.c.bf16 %v157_v53, %v157_v53  ;;  %160 = vrot.lane.b32.xlu0 %v157_v53, %s3302_s27  ;;  %674 = vmatpush.bf16.msra.mxu0 %v3419_v52 }
 0x3a3   :  { %166 = vrot.lane.b32.xlu1 %v158_v54, %s3302_s27 }
 0x413   :  { %v161_v57 = vpop.permute.xlu0 %160 }
 0x414   :  { %163 = vst.msk [vmem:[#allocation4 + $0x8] sm:$0xff] %vm86_vm4, %v161_v57 }
 0x415   :  { %v167_v58 = vpop.permute.xlu1 %166 }
 0x416   :  { %2733 = vmatmul.msk.bf16.vlgmr.msra.gmra.mxu1 %vm86_vm4, %v167_v58 }
 0x41b   :  { %v424_v59 = vld [vmem:[#allocation4 + $0x8] sm:$0xff] }
 0x41c   :  { %v429_v61 = vpack.c.bf16 %v424_v59, %v423_v60 }
 0x426   :  { %2749 = vmatmul.msk.bf16.vlgmr.msrb.gmra.mxu1 %vm86_vm4, %v429_v61 }
 0x493   :  { %v180_v63 = vpop.f32.mrf.mxu1 }
 0x494   :  { %v184_v0 = vadd.f32 %v180_v63, %v3382_v62 }
 0x496   :  { %3026 = vtanh.f32 %v184_v0  ;;  %v2734_v8 = vmul.f32 -1.442695, %v184_v0 }
 0x49b   :  { %v182_v1 = vpop.f32.mrf.mxu1 }
 0x49c   :  { %v3027_v2 = vpop.eup %3026 }
 0x49d   :  { %207 = vrot.lane.b32.xlu1 %v3027_v2, %s3301_s26 }
 0x4a3   :  { %v470_v4 = vpop.f32.mrf.mxu1 }
 0x4a4   :  { %v471_v5 = vadd.f32 %v3389_v3, %v470_v4 }
 0x4a6   :  { %3028 = vtanh.f32 %v471_v5  ;;  %v2752_v7 = vmul.f32 -1.442695, %v471_v5 }
 0x4a8   :  { %3030 = vpow2.f32 %v2752_v7 }
 0x4a9   :  { %3032 = vpow2.f32 %v2734_v8 }
 0x4ab   :  { %v472_v60 = vpop.f32.mrf.mxu1 }
 0x4ac   :  { %v3029_v6 = vpop.eup %3028  ;;  %v473_v61 = vadd.f32 %v3389_v3, %v472_v60 }
 0x4ad   :  { %514 = vrot.lane.b32.xlu2 %v3029_v6, %s3301_s26 }
 0x4ae   :  { %v3031_v9 = vpop.eup %3030 }
 0x4af   :  { %v495_v10 = vadd.f32 1.0, %v3031_v9  ;;  %v3033_v11 = vpop.eup %3032 }
 0x4b0   :  { %v188_v12 = vadd.f32 1.0, %v3033_v11 }
 0x4b1   :  { %3034 = vrcp.f32 %v495_v10  ;;  %v507_v21 = vand.u32 2147483648, %v495_v10  ;;  %vm501_vm10 = vweird.f32 %v495_v10  ;;  %v505_v22 = vand.u32 2147483647, %v495_v10 }
 0x4b2   :  { %3036 = vrcp.f32 %v188_v12  ;;  %v200_v30 = vand.u32 2147483648, %v188_v12  ;;  %vm194_vm14 = vweird.f32 %v188_v12  ;;  %v198_v31 = vand.u32 2147483647, %v188_v12 }
 0x4b3   :  { %v508_v25 = vor.u32 1.1754944e-38, %v507_v21  ;;  %vm506_vm12 = vcmp.eq.f32.partialorder %v505_v22, 8.507059e+37 }
 0x4b4   :  { %v201_v33 = vor.u32 1.1754944e-38, %v200_v30  ;;  %vm199_vm0 = vcmp.eq.f32.partialorder %v198_v31, 8.507059e+37 }
 0x4b7   :  { %v3035_v13 = vpop.eup %3034 }
 0x4b8   :  { %v497_v14 = vmul.f32 %v3035_v13, %v495_v10  ;;  %v3037_v16 = vpop.eup %3036  ;;  %vm502_vm9 = vweird.f32 %v3035_v13 }
 0x4b9   :  { %v190_v18 = vmul.f32 %v3037_v16, %v188_v12  ;;  %vm503_vm11 = vmor %vm501_vm10, %vm502_vm9  ;;  %vm195_vm13 = vweird.f32 %v3037_v16 }
 0x4ba   :  { %v498_v15 = vsub.f32 1.0, %v497_v14  ;;  %vm196_vm15 = vmor %vm194_vm14, %vm195_vm13 }
 0x4bb   :  { %v191_v20 = vsub.f32 1.0, %v190_v18 }
 0x4bc   :  { %v499_v17 = vmul.f32 %v3035_v13, %v498_v15 }
 0x4bd   :  { %v192_v24 = vmul.f32 %v3037_v16, %v191_v20 }
 0x4be   :  { %v500_v19 = vadd.f32 %v3035_v13, %v499_v17 }
 0x4bf   :  { %v193_v29 = vadd.f32 %v3037_v16, %v192_v24 }
 0x4c0   :  { %v504_v23 = vsel %vm503_vm11, %v3035_v13, %v500_v19 }
 0x4c1   :  { %v509_v27 = vsel %vm506_vm12, %v508_v25, %v504_v23  ;;  %v197_v32 = vsel %vm196_vm15, %v3037_v16, %v193_v29 }
 0x4c2   :  { %v202_v35 = vsel %vm199_vm0, %v201_v33, %v197_v32  ;;  %v512_v37 = vmul.f32 0.0, %v509_v27 }
 0x4c3   :  { %v205_v40 = vmul.f32 %v202_v35, %v3363_v49 }
 0x507   :  { %v515_v26 = vpop.permute.xlu2 %514 }
 0x508   :  { %v517_v28 = vmul.f32 %v515_v26, %v509_v27 }
 0x50a   :  { %519 = vrot.lane.b32.xlu1 %v517_v28, %s3302_s27 }
 0x50f   :  { %v208_v34 = vpop.permute.xlu1 %207 }
 0x510   :  { %v210_v36 = vmul.f32 %v208_v34, %v202_v35 }
 0x512   :  { %212 = vrot.lane.b32.xlu0 %v210_v36, %s3302_s27 }
 0x57c   :  { %v520_v38 = vpop.permute.xlu1 %519 }
 0x57d   :  { %v3395_v39 = vadd.f32 %v520_v38, %v512_v37 }
 0x57f   :  { %3038 = vtanh.f32 %v3395_v39 }
 0x584   :  { %v213_v41 = vpop.permute.xlu0 %212 }
 0x585   :  { %v3039_v42 = vpop.eup %3038  ;;  %v3399_v43 = vadd.f32 %v213_v41, %v205_v40 }
 0x586   :  { %525 = vrot.lane.b32.xlu0 %v3039_v42, %s3301_s26 }
 0x587   :  { %3040 = vtanh.f32 %v3399_v43 }
 0x58d   :  { %v3041_v44 = vpop.eup %3040 }
 0x58e   :  { %218 = vrot.lane.b32.xlu2 %v3041_v44, %s3301_s26 }
 0x5e8   :  { %v219_v45 = vpop.permute.xlu2 %218 }
 0x5e9   :  { %v3404_v46 = vmul.f32 %v219_v45, %v202_v35 }
 0x5eb   :  { %v222_v47 = vpack.c.bf16 %v3404_v46, %v3404_v46 }
 0x5ed   :  { %230 = vrot.lane.b32.xlu1 %v222_v47, %s3302_s27 }
 0x5f8   :  { %v526_v48 = vpop.permute.xlu0 %525 }
 0x5f9   :  { %v528_v49 = vmul.f32 %v526_v48, %v509_v27 }
 0x5fb   :  { %v529_v50 = vpack.c.bf16 %v528_v49, %v528_v49 }
 0x5fd   :  { %532 = vrot.lane.b32.xlu2 %v529_v50, %s3302_s27 }
 0x657   :  { %v533_v54 = vpop.permute.xlu2 %532 }
 0x65f   :  { %v231_v53 = vpop.permute.xlu1 %230 }
 0x660   :  { %2735 = vmatmul.msk.bf16.vlgmr.msra.gmra.mxu2 %vm86_vm4, %v231_v53 }
 0x661   :  { %732 = vmatpush.bf16.msra.mxu2 %v3413_v51 }
 0x665   :  { %733 = vmatpush.bf16.msra.mxu2 %v3419_v52 }
 0x670   :  { %2761 = vmatmul.msk.bf16.vlgmr.msrb.gmra.mxu2 %vm86_vm4, %v533_v54 }
 0x6e3   :  { %v244_v56 = vpop.f32.mrf.mxu2 }
 0x6e4   :  { %v248_v57 = vadd.f32 %v244_v56, %v3433_v55 }
 0x6e6   :  { %3042 = vtanh.f32 %v248_v57  ;;  %v2736_v4 = vmul.f32 -1.442695, %v248_v57 }
 0x6eb   :  { %v246_v58 = vpop.f32.mrf.mxu2 }
 0x6ec   :  { %v3043_v59 = vpop.eup %3042  ;;  %v3466_v58 = vld [vmem:[%s4036_s0 + $0x20] sm:$0xff] }
 0x6ed   :  { %271 = vrot.lane.b32.xlu0 %v3043_v59, %s3301_s26 }
 0x6f3   :  { %v558_v63 = vpop.f32.mrf.mxu2 }
 0x6f4   :  { %v562_v0 = vadd.f32 %v558_v63, %v473_v61 }
 0x6f6   :  { %3044 = vtanh.f32 %v562_v0  ;;  %v2762_v7 = vmul.f32 -1.442695, %v562_v0 }
 0x6f7   :  { %3046 = vpow2.f32 %v2736_v4 }
 0x6fb   :  { %v560_v1 = vpop.f32.mrf.mxu2 }
 0x6fc   :  { %v3045_v2 = vpop.eup %3044 }
 0x6fd   :  { %585 = vrot.lane.b32.xlu1 %v3045_v2, %s3301_s26  ;;  %v3047_v5 = vpop.eup %3046 }
 0x6fe   :  { %v252_v6 = vadd.f32 1.0, %v3047_v5 }
 0x700   :  { %3048 = vrcp.f32 %v252_v6  ;;  %v264_v16 = vand.u32 2147483648, %v252_v6  ;;  %vm258_vm2 = vweird.f32 %v252_v6  ;;  %v262_v17 = vand.u32 2147483647, %v252_v6 }
 0x701   :  { %3050 = vpow2.f32 %v2762_v7 }
 0x702   :  { %v265_v20 = vor.u32 1.1754944e-38, %v264_v16  ;;  %vm263_vm5 = vcmp.eq.f32.partialorder %v262_v17, 8.507059e+37 }
 0x706   :  { %v3049_v8 = vpop.eup %3048 }
 0x707   :  { %v3051_v9 = vpop.eup %3050  ;;  %v254_v10 = vmul.f32 %v3049_v8, %v252_v6  ;;  %vm259_vm1 = vweird.f32 %v3049_v8 }
 0x708   :  { %v566_v11 = vadd.f32 1.0, %v3051_v9  ;;  %vm260_vm3 = vmor %vm258_vm2, %vm259_vm1 }
 0x709   :  { %v255_v12 = vsub.f32 1.0, %v254_v10 }
 0x70a   :  { %3052 = vrcp.f32 %v566_v11  ;;  %v578_v27 = vand.u32 2147483648, %v566_v11  ;;  %vm572_vm7 = vweird.f32 %v566_v11  ;;  %v576_v28 = vand.u32 2147483647, %v566_v11 }
 0x70b   :  { %v256_v13 = vmul.f32 %v3049_v8, %v255_v12 }
 0x70c   :  { %v579_v30 = vor.u32 1.1754944e-38, %v578_v27  ;;  %vm577_vm9 = vcmp.eq.f32.partialorder %v576_v28, 8.507059e+37 }
 0x70d   :  { %v257_v14 = vadd.f32 %v3049_v8, %v256_v13 }
 0x70f   :  { %v261_v18 = vsel %vm260_vm3, %v3049_v8, %v257_v14 }
 0x710   :  { %v3053_v15 = vpop.eup %3052  ;;  %v266_v21 = vsel %vm263_vm5, %v265_v20, %v261_v18 }
 0x711   :  { %v568_v19 = vmul.f32 %v3053_v15, %v566_v11  ;;  %vm573_vm6 = vweird.f32 %v3053_v15  ;;  %v269_v34 = vmul.f32 %v266_v21, %v3399_v43 }
 0x712   :  { %vm574_vm8 = vmor %vm572_vm7, %vm573_vm6 }
 0x713   :  { %v569_v24 = vsub.f32 1.0, %v568_v19 }
 0x715   :  { %v570_v25 = vmul.f32 %v3053_v15, %v569_v24 }
 0x717   :  { %v571_v26 = vadd.f32 %v3053_v15, %v570_v25 }
 0x719   :  { %v575_v29 = vsel %vm574_vm8, %v3053_v15, %v571_v26 }
 0x71a   :  { %v580_v32 = vsel %vm577_vm9, %v579_v30, %v575_v29 }
 0x71b   :  { %v583_v38 = vmul.f32 %v580_v32, %v3395_v39 }
 0x75f   :  { %v272_v22 = vpop.permute.xlu0 %271 }
 0x760   :  { %v274_v23 = vmul.f32 %v272_v22, %v266_v21 }
 0x762   :  { %276 = vrot.lane.b32.xlu2 %v274_v23, %s3302_s27 }
 0x76f   :  { %v586_v31 = vpop.permute.xlu1 %585 }
 0x770   :  { %v588_v33 = vmul.f32 %v586_v31, %v580_v32 }
 0x772   :  { %590 = vrot.lane.b32.xlu0 %v588_v33, %s3302_s27 }
 0x7bc   :  { %v277_v35 = vpop.permute.xlu2 %276 }
 0x7bd   :  { %v3442_v36 = vadd.f32 %v277_v35, %v269_v34 }
 0x7bf   :  { %3054 = vtanh.f32 %v3442_v36 }
 0x7c5   :  { %v3055_v37 = vpop.eup %3054 }
 0x7c6   :  { %282 = vrot.lane.b32.xlu1 %v3055_v37, %s3301_s26 }
 0x7ce   :  { %224 = vrot.lane.b32.xlu1 %v3404_v46, %s3302_s27 }
 0x7e4   :  { %v591_v40 = vpop.permute.xlu0 %590 }
 0x7e5   :  { %v3449_v41 = vadd.f32 %v591_v40, %v583_v38 }
 0x7e7   :  { %3056 = vtanh.f32 %v3449_v41 }
 0x7ed   :  { %v3057_v42 = vpop.eup %3056 }
 0x7ee   :  { %596 = vrot.lane.b32.xlu2 %v3057_v42, %s3301_s26 }
 0x838   :  { %v283_v43 = vpop.permute.xlu1 %282 }
 0x839   :  { %v285_v44 = vmul.f32 %v283_v43, %v266_v21 }
 0x83b   :  { %v286_v45 = vpack.c.bf16 %v285_v44, %v285_v44  ;;  %288 = vrot.lane.b32.xlu2 %v285_v44, %s3302_s27 }
 0x83d   :  { %294 = vrot.lane.b32.xlu0 %v286_v45, %s3302_s27 }
 0x840   :  { %v225_v47 = vpop.permute.xlu1 %224 }
 0x841   :  { %227 = vst.msk [vmem:[#allocation4 + $0x10] sm:$0xff] %vm86_vm4, %v225_v47 }
 0x848   :  { %v597_v46 = vpop.permute.xlu2 %596  ;;  %v425_v50 = vld [vmem:[#allocation4 + $0x10] sm:$0xff] }
 0x849   :  { %v599_v39 = vmul.f32 %v597_v46, %v580_v32 }
 0x84b   :  { %v600_v48 = vpack.c.bf16 %v599_v39, %v599_v39 }
 0x84d   :  { %603 = vrot.lane.b32.xlu0 %v600_v48, %s3302_s27 }
 0x895   :  { %v289_v49 = vpop.permute.xlu2 %288 }
 0x896   :  { %291 = vst.msk [vmem:[#allocation4 + $0x18] sm:$0xff] %vm86_vm4, %v289_v49 }
 0x89d   :  { %v426_v53 = vld [vmem:[#allocation4 + $0x18] sm:$0xff] }
 0x89e   :  { %v430_v54 = vpack.c.bf16 %v426_v53, %v425_v50  ;;  %v3495_v53 = vld [vmem:[%s4036_s0 + $0x28] sm:$0xff] }
 0x8a0   :  { %2750 = vmatmul.msk.bf16.gmra.mxu1 %vm86_vm4, %v430_v54 }
 0x8af   :  { %v295_v56 = vpop.permute.xlu0 %294 }
 0x8b0   :  { %2737 = vmatmul.msk.bf16.vlgmr.msra.gmra.mxu3 %vm86_vm4, %v295_v56 }
 0x8b1   :  { %791 = vmatpush.bf16.msra.mxu3 %v3413_v51 }
 0x8b5   :  { %792 = vmatpush.bf16.msra.mxu3 %v3419_v52 }
 0x8bf   :  { %v604_v57 = vpop.permute.xlu0 %603 }
 0x8c0   :  { %2763 = vmatmul.msk.bf16.vlgmr.msrb.gmra.mxu3 %vm86_vm4, %v604_v57 }
 0x91d   :  { %v475_v0 = vpop.f32.mrf.mxu1 }
 0x91e   :  { %v476_v51 = vadd.f32 %v3389_v3, %v475_v0 }
 0x933   :  { %v308_v59 = vpop.f32.mrf.mxu3 }
 0x934   :  { %v312_v60 = vadd.f32 %v308_v59, %v3466_v58 }
 0x936   :  { %3058 = vtanh.f32 %v312_v60  ;;  %v2738_v6 = vmul.f32 -1.442695, %v312_v60  ;;  %v477_v60 = vpop.f32.mrf.mxu1 }
 0x93b   :  { %v310_v61 = vpop.f32.mrf.mxu3 }
 0x93c   :  { %v3059_v63 = vpop.eup %3058  ;;  %v478_v61 = vadd.f32 %v3389_v3, %v477_v60 }
 0x93d   :  { %335 = vrot.lane.b32.xlu1 %v3059_v63, %s3301_s26 }
 0x943   :  { %v617_v52 = vpop.f32.mrf.mxu3 }
 0x944   :  { %v621_v1 = vadd.f32 %v617_v52, %v476_v51 }
 0x946   :  { %3060 = vtanh.f32 %v621_v1  ;;  %v2764_v5 = vmul.f32 -1.442695, %v621_v1 }
 0x948   :  { %3062 = vpow2.f32 %v2764_v5 }
 0x949   :  { %3064 = vpow2.f32 %v2738_v6 }
 0x94b   :  { %v619_v2 = vpop.f32.mrf.mxu3 }
 0x94c   :  { %v3061_v4 = vpop.eup %3060 }
 0x94d   :  { %644 = vrot.lane.b32.xlu2 %v3061_v4, %s3301_s26 }
 0x94e   :  { %v3063_v7 = vpop.eup %3062 }
 0x94f   :  { %v625_v8 = vadd.f32 1.0, %v3063_v7  ;;  %v3065_v9 = vpop.eup %3064 }
 0x950   :  { %v316_v10 = vadd.f32 1.0, %v3065_v9 }
 0x951   :  { %3066 = vrcp.f32 %v625_v8  ;;  %v637_v19 = vand.u32 2147483648, %v625_v8  ;;  %vm631_vm11 = vweird.f32 %v625_v8  ;;  %v635_v20 = vand.u32 2147483647, %v625_v8 }
 0x952   :  { %3068 = vrcp.f32 %v316_v10  ;;  %v328_v28 = vand.u32 2147483648, %v316_v10  ;;  %vm322_vm15 = vweird.f32 %v316_v10  ;;  %v326_v29 = vand.u32 2147483647, %v316_v10 }
 0x953   :  { %v638_v23 = vor.u32 1.1754944e-38, %v637_v19  ;;  %vm636_vm13 = vcmp.eq.f32.partialorder %v635_v20, 8.507059e+37 }
 0x954   :  { %v329_v31 = vor.u32 1.1754944e-38, %v328_v28  ;;  %vm327_vm1 = vcmp.eq.f32.partialorder %v326_v29, 8.507059e+37 }
 0x957   :  { %v3067_v11 = vpop.eup %3066 }
 0x958   :  { %v627_v12 = vmul.f32 %v3067_v11, %v625_v8  ;;  %v3069_v14 = vpop.eup %3068  ;;  %vm632_vm10 = vweird.f32 %v3067_v11 }
 0x959   :  { %v318_v16 = vmul.f32 %v3069_v14, %v316_v10  ;;  %vm633_vm12 = vmor %vm631_vm11, %vm632_vm10  ;;  %vm323_vm14 = vweird.f32 %v3069_v14 }
 0x95a   :  { %v628_v13 = vsub.f32 1.0, %v627_v12  ;;  %vm324_vm0 = vmor %vm322_vm15, %vm323_vm14 }
 0x95b   :  { %v319_v18 = vsub.f32 1.0, %v318_v16 }
 0x95c   :  { %v629_v15 = vmul.f32 %v3067_v11, %v628_v13 }
 0x95d   :  { %v320_v22 = vmul.f32 %v3069_v14, %v319_v18 }
 0x95e   :  { %v630_v17 = vadd.f32 %v3067_v11, %v629_v15 }
 0x95f   :  { %v321_v27 = vadd.f32 %v3069_v14, %v320_v22 }
 0x960   :  { %v634_v21 = vsel %vm633_vm12, %v3067_v11, %v630_v17 }
 0x961   :  { %v639_v25 = vsel %vm636_vm13, %v638_v23, %v634_v21  ;;  %v325_v30 = vsel %vm324_vm0, %v3069_v14, %v321_v27 }
 0x962   :  { %v330_v33 = vsel %vm327_vm1, %v329_v31, %v325_v30  ;;  %v642_v35 = vmul.f32 %v639_v25, %v3449_v41 }
 0x963   :  { %v333_v40 = vmul.f32 %v330_v33, %v3442_v36 }
 0x9a7   :  { %v645_v24 = vpop.permute.xlu2 %644 }
 0x9a8   :  { %v647_v26 = vmul.f32 %v645_v24, %v639_v25 }
 0x9aa   :  { %649 = vrot.lane.b32.xlu1 %v647_v26, %s3302_s27 }
 0x9af   :  { %v336_v32 = vpop.permute.xlu1 %335 }
 0x9b0   :  { %v338_v34 = vmul.f32 %v336_v32, %v330_v33 }
 0x9b2   :  { %340 = vrot.lane.b32.xlu0 %v338_v34, %s3302_s27 }
 0xa1c   :  { %v650_v37 = vpop.permute.xlu1 %649 }
 0xa1d   :  { %v3475_v38 = vadd.f32 %v650_v37, %v642_v35 }
 0xa1f   :  { %3070 = vtanh.f32 %v3475_v38 }
 0xa24   :  { %v341_v42 = vpop.permute.xlu0 %340 }
 0xa25   :  { %v3071_v43 = vpop.eup %3070  ;;  %v3479_v44 = vadd.f32 %v341_v42, %v333_v40 }
 0xa26   :  { %655 = vrot.lane.b32.xlu0 %v3071_v43, %s3301_s26 }
 0xa27   :  { %3072 = vtanh.f32 %v3479_v44 }
 0xa2d   :  { %v3073_v45 = vpop.eup %3072 }
 0xa2e   :  { %346 = vrot.lane.b32.xlu2 %v3073_v45, %s3301_s26 }
 0xa88   :  { %v347_v47 = vpop.permute.xlu2 %346 }
 0xa89   :  { %v3484_v41 = vmul.f32 %v347_v47, %v330_v33 }
 0xa8b   :  { %v350_v46 = vpack.c.bf16 %v3484_v41, %v3484_v41 }
 0xa8d   :  { %358 = vrot.lane.b32.xlu1 %v350_v46, %s3302_s27 }
 0xa98   :  { %v656_v36 = vpop.permute.xlu0 %655 }
 0xa99   :  { %v658_v39 = vmul.f32 %v656_v36, %v639_v25 }
 0xa9b   :  { %v659_v48 = vpack.c.bf16 %v658_v39, %v658_v39 }
 0xa9d   :  { %662 = vrot.lane.b32.xlu2 %v659_v48, %s3302_s27 }
 0xaf7   :  { %v663_v50 = vpop.permute.xlu2 %662 }
 0xaff   :  { %v359_v49 = vpop.permute.xlu1 %358 }
 0xb00   :  { %2739 = vmatmul.msk.bf16.vlgmr.msrb.gmra.mxu0 %vm86_vm4, %v359_v49 }
 0xb10   :  { %2765 = vmatmul.msk.bf16.vlgmr.msra.gmra.mxu0 %vm86_vm4, %v663_v50 }
 0xb7d   :  { %v372_v54 = vpop.f32.mrf.mxu0 }
 0xb7e   :  { %v376_v56 = vadd.f32 %v372_v54, %v3495_v53 }
 0xb80   :  { %3074 = vtanh.f32 %v376_v56  ;;  %v2740_v1 = vmul.f32 -1.442695, %v376_v56 }
 0xb85   :  { %v374_v57 = vpop.f32.mrf.mxu0 }
 0xb86   :  { %v3075_v59 = vpop.eup %3074 }
 0xb87   :  { %399 = vrot.lane.b32.xlu0 %v3075_v59, %s3301_s26 }
 0xb8d   :  { %v676_v63 = vpop.f32.mrf.mxu0 }
 0xb8e   :  { %v680_v0 = vadd.f32 %v676_v63, %v478_v61 }
 0xb90   :  { %3076 = vtanh.f32 %v680_v0  ;;  %v2766_v5 = vmul.f32 -1.442695, %v680_v0  ;;  %v2789_v0 = vmul.f32 -1.442695, %v3382_v62 }
 0xb91   :  { %3078 = vpow2.f32 %v2740_v1 }
 0xb95   :  { %v678_v51 = vpop.f32.mrf.mxu0 }
 0xb96   :  { %v3077_v52 = vpop.eup %3076 }
 0xb97   :  { %703 = vrot.lane.b32.xlu1 %v3077_v52, %s3301_s26  ;;  %v3079_v2 = vpop.eup %3078 }
 0xb98   :  { %v380_v4 = vadd.f32 1.0, %v3079_v2 }
 0xb9a   :  { %3080 = vrcp.f32 %v380_v4  ;;  %v392_v14 = vand.u32 2147483648, %v380_v4  ;;  %vm386_vm3 = vweird.f32 %v380_v4  ;;  %v390_v15 = vand.u32 2147483647, %v380_v4 }
 0xb9b   :  { %3082 = vpow2.f32 %v2766_v5 }
 0xb9c   :  { %v393_v18 = vor.u32 1.1754944e-38, %v392_v14  ;;  %vm391_vm6 = vcmp.eq.f32.partialorder %v390_v15, 8.507059e+37 }
 0xba0   :  { %v3081_v6 = vpop.eup %3080 }
 0xba1   :  { %v3083_v7 = vpop.eup %3082  ;;  %v382_v8 = vmul.f32 %v3081_v6, %v380_v4  ;;  %vm387_vm2 = vweird.f32 %v3081_v6 }
 0xba2   :  { %v684_v9 = vadd.f32 1.0, %v3083_v7  ;;  %vm388_vm5 = vmor %vm386_vm3, %vm387_vm2 }
 0xba3   :  { %v383_v10 = vsub.f32 1.0, %v382_v8 }
 0xba4   :  { %3084 = vrcp.f32 %v684_v9  ;;  %v696_v25 = vand.u32 2147483648, %v684_v9  ;;  %vm690_vm8 = vweird.f32 %v684_v9  ;;  %v694_v26 = vand.u32 2147483647, %v684_v9 }
 0xba5   :  { %v384_v11 = vmul.f32 %v3081_v6, %v383_v10 }
 0xba6   :  { %v697_v28 = vor.u32 1.1754944e-38, %v696_v25  ;;  %vm695_vm10 = vcmp.eq.f32.partialorder %v694_v26, 8.507059e+37 }
 0xba7   :  { %v385_v12 = vadd.f32 %v3081_v6, %v384_v11 }
 0xba9   :  { %v389_v16 = vsel %vm388_vm5, %v3081_v6, %v385_v12 }
 0xbaa   :  { %v3085_v13 = vpop.eup %3084  ;;  %v394_v20 = vsel %vm391_vm6, %v393_v18, %v389_v16 }
 0xbab   :  { %v686_v17 = vmul.f32 %v3085_v13, %v684_v9  ;;  %vm691_vm7 = vweird.f32 %v3085_v13  ;;  %v397_v32 = vmul.f32 %v394_v20, %v3479_v44 }
 0xbac   :  { %vm692_vm9 = vmor %vm690_vm8, %vm691_vm7 }
 0xbad   :  { %v687_v22 = vsub.f32 1.0, %v686_v17 }
 0xbaf   :  { %v688_v23 = vmul.f32 %v3085_v13, %v687_v22 }
 0xbb1   :  { %v689_v24 = vadd.f32 %v3085_v13, %v688_v23 }
 0xbb3   :  { %v693_v27 = vsel %vm692_vm9, %v3085_v13, %v689_v24 }
 0xbb4   :  { %v698_v30 = vsel %vm695_vm10, %v697_v28, %v693_v27 }
 0xbb5   :  { %v701_v37 = vmul.f32 %v698_v30, %v3475_v38 }
 0xbf9   :  { %v400_v19 = vpop.permute.xlu0 %399 }
 0xbfa   :  { %v402_v21 = vmul.f32 %v400_v19, %v394_v20 }
 0xbfc   :  { %404 = vrot.lane.b32.xlu2 %v402_v21, %s3302_s27 }
 0xc09   :  { %v704_v29 = vpop.permute.xlu1 %703 }
 0xc0a   :  { %v706_v31 = vmul.f32 %v704_v29, %v698_v30 }
 0xc0c   :  { %708 = vrot.lane.b32.xlu0 %v706_v31, %s3302_s27 }
 0xc14   :  { %352 = vrot.lane.b32.xlu0 %v3484_v41, %s3302_s27 }
 0xc56   :  { %v405_v33 = vpop.permute.xlu2 %404 }
 0xc57   :  { %v407_v34 = vadd.f32 %v405_v33, %v397_v32 }
 0xc59   :  { %3086 = vtanh.f32 %v407_v34 }
 0xc5f   :  { %v3087_v35 = vpop.eup %3086 }
 0xc60   :  { %410 = vrot.lane.b32.xlu1 %v3087_v35, %s3301_s26 }
 0xc7e   :  { %v709_v40 = vpop.permute.xlu0 %708 }
 0xc7f   :  { %v3508_v42 = vadd.f32 %v709_v40, %v701_v37 }
 0xc81   :  { %3088 = vtanh.f32 %v3508_v42 }
 0xc82   :  { %3090 = vtanh.f32 %v3382_v62 }
 0xc86   :  { %v353_v43 = vpop.permute.xlu0 %352 }
 0xc87   :  { %v3089_v45 = vpop.eup %3088  ;;  %355 = vst.msk [vmem:[#allocation4 + $0x20] sm:$0xff] %vm86_vm4, %v353_v43 }
 0xc88   :  { %714 = vrot.lane.b32.xlu2 %v3089_v45, %s3301_s26  ;;  %v3091_v41 = vpop.eup %3090 }
 0xc8e   :  { %v427_v49 = vld [vmem:[#allocation4 + $0x20] sm:$0xff] }
 0xcd2   :  { %v411_v44 = vpop.permute.xlu1 %410 }
 0xcd3   :  { %v413_v47 = vmul.f32 %v411_v44, %v394_v20 }
 0xcd5   :  { %415 = vrot.lane.b32.xlu1 %v413_v47, %s3302_s27  ;;  %v3543_v47 = vld [vmem:[%s4037_s1 + $0x8] sm:$0xff] }
 0xcd6   :  { %976 = vmatpush.bf16.msrb.mxu3 %v3543_v47  ;;  %1104 = vmatpush.bf16.msra.mxu1 %v3543_v47 }
 0xcdd   :  { %930 = vrot.lane.b32.xlu1 %v3091_v41, %s3301_s26  ;;  %v3549_v41 = vld [vmem:[%s4037_s1] sm:$0xff] }
 0xcde   :  { %977 = vmatpush.bf16.msrb.mxu3 %v3549_v41  ;;  %1105 = vmatpush.bf16.msra.mxu1 %v3549_v41 }
 0xce2   :  { %v715_v38 = vpop.permute.xlu2 %714 }
 0xce3   :  { %v717_v46 = vmul.f32 %v715_v38, %v698_v30 }
 0xce5   :  { %v718_v36 = vpack.c.bf16 %v717_v46, %v717_v46 }
 0xce7   :  { %721 = vrot.lane.b32.xlu2 %v718_v36, %s3302_s27 }
 0xd41   :  { %v722_v39 = vpop.permute.xlu2 %721 }
 0xd42   :  { %2767 = vmatmul.msk.bf16.vlgmr.msra.gmra.mxu2 %vm86_vm4, %v722_v39 }
 0xd47   :  { %v416_v48 = vpop.permute.xlu1 %415 }
 0xd48   :  { %418 = vst.msk [vmem:[#allocation4 + $0x28] sm:$0xff] %vm86_vm4, %v416_v48 }
 0xd4f   :  { %v428_v50 = vld [vmem:[#allocation4 + $0x28] sm:$0xff]  ;;  %v931_v13 = vpop.permute.xlu1 %930 }
 0xd50   :  { %v431_v54 = vpack.c.bf16 %v428_v50, %v427_v49 }
 0xd52   :  { %2751 = vmatmul.msk.bf16.gmra.mxu1 %vm86_vm4, %v431_v54 }
 0xdc5   :  { %v735_v56 = vpop.f32.mrf.mxu2 }
 0xdcd   :  { %v737_v57 = vpop.f32.mrf.mxu2 }
 0xdcf   :  { %v480_v59 = vpop.f32.mrf.mxu1 }
 0xdd0   :  { %v481_v60 = vadd.f32 %v3389_v3, %v480_v59 }
 0xdd2   :  { %v739_v61 = vadd.f32 %v735_v56, %v481_v60 }
 0xdd4   :  { %3092 = vtanh.f32 %v739_v61  ;;  %v2768_v52 = vmul.f32 -1.442695, %v739_v61 }
 0xdd5   :  { %3094 = vpow2.f32 %v2789_v0 }
 0xdd6   :  { %3096 = vpow2.f32 %v2768_v52 }
 0xdd7   :  { %v482_v36 = vpop.f32.mrf.mxu1 }
 0xdd8   :  { %v483_v39 = vadd.f32 %v3389_v3, %v482_v36 }
 0xdda   :  { %v3093_v63 = vpop.eup %3092 }
 0xddb   :  { %762 = vrot.lane.b32.xlu0 %v3093_v63, %s3301_s26  ;;  %v3095_v51 = vpop.eup %3094 }
 0xddc   :  { %v911_v1 = vadd.f32 1.0, %v3095_v51  ;;  %v3097_v2 = vpop.eup %3096 }
 0xddd   :  { %v743_v5 = vadd.f32 1.0, %v3097_v2 }
 0xdde   :  { %3098 = vrcp.f32 %v911_v1  ;;  %v923_v7 = vand.u32 2147483648, %v911_v1  ;;  %vm917_vm11 = vweird.f32 %v911_v1  ;;  %v921_v9 = vand.u32 2147483647, %v911_v1 }
 0xddf   :  { %3100 = vrcp.f32 %v743_v5  ;;  %v755_v21 = vand.u32 2147483648, %v743_v5  ;;  %vm749_vm0 = vweird.f32 %v743_v5  ;;  %v753_v22 = vand.u32 2147483647, %v743_v5 }
 0xde0   :  { %v924_v11 = vor.u32 1.1754944e-38, %v923_v7  ;;  %vm922_vm14 = vcmp.eq.f32.partialorder %v921_v9, 8.507059e+37 }
 0xde1   :  { %v756_v24 = vor.u32 1.1754944e-38, %v755_v21  ;;  %vm754_vm2 = vcmp.eq.f32.partialorder %v753_v22, 8.507059e+37 }
 0xde4   :  { %v3099_v4 = vpop.eup %3098 }
 0xde5   :  { %v913_v6 = vmul.f32 %v3099_v4, %v911_v1  ;;  %vm918_vm12 = vweird.f32 %v3099_v4  ;;  %v3101_v12 = vpop.eup %3100 }
 0xde6   :  { %vm919_vm13 = vmor %vm917_vm11, %vm918_vm12  ;;  %v745_v16 = vmul.f32 %v3101_v12, %v743_v5  ;;  %vm750_vm15 = vweird.f32 %v3101_v12  ;;  %vm900_vm12 = vcmask 31744  }
 0xde7   :  { %v914_v8 = vsub.f32 1.0, %v913_v6  ;;  %vm751_vm1 = vmor %vm749_vm0, %vm750_vm15 }
 0xde8   :  { %v746_v18 = vsub.f32 1.0, %v745_v16 }
 0xde9   :  { %v915_v10 = vmul.f32 %v3099_v4, %v914_v8 }
 0xdea   :  { %v747_v19 = vmul.f32 %v3101_v12, %v746_v18 }
 0xdeb   :  { %v916_v62 = vadd.f32 %v3099_v4, %v915_v10 }
 0xdec   :  { %v748_v20 = vadd.f32 %v3101_v12, %v747_v19 }
 0xded   :  { %v920_v14 = vsel %vm919_vm13, %v3099_v4, %v916_v62 }
 0xdee   :  { %v925_v15 = vsel %vm922_vm14, %v924_v11, %v920_v14  ;;  %v752_v23 = vsel %vm751_vm1, %v3101_v12, %v748_v20 }
 0xdef   :  { %v933_v17 = vmul.f32 %v931_v13, %v925_v15  ;;  %v757_v26 = vsel %vm754_vm2, %v756_v24, %v752_v23  ;;  %v928_v31 = vmul.f32 0.0, %v925_v15 }
 0xdf0   :  { %v760_v28 = vmul.f32 %v757_v26, %v3508_v42 }
 0xdf1   :  { %935 = vrot.lane.b32.xlu0 %v933_v17, %s3302_s27 }
 0xe4d   :  { %v763_v25 = vpop.permute.xlu0 %762 }
 0xe4e   :  { %v765_v27 = vmul.f32 %v763_v25, %v757_v26 }
 0xe50   :  { %767 = vrot.lane.b32.xlu2 %v765_v27, %s3302_s27 }
 0xe63   :  { %v936_v32 = vpop.permute.xlu0 %935 }
 0xe64   :  { %v3529_v33 = vadd.f32 %v936_v32, %v928_v31 }
 0xeaa   :  { %v768_v29 = vpop.permute.xlu2 %767 }
 0xeab   :  { %v3526_v30 = vadd.f32 %v768_v29, %v760_v28 }
 0xead   :  { %3102 = vtanh.f32 %v3526_v30 }
 0xeae   :  { %3104 = vtanh.f32 %v3529_v33 }
 0xeb3   :  { %v3103_v34 = vpop.eup %3102 }
 0xeb4   :  { %773 = vrot.lane.b32.xlu1 %v3103_v34, %s3301_s26  ;;  %v3105_v35 = vpop.eup %3104  ;;  %v2973_v34 = vld [vmem:[%s4041_s5 + $0x14] sm:$0xf0] }
 0xeb5   :  { %941 = vrot.lane.b32.xlu2 %v3105_v35, %s3301_s26 }
 0xf0f   :  { %v942_v37 = vpop.permute.xlu2 %941 }
 0xf10   :  { %v3534_v40 = vmul.f32 %v942_v37, %v925_v15  ;;  %v2783_v37 = vld [vmem:[%s4041_s5 + $0x18] sm:$0xf0] }
 0xf12   :  { %v945_v42 = vpack.c.bf16 %v3534_v40, %v3534_v40 }
 0xf14   :  { %953 = vrot.lane.b32.xlu1 %v945_v42, %s3302_s27  ;;  %v2971_v42 = vld [vmem:[%s4041_s5 + $0x4] sm:$0xf0] }
 0xf26   :  { %v774_v43 = vpop.permute.xlu1 %773 }
 0xf27   :  { %v776_v45 = vmul.f32 %v774_v43, %v757_v26 }
 0xf29   :  { %v777_v44 = vpack.c.bf16 %v776_v45, %v776_v45  ;;  %v2970_v45 = vld [vmem:[%s4041_s5 + $0x4] sm:$0xf] }
 0xf2b   :  { %780 = vrot.lane.b32.xlu0 %v777_v44, %s3302_s27  ;;  %v2775_v44 = vld [vmem:[%s4041_s5 + $0x8] sm:$0xf0] }
 0xf86   :  { %v954_v46 = vpop.permute.xlu1 %953 }
 0xf9d   :  { %v781_v38 = vpop.permute.xlu0 %780 }
 0xf9e   :  { %2769 = vmatmul.msk.bf16.vlgmr.msra.gmra.mxu3 %vm86_vm4, %v781_v38 }
 0xfae   :  { %2798 = vmatmul.msk.bf16.vlgmr.msrb.gmra.mxu3 %vm86_vm4, %v954_v46  ;;  %v2778_v46 = vor.u32 %v2970_v45, %v2775_v44 }
0x1021   :  { %v794_v48 = vpop.f32.mrf.mxu3 }
0x1022   :  { %v798_v49 = vadd.f32 %v794_v48, %v483_v39 }
0x1024   :  { %3106 = vtanh.f32 %v798_v49  ;;  %v2770_v61 = vmul.f32 -1.442695, %v798_v49 }
0x1029   :  { %v796_v50 = vpop.f32.mrf.mxu3 }
0x102a   :  { %v3107_v54 = vpop.eup %3106 }
0x102b   :  { %821 = vrot.lane.b32.xlu2 %v3107_v54, %s3301_s26 }
0x1031   :  { %v979_v56 = vpop.f32.mrf.mxu3 }
0x1032   :  { %v983_v57 = vadd.f32 %v979_v56, %v3433_v55 }
0x1034   :  { %3108 = vtanh.f32 %v983_v57  ;;  %v2799_v5 = vmul.f32 -1.442695, %v983_v57 }
0x1035   :  { %3110 = vpow2.f32 %v2770_v61 }
0x1039   :  { %v981_v59 = vpop.f32.mrf.mxu3 }
0x103a   :  { %v3109_v60 = vpop.eup %3108 }
0x103b   :  { %1006 = vrot.lane.b32.xlu0 %v3109_v60, %s3301_s26  ;;  %v3111_v63 = vpop.eup %3110 }
0x103c   :  { %v802_v0 = vadd.f32 1.0, %v3111_v63 }
0x103e   :  { %3112 = vrcp.f32 %v802_v0  ;;  %v814_v4 = vand.u32 2147483648, %v802_v0  ;;  %vm808_vm5 = vweird.f32 %v802_v0  ;;  %v812_v55 = vand.u32 2147483647, %v802_v0 }
0x103f   :  { %3114 = vpow2.f32 %v2799_v5 }
0x1040   :  { %v815_v7 = vor.u32 1.1754944e-38, %v814_v4  ;;  %vm813_vm7 = vcmp.eq.f32.partialorder %v812_v55, 8.507059e+37 }
0x1044   :  { %v3113_v3 = vpop.eup %3112 }
0x1045   :  { %v804_v51 = vmul.f32 %v3113_v3, %v802_v0  ;;  %vm809_vm3 = vweird.f32 %v3113_v3  ;;  %v3115_v11 = vpop.eup %3114 }
0x1046   :  { %vm810_vm6 = vmor %vm808_vm5, %vm809_vm3  ;;  %v987_v62 = vadd.f32 1.0, %v3115_v11  ;;  %v3632_v11 = vld [vmem:[%s4039_s4] ss:$0 sm:$0xff] }
0x1047   :  { %v805_v52 = vsub.f32 1.0, %v804_v51 }
0x1048   :  { %3116 = vrcp.f32 %v987_v62  ;;  %v999_v17 = vand.u32 2147483648, %v987_v62  ;;  %vm993_vm9 = vweird.f32 %v987_v62  ;;  %v997_v18 = vand.u32 2147483647, %v987_v62 }
0x1049   :  { %v806_v1 = vmul.f32 %v3113_v3, %v805_v52 }
0x104a   :  { %v1000_v20 = vor.u32 1.1754944e-38, %v999_v17  ;;  %vm998_vm11 = vcmp.eq.f32.partialorder %v997_v18, 8.507059e+37 }
0x104b   :  { %v807_v2 = vadd.f32 %v3113_v3, %v806_v1 }
0x104d   :  { %v811_v6 = vsel %vm810_vm6, %v3113_v3, %v807_v2  ;;  %v841_v3 = vld [vmem:[%s4042_s6] sm:$0x3] }
0x104e   :  { %v816_v9 = vsel %vm813_vm7, %v815_v7, %v811_v6  ;;  %v3117_v12 = vpop.eup %3116  ;;  %v843_v51 = vperm.slane %v841_v3, 0  ;;  %v844_v2 = vperm.slane %v841_v3, 1 }
0x104f   :  { %v989_v13 = vmul.f32 %v3117_v12, %v987_v62  ;;  %vm994_vm8 = vweird.f32 %v3117_v12  ;;  %v819_v24 = vmul.f32 %v816_v9, %v3526_v30  ;;  %v2781_v30 = vld [vmem:[%s4041_s5 + $0x10] sm:$0xf] }
0x1050   :  { %vm995_vm10 = vmor %vm993_vm9, %vm994_vm8  ;;  %v2782_v35 = vor.u32 %v2973_v34, %v2781_v30 }
0x1051   :  { %v990_v14 = vsub.f32 1.0, %v989_v13 }
0x1052   :  { %879 = vmatpush.bf16.msrb.mxu0 %v2782_v35 }
0x1053   :  { %v991_v15 = vmul.f32 %v3117_v12, %v990_v14 }
0x1055   :  { %v992_v16 = vadd.f32 %v3117_v12, %v991_v15 }
0x1057   :  { %v996_v19 = vsel %vm995_vm10, %v3117_v12, %v992_v16 }
0x1058   :  { %v1001_v22 = vsel %vm998_vm11, %v1000_v20, %v996_v19 }
0x1059   :  { %v1004_v28 = vmul.f32 %v1001_v22, %v3529_v33  ;;  %v2972_v33 = vld [vmem:[%s4041_s5 + $0x14] sm:$0xf] }
0x105a   :  { %v2786_v43 = vor.u32 %v2972_v33, %v2783_v37 }
0x105c   :  { %892 = vmatpush.bf16.msrb.mxu2 %v2786_v43 }
0x1060   :  { %893 = vmatpush.bf16.msrb.mxu2 %v2778_v46 }
0x1064   :  { %1168 = vmatpush.bf16.msra.mxu2 %v3543_v47 }
0x1068   :  { %1169 = vmatpush.bf16.msra.mxu2 %v3549_v41 }
0x1085   :  { %v822_v8 = vpop.permute.xlu2 %821 }
0x1086   :  { %v824_v10 = vmul.f32 %v822_v8, %v816_v9 }
0x1088   :  { %826 = vrot.lane.b32.xlu1 %v824_v10, %s3302_s27 }
0x10ad   :  { %v1007_v21 = vpop.permute.xlu0 %1006 }
0x10ae   :  { %v1009_v23 = vmul.f32 %v1007_v21, %v1001_v22 }
0x10b0   :  { %1011 = vrot.lane.b32.xlu2 %v1009_v23, %s3302_s27 }
0x10fa   :  { %v827_v25 = vpop.permute.xlu1 %826 }
0x10fb   :  { %v829_v26 = vadd.f32 %v827_v25, %v819_v24 }
0x10fd   :  { %3118 = vtanh.f32 %v829_v26 }
0x1103   :  { %v3119_v27 = vpop.eup %3118 }
0x1104   :  { %832 = vrot.lane.b32.xlu0 %v3119_v27, %s3301_s26 }
0x110a   :  { %v1012_v29 = vpop.permute.xlu2 %1011 }
0x110b   :  { %v3565_v31 = vadd.f32 %v1012_v29, %v1004_v28 }
0x110c   :  { %947 = vrot.lane.b32.xlu0 %v3534_v40, %s3302_s27  ;;  %v2773_v40 = vld [vmem:[%s4041_s5] sm:$0xf] }
0x110d   :  { %3120 = vtanh.f32 %v3565_v31  ;;  %v2774_v38 = vor.u32 %v2971_v42, %v2773_v40 }
0x110f   :  { %880 = vmatpush.bf16.msrb.mxu0 %v2774_v38 }
0x1113   :  { %v3121_v32 = vpop.eup %3120  ;;  %1040 = vmatpush.bf16.msra.mxu0 %v3543_v47  ;;  %v2979_v47 = vld [vmem:[%s4038_s2 + $0x8] sm:$0xff] }
0x1114   :  { %1017 = vrot.lane.b32.xlu1 %v3121_v32, %s3301_s26  ;;  %1265 = vmatpush.bf16.msra.mxu3 %v2979_v47 }
0x1117   :  { %1041 = vmatpush.bf16.msra.mxu0 %v3549_v41  ;;  %v2978_v41 = vld [vmem:[%s4038_s2] sm:$0xff] }
0x1118   :  { %1266 = vmatpush.bf16.msra.mxu3 %v2978_v41 }
0x1176   :  { %v833_v36 = vpop.permute.xlu0 %832 }
0x1177   :  { %v835_v39 = vmul.f32 %v833_v36, %v816_v9 }
0x1179   :  { %v836_v48 = vpack.c.bf16 %v835_v39, %v835_v39 }
0x117b   :  { %848 = vrot.lane.b32.xlu2 %v836_v48, %s3302_s27 }
0x117e   :  { %v948_v49 = vpop.permute.xlu0 %947 }
0x117f   :  { %950 = vst.msk [vmem:[#allocation4] sm:$0xff] %vm86_vm4, %v948_v49 }
0x1186   :  { %v1018_v50 = vpop.permute.xlu1 %1017  ;;  %v1222_v61 = vld [vmem:[#allocation4] sm:$0xff] }
0x1187   :  { %v1020_v54 = vmul.f32 %v1018_v50, %v1001_v22 }
0x1189   :  { %v1021_v56 = vpack.c.bf16 %v1020_v54, %v1020_v54  ;;  %1023 = vrot.lane.b32.xlu1 %v1020_v54, %s3302_s27 }
0x118b   :  { %1029 = vrot.lane.b32.xlu2 %v1021_v56, %s3302_s27 }
0x11d5   :  { %v849_v57 = vpop.permute.xlu2 %848 }
0x11d6   :  { %2787 = vmatmul.msk.bf16.vlgmr.msrb.gmra.mxu0 %vm86_vm4, %v849_v57  ;;  %2788 = vmatmul.msk.bf16.vlgmr.msrb.gmra.mxu2 %vm86_vm4, %v849_v57 }
0x11e5   :  { %v1030_v59 = vpop.permute.xlu2 %1029 }
0x11e6   :  { %2800 = vmatmul.msk.bf16.vlgmr.msra.gmra.mxu0 %vm86_vm4, %v1030_v59 }
0x11fb   :  { %v1024_v60 = vpop.permute.xlu1 %1023 }
0x11fc   :  { %1026 = vst.msk [vmem:[#allocation4 + $0x8] sm:$0xff] %vm86_vm4, %v1024_v60 }
0x1203   :  { %v1223_v63 = vld [vmem:[#allocation4 + $0x8] sm:$0xff] }
0x1204   :  { %v1227_v0 = vpack.c.bf16 %v1223_v63, %v1222_v61  ;;  %v2977_v63 = vld [vmem:[%s4040_s3 + $0x8] sm:$0xff] }
0x1205   :  { %1351 = vmatpush.bf16.msrb.mxu0 %v2977_v63  ;;  %1410 = vmatpush.bf16.msrb.mxu1 %v2977_v63 }
0x1206   :  { %2814 = vmatmul.msk.bf16.vlgmr.msra.gmra.mxu3 %vm86_vm4, %v1227_v0  ;;  %v2976_v0 = vld [vmem:[%s4040_s3] sm:$0xff]  ;;  %1469 = vmatpush.bf16.msrb.mxu2 %v2977_v63 }
0x1209   :  { %1352 = vmatpush.bf16.msrb.mxu0 %v2976_v0  ;;  %1411 = vmatpush.bf16.msrb.mxu1 %v2976_v0 }
0x120a   :  { %1470 = vmatpush.bf16.msrb.mxu2 %v2976_v0 }
0x120d   :  { %1528 = vmatpush.bf16.msra.mxu0 %v2977_v63 }
0x1211   :  { %1529 = vmatpush.bf16.msra.mxu0 %v2976_v0 }
0x1253   :  { %v882_v52 = vpop.f32.mrf.mxu0 }
0x1254   :  { %v3617_v1 = vadd.f32 %v882_v52, %v843_v51 }
0x1256   :  { %899 = vst [vmem:[%s4043_s7] sm:$0xff] %v3617_v1 }
0x1259   :  { %v895_v4 = vpop.f32.mrf.mxu2 }
0x125a   :  { %v896_v5 = vadd.f32 %v895_v4, %v844_v2 }
0x125b   :  { %v884_v55 = vpop.f32.mrf.mxu0 }
0x125c   :  { %901 = vst.msk [vmem:[%s4043_s7 + $0x8] sm:$0xff] %vm900_vm12, %v896_v5 }
0x1261   :  { %v897_v6 = vpop.f32.mrf.mxu2 }
0x1263   :  { %v1043_v7 = vpop.f32.mrf.mxu0 }
0x1264   :  { %v1047_v8 = vadd.f32 %v1043_v7, %v3466_v58 }
0x1266   :  { %3122 = vtanh.f32 %v1047_v8  ;;  %v2801_v14 = vmul.f32 -1.442695, %v1047_v8 }
0x126b   :  { %v1045_v9 = vpop.f32.mrf.mxu0 }
0x126c   :  { %v3123_v10 = vpop.eup %3122 }
0x126d   :  { %1070 = vrot.lane.b32.xlu0 %v3123_v10, %s3301_s26 }
0x1289   :  { %v1268_v62 = vpop.f32.mrf.mxu3 }
0x128a   :  { %v1269_v12 = vadd.f32 %v3632_v11, %v1268_v62 }
0x128c   :  { %3124 = vtanh.f32 %v1269_v12  ;;  %v2817_v20 = vmul.f32 -1.442695, %v1269_v12 }
0x128d   :  { %3126 = vpow2.f32 %v2801_v14 }
0x1291   :  { %v1270_v55 = vpop.f32.mrf.mxu3 }
0x1292   :  { %v3125_v13 = vpop.eup %3124  ;;  %v1271_v6 = vadd.f32 %v3632_v11, %v1270_v55 }
0x1293   :  { %1310 = vrot.lane.b32.xlu1 %v3125_v13, %s3301_s26  ;;  %v3127_v58 = vpop.eup %3126 }
0x1294   :  { %v1051_v15 = vadd.f32 1.0, %v3127_v58 }
0x1296   :  { %3128 = vrcp.f32 %v1051_v15  ;;  %v1063_v22 = vand.u32 2147483648, %v1051_v15  ;;  %vm1057_vm14 = vweird.f32 %v1051_v15  ;;  %v1061_v23 = vand.u32 2147483647, %v1051_v15 }
0x1297   :  { %3130 = vpow2.f32 %v2817_v20 }
0x1298   :  { %v1064_v25 = vor.u32 1.1754944e-38, %v1063_v22  ;;  %vm1062_vm0 = vcmp.eq.f32.partialorder %v1061_v23, 8.507059e+37 }
0x129c   :  { %v3129_v16 = vpop.eup %3128 }
0x129d   :  { %v1053_v17 = vmul.f32 %v3129_v16, %v1051_v15  ;;  %vm1058_vm13 = vweird.f32 %v3129_v16  ;;  %v3131_v29 = vpop.eup %3130 }
0x129e   :  { %vm1059_vm15 = vmor %vm1057_vm14, %vm1058_vm13  ;;  %v1291_v32 = vadd.f32 1.0, %v3131_v29 }
0x129f   :  { %v1054_v18 = vsub.f32 1.0, %v1053_v17 }
0x12a0   :  { %3132 = vrcp.f32 %v1291_v32  ;;  %v1303_v40 = vand.u32 2147483648, %v1291_v32  ;;  %vm1297_vm2 = vweird.f32 %v1291_v32  ;;  %v1301_v42 = vand.u32 2147483647, %v1291_v32 }
0x12a1   :  { %v1055_v19 = vmul.f32 %v3129_v16, %v1054_v18 }
0x12a2   :  { %v1304_v45 = vor.u32 1.1754944e-38, %v1303_v40  ;;  %vm1302_vm5 = vcmp.eq.f32.partialorder %v1301_v42, 8.507059e+37 }
0x12a3   :  { %v1056_v21 = vadd.f32 %v3129_v16, %v1055_v19 }
0x12a5   :  { %v1060_v24 = vsel %vm1059_vm15, %v3129_v16, %v1056_v21 }
0x12a6   :  { %v1065_v27 = vsel %vm1062_vm0, %v1064_v25, %v1060_v24  ;;  %v3133_v30 = vpop.eup %3132 }
0x12a7   :  { %v1293_v34 = vmul.f32 %v3133_v30, %v1291_v32  ;;  %vm1298_vm1 = vweird.f32 %v3133_v30  ;;  %v1068_v36 = vmul.f32 %v1065_v27, %v3565_v31 }
0x12a8   :  { %vm1299_vm3 = vmor %vm1297_vm2, %vm1298_vm1 }
0x12a9   :  { %v1294_v33 = vsub.f32 1.0, %v1293_v34 }
0x12ab   :  { %v1295_v35 = vmul.f32 %v3133_v30, %v1294_v33 }
0x12ad   :  { %v1296_v37 = vadd.f32 %v3133_v30, %v1295_v35 }
0x12af   :  { %v1300_v43 = vsel %vm1299_vm3, %v3133_v30, %v1296_v37 }
0x12b0   :  { %v1305_v38 = vsel %vm1302_vm5, %v1304_v45, %v1300_v43 }
0x12b1   :  { %v1308_v50 = vmul.f32 0.0, %v1305_v38 }
0x12df   :  { %v1071_v26 = vpop.permute.xlu0 %1070 }
0x12e0   :  { %v1073_v28 = vmul.f32 %v1071_v26, %v1065_v27 }
0x12e2   :  { %1075 = vrot.lane.b32.xlu2 %v1073_v28, %s3302_s27 }
0x1305   :  { %v1311_v44 = vpop.permute.xlu1 %1310 }
0x1306   :  { %v1313_v46 = vmul.f32 %v1311_v44, %v1305_v38 }
0x1308   :  { %1315 = vrot.lane.b32.xlu0 %v1313_v46, %s3302_s27 }
0x133c   :  { %v1076_v39 = vpop.permute.xlu2 %1075 }
0x133d   :  { %v3639_v48 = vadd.f32 %v1076_v39, %v1068_v36 }
0x133f   :  { %3134 = vtanh.f32 %v3639_v48 }
0x1345   :  { %v3135_v49 = vpop.eup %3134 }
0x1346   :  { %1081 = vrot.lane.b32.xlu1 %v3135_v49, %s3301_s26 }
0x137a   :  { %v1316_v54 = vpop.permute.xlu0 %1315 }
0x137b   :  { %v3643_v56 = vadd.f32 %v1316_v54, %v1308_v50 }
0x137d   :  { %3136 = vtanh.f32 %v3643_v56 }
0x1383   :  { %v3137_v47 = vpop.eup %3136 }
0x1384   :  { %1321 = vrot.lane.b32.xlu2 %v3137_v47, %s3301_s26 }
0x13b8   :  { %v1082_v57 = vpop.permute.xlu1 %1081 }
0x13b9   :  { %v3647_v41 = vmul.f32 %v1082_v57, %v1065_v27 }
0x13bb   :  { %v1085_v31 = vpack.c.bf16 %v3647_v41, %v3647_v41 }
0x13bd   :  { %1093 = vrot.lane.b32.xlu0 %v1085_v31, %s3302_s27 }
0x13de   :  { %v1322_v59 = vpop.permute.xlu2 %1321 }
0x13df   :  { %v1324_v60 = vmul.f32 %v1322_v59, %v1305_v38 }
0x13e1   :  { %v1325_v61 = vpack.c.bf16 %v1324_v60, %v1324_v60 }
0x13e3   :  { %1328 = vrot.lane.b32.xlu1 %v1325_v61, %s3302_s27 }
0x142f   :  { %v1094_v3 = vpop.permute.xlu0 %1093 }
0x1430   :  { %2802 = vmatmul.msk.bf16.vlgmr.msra.gmra.mxu1 %vm86_vm4, %v1094_v3 }
0x1455   :  { %v1329_v51 = vpop.permute.xlu1 %1328 }
0x1456   :  { %2826 = vmatmul.msk.bf16.vlgmr.msrb.gmra.mxu0 %vm86_vm4, %v1329_v51 }
0x14ad   :  { %v1107_v52 = vpop.f32.mrf.mxu1 }
0x14ae   :  { %v1111_v2 = vadd.f32 %v1107_v52, %v3495_v53 }
0x14b0   :  { %3138 = vtanh.f32 %v1111_v2  ;;  %v2803_v62 = vmul.f32 -1.442695, %v1111_v2 }
0x14b5   :  { %v1109_v4 = vpop.f32.mrf.mxu1 }
0x14b6   :  { %v3139_v5 = vpop.eup %3138 }
0x14b7   :  { %1134 = vrot.lane.b32.xlu2 %v3139_v5, %s3301_s26 }
0x14d3   :  { %v1354_v7 = vpop.f32.mrf.mxu0 }
0x14d4   :  { %v1358_v8 = vadd.f32 %v1354_v7, %v1271_v6 }
0x14d6   :  { %3140 = vtanh.f32 %v1358_v8  ;;  %v2827_v24 = vmul.f32 -1.442695, %v1358_v8 }
0x14d7   :  { %3142 = vpow2.f32 %v2803_v62 }
0x14db   :  { %v1356_v9 = vpop.f32.mrf.mxu0 }
0x14dc   :  { %v3141_v10 = vpop.eup %3140 }
0x14dd   :  { %1381 = vrot.lane.b32.xlu0 %v3141_v10, %s3301_s26  ;;  %v3143_v12 = vpop.eup %3142 }
0x14de   :  { %v1115_v13 = vadd.f32 1.0, %v3143_v12 }
0x14e0   :  { %3144 = vrcp.f32 %v1115_v13  ;;  %v1127_v17 = vand.u32 2147483648, %v1115_v13  ;;  %vm1121_vm7 = vweird.f32 %v1115_v13  ;;  %v1125_v18 = vand.u32 2147483647, %v1115_v13 }
0x14e1   :  { %3146 = vpow2.f32 %v2827_v24 }
0x14e2   :  { %v1128_v20 = vor.u32 1.1754944e-38, %v1127_v17  ;;  %vm1126_vm9 = vcmp.eq.f32.partialorder %v1125_v18, 8.507059e+37 }
0x14e6   :  { %v3145_v53 = vpop.eup %3144 }
0x14e7   :  { %v1117_v14 = vmul.f32 %v3145_v53, %v1115_v13  ;;  %vm1122_vm6 = vweird.f32 %v3145_v53  ;;  %v3147_v25 = vpop.eup %3146 }
0x14e8   :  { %vm1123_vm8 = vmor %vm1121_vm7, %vm1122_vm6  ;;  %v1362_v26 = vadd.f32 1.0, %v3147_v25 }
0x14e9   :  { %v1118_v58 = vsub.f32 1.0, %v1117_v14 }
0x14ea   :  { %3148 = vrcp.f32 %v1362_v26  ;;  %v1374_v34 = vand.u32 2147483648, %v1362_v26  ;;  %vm1368_vm11 = vweird.f32 %v1362_v26  ;;  %v1372_v33 = vand.u32 2147483647, %v1362_v26 }
0x14eb   :  { %v1119_v15 = vmul.f32 %v3145_v53, %v1118_v58 }
0x14ec   :  { %v1375_v37 = vor.u32 1.1754944e-38, %v1374_v34  ;;  %vm1373_vm14 = vcmp.eq.f32.partialorder %v1372_v33, 8.507059e+37 }
0x14ed   :  { %v1120_v16 = vadd.f32 %v3145_v53, %v1119_v15 }
0x14ef   :  { %v1124_v19 = vsel %vm1123_vm8, %v3145_v53, %v1120_v16 }
0x14f0   :  { %v1129_v22 = vsel %vm1126_vm9, %v1128_v20, %v1124_v19  ;;  %v3149_v27 = vpop.eup %3148 }
0x14f1   :  { %v1364_v28 = vmul.f32 %v3149_v27, %v1362_v26  ;;  %vm1369_vm10 = vweird.f32 %v3149_v27  ;;  %v1132_v45 = vmul.f32 %v1129_v22, %v3639_v48 }
0x14f2   :  { %vm1370_vm13 = vmor %vm1368_vm11, %vm1369_vm10 }
0x14f3   :  { %v1365_v29 = vsub.f32 1.0, %v1364_v28 }
0x14f5   :  { %v1366_v32 = vmul.f32 %v3149_v27, %v1365_v29 }
0x14f7   :  { %v1367_v30 = vadd.f32 %v3149_v27, %v1366_v32 }
0x14f9   :  { %v1371_v35 = vsel %vm1370_vm13, %v3149_v27, %v1367_v30 }
0x14fa   :  { %v1376_v42 = vsel %vm1373_vm14, %v1375_v37, %v1371_v35  ;;  %v3298_v35 = vld [vmem:[%s4036_s0 + $0x20] sm:$0xff] }
0x14fb   :  { %v1379_v36 = vmul.f32 %v1376_v42, %v3643_v56 }
0x1511   :  { %v1135_v21 = vpop.permute.xlu2 %1134 }
0x1512   :  { %v1137_v23 = vmul.f32 %v1135_v21, %v1129_v22 }
0x1514   :  { %1139 = vrot.lane.b32.xlu1 %v1137_v23, %s3302_s27 }
0x154f   :  { %v1382_v40 = vpop.permute.xlu0 %1381 }
0x1550   :  { %v1384_v43 = vmul.f32 %v1382_v40, %v1376_v42 }
0x1552   :  { %1386 = vrot.lane.b32.xlu2 %v1384_v43, %s3302_s27 }
0x155a   :  { %1087 = vrot.lane.b32.xlu2 %v3647_v41, %s3302_s27 }
0x1586   :  { %v1140_v44 = vpop.permute.xlu1 %1139 }
0x1587   :  { %v3670_v38 = vadd.f32 %v1140_v44, %v1132_v45 }
0x1589   :  { %3150 = vtanh.f32 %v3670_v38 }
0x158f   :  { %v3151_v46 = vpop.eup %3150 }
0x1590   :  { %1145 = vrot.lane.b32.xlu0 %v3151_v46, %s3301_s26 }
0x15ac   :  { %v1387_v39 = vpop.permute.xlu2 %1386 }
0x15ad   :  { %v1389_v49 = vadd.f32 %v1387_v39, %v1379_v36 }
0x15af   :  { %3152 = vtanh.f32 %v1389_v49 }
0x15b4   :  { %v1088_v50 = vpop.permute.xlu2 %1087 }
0x15b5   :  { %v3153_v54 = vpop.eup %3152  ;;  %1090 = vst.msk [vmem:[#allocation4 + $0x10] sm:$0xff] %vm86_vm4, %v1088_v50 }
0x15b6   :  { %1392 = vrot.lane.b32.xlu1 %v3153_v54, %s3301_s26 }
0x15bc   :  { %v1224_v56 = vld [vmem:[#allocation4 + $0x10] sm:$0xff] }
0x1602   :  { %v1146_v48 = vpop.permute.xlu0 %1145 }
0x1603   :  { %v1148_v47 = vmul.f32 %v1146_v48, %v1129_v22 }
0x1605   :  { %1151 = vrot.lane.b32.xlu0 %v1148_v47, %s3302_s27  ;;  %v1149_v5 = vpack.c.bf16 %v1148_v47, %v1148_v47 }
0x1628   :  { %v1393_v57 = vpop.permute.xlu1 %1392 }
0x1629   :  { %v1395_v41 = vmul.f32 %v1393_v57, %v1376_v42 }
0x162b   :  { %v1396_v31 = vpack.c.bf16 %v1395_v41, %v1395_v41 }
0x162d   :  { %1399 = vrot.lane.b32.xlu1 %v1396_v31, %s3302_s27 }
0x1677   :  { %v1152_v59 = vpop.permute.xlu0 %1151 }
0x1678   :  { %1154 = vst.msk [vmem:[#allocation4 + $0x18] sm:$0xff] %vm86_vm4, %v1152_v59  ;;  %v2852_v59 = vmul.f32 -1.442695, %v3298_v35 }
0x167f   :  { %v1225_v60 = vld [vmem:[#allocation4 + $0x18] sm:$0xff] }
0x1680   :  { %v1228_v61 = vpack.c.bf16 %v1225_v60, %v1224_v56 }
0x1682   :  { %2815 = vmatmul.msk.bf16.gmra.mxu3 %vm86_vm4, %v1228_v61 }
0x169f   :  { %v1400_v63 = vpop.permute.xlu1 %1399 }
0x16a0   :  { %2828 = vmatmul.msk.bf16.vlgmr.msrb.gmra.mxu1 %vm86_vm4, %v1400_v63 }
0x1705   :  { %v1273_v0 = vpop.f32.mrf.mxu3 }
0x1706   :  { %v1274_v3 = vadd.f32 %v3632_v11, %v1273_v0 }
0x171d   :  { %v1413_v51 = vpop.f32.mrf.mxu1 }
0x171e   :  { %v1417_v52 = vadd.f32 %v1413_v51, %v1274_v3 }
0x1720   :  { %3154 = vtanh.f32 %v1417_v52  ;;  %v2829_v55 = vmul.f32 -1.442695, %v1417_v52 }
0x1722   :  { %3156 = vpow2.f32 %v2829_v55 }
0x1725   :  { %v1415_v2 = vpop.f32.mrf.mxu1 }
0x1726   :  { %v3155_v4 = vpop.eup %3154 }
0x1727   :  { %1440 = vrot.lane.b32.xlu2 %v3155_v4, %s3301_s26 }
0x1728   :  { %v3157_v6 = vpop.eup %3156 }
0x1729   :  { %v1421_v7 = vadd.f32 1.0, %v3157_v6 }
0x172b   :  { %3158 = vrcp.f32 %v1421_v7  ;;  %v1433_v13 = vand.u32 2147483648, %v1421_v7  ;;  %vm1427_vm0 = vweird.f32 %v1421_v7  ;;  %v1431_v53 = vand.u32 2147483647, %v1421_v7 }
0x172d   :  { %v1434_v58 = vor.u32 1.1754944e-38, %v1433_v13  ;;  %vm1432_vm2 = vcmp.eq.f32.partialorder %v1431_v53, 8.507059e+37 }
0x172f   :  { %1157 = vrot.lane.b32.xlu2 %v1149_v5, %s3302_s27 }
0x1731   :  { %v3159_v8 = vpop.eup %3158 }
0x1732   :  { %v1423_v9 = vmul.f32 %v3159_v8, %v1421_v7  ;;  %vm1428_vm15 = vweird.f32 %v3159_v8  ;;  %v1275_v7 = vpop.f32.mrf.mxu3 }
0x1733   :  { %vm1429_vm1 = vmor %vm1427_vm0, %vm1428_vm15 }
0x1734   :  { %v1424_v10 = vsub.f32 1.0, %v1423_v9 }
0x1736   :  { %v1425_v62 = vmul.f32 %v3159_v8, %v1424_v10 }
0x1738   :  { %v1426_v12 = vadd.f32 %v3159_v8, %v1425_v62 }
0x173a   :  { %v1430_v14 = vsel %vm1429_vm1, %v3159_v8, %v1426_v12  ;;  %v1276_v8 = vadd.f32 %v3632_v11, %v1275_v7 }
0x173b   :  { %v1435_v16 = vsel %vm1432_vm2, %v1434_v58, %v1430_v14 }
0x173c   :  { %v1438_v19 = vmul.f32 %v1435_v16, %v1389_v49 }
0x1781   :  { %v1441_v15 = vpop.permute.xlu2 %1440 }
0x1782   :  { %v1443_v17 = vmul.f32 %v1441_v15, %v1435_v16 }
0x1784   :  { %1445 = vrot.lane.b32.xlu0 %v1443_v17, %s3302_s27 }
0x1789   :  { %v1158_v18 = vpop.permute.xlu2 %1157 }
0x178a   :  { %2804 = vmatmul.msk.bf16.vlgmr.msra.gmra.mxu2 %vm86_vm4, %v1158_v18 }
0x17f6   :  { %v1446_v20 = vpop.permute.xlu0 %1445 }
0x17f7   :  { %v3687_v21 = vadd.f32 %v1446_v20, %v1438_v19 }
0x17f9   :  { %3160 = vtanh.f32 %v3687_v21 }
0x17ff   :  { %v3161_v22 = vpop.eup %3160 }
0x1800   :  { %1451 = vrot.lane.b32.xlu1 %v3161_v22, %s3301_s26 }
0x180d   :  { %v1171_v23 = vpop.f32.mrf.mxu2 }
0x180e   :  { %v1175_v24 = vadd.f32 %v1171_v23, %v3617_v1 }
0x1810   :  { %3162 = vtanh.f32 %v1175_v24  ;;  %v2805_v27 = vmul.f32 -1.442695, %v1175_v24 }
0x1812   :  { %3164 = vpow2.f32 %v2805_v27 }
0x1815   :  { %v1173_v25 = vpop.f32.mrf.mxu2 }
0x1816   :  { %v3163_v26 = vpop.eup %3162 }
0x1817   :  { %1198 = vrot.lane.b32.xlu1 %v3163_v26, %s3301_s26 }
0x1818   :  { %v3165_v28 = vpop.eup %3164 }
0x1819   :  { %v1179_v29 = vadd.f32 1.0, %v3165_v28 }
0x181b   :  { %3166 = vrcp.f32 %v1179_v29  ;;  %v1191_v44 = vand.u32 2147483648, %v1179_v29  ;;  %vm1185_vm5 = vweird.f32 %v1179_v29  ;;  %v1189_v46 = vand.u32 2147483647, %v1179_v29 }
0x181c   :  { %3168 = vtanh.f32 %v3298_v35 }
0x181d   :  { %v1192_v39 = vor.u32 1.1754944e-38, %v1191_v44  ;;  %vm1190_vm7 = vcmp.eq.f32.partialorder %v1189_v46, 8.507059e+37 }
0x1821   :  { %v3167_v30 = vpop.eup %3166 }
0x1822   :  { %v1181_v37 = vmul.f32 %v3167_v30, %v1179_v29  ;;  %v3169_v42 = vpop.eup %3168  ;;  %vm1186_vm3 = vweird.f32 %v3167_v30 }
0x1823   :  { %vm1187_vm6 = vmor %vm1185_vm5, %vm1186_vm3 }
0x1824   :  { %v1182_v40 = vsub.f32 1.0, %v1181_v37 }
0x1826   :  { %v1183_v43 = vmul.f32 %v3167_v30, %v1182_v40 }
0x1828   :  { %v1184_v45 = vadd.f32 %v3167_v30, %v1183_v43 }
0x182a   :  { %v1188_v36 = vsel %vm1187_vm6, %v3167_v30, %v1184_v45 }
0x182b   :  { %v1193_v50 = vsel %vm1190_vm7, %v1192_v39, %v1188_v36 }
0x182c   :  { %v1196_v47 = vmul.f32 %v1193_v50, %v3670_v38 }
0x1872   :  { %v1452_v32 = vpop.permute.xlu1 %1451 }
0x1873   :  { %v1454_v34 = vmul.f32 %v1452_v32, %v1435_v16 }
0x1875   :  { %v1455_v33 = vpack.c.bf16 %v1454_v34, %v1454_v34 }
0x1877   :  { %1458 = vrot.lane.b32.xlu0 %v1455_v33, %s3302_s27 }
0x187f   :  { %1666 = vrot.lane.b32.xlu0 %v3169_v42, %s3301_s26 }
0x1889   :  { %v1199_v49 = vpop.permute.xlu1 %1198 }
0x188a   :  { %v1201_v54 = vmul.f32 %v1199_v49, %v1193_v50 }
0x188c   :  { %1203 = vrot.lane.b32.xlu1 %v1201_v54, %s3302_s27 }
0x18e9   :  { %v1459_v48 = vpop.permute.xlu0 %1458 }
0x18ea   :  { %2830 = vmatmul.msk.bf16.vlgmr.msrb.gmra.mxu2 %vm86_vm4, %v1459_v48  ;;  %v3727_v48 = vld [vmem:[%s4037_s1 + $0x8] sm:$0xff] }
0x18eb   :  { %1712 = vmatpush.bf16.msrb.mxu0 %v3727_v48 }
0x18f1   :  { %v1667_v4 = vpop.permute.xlu0 %1666 }
0x18fe   :  { %v1204_v57 = vpop.permute.xlu1 %1203 }
0x18ff   :  { %v1206_v41 = vadd.f32 %v1204_v57, %v1196_v47  ;;  %v3733_v47 = vld [vmem:[%s4037_s1] sm:$0xff] }
0x1900   :  { %1713 = vmatpush.bf16.msrb.mxu0 %v3733_v47 }
0x1901   :  { %3170 = vtanh.f32 %v1206_v41 }
0x1902   :  { %3172 = vpow2.f32 %v2852_v59 }
0x1907   :  { %v3171_v31 = vpop.eup %3170 }
0x1908   :  { %1209 = vrot.lane.b32.xlu1 %v3171_v31, %s3301_s26  ;;  %v3173_v56 = vpop.eup %3172 }
0x1909   :  { %v1647_v60 = vadd.f32 1.0, %v3173_v56 }
0x190b   :  { %3174 = vrcp.f32 %v1647_v60  ;;  %v1659_v0 = vand.u32 2147483648, %v1647_v60  ;;  %vm1653_vm8 = vweird.f32 %v1647_v60  ;;  %v1657_v51 = vand.u32 2147483647, %v1647_v60 }
0x190d   :  { %v1660_v38 = vor.u32 1.1754944e-38, %v1659_v0  ;;  %vm1658_vm11 = vcmp.eq.f32.partialorder %v1657_v51, 8.507059e+37  ;;  %v3299_v0 = vld [vmem:[%s4036_s0 + $0x28] sm:$0xff] }
0x1911   :  { %v3175_v61 = vpop.eup %3174 }
0x1912   :  { %v1649_v63 = vmul.f32 %v3175_v61, %v1647_v60  ;;  %vm1654_vm9 = vweird.f32 %v3175_v61 }
0x1913   :  { %vm1655_vm10 = vmor %vm1653_vm8, %vm1654_vm9 }
0x1914   :  { %v1650_v3 = vsub.f32 1.0, %v1649_v63 }
0x1916   :  { %v1651_v52 = vmul.f32 %v3175_v61, %v1650_v3 }
0x1918   :  { %v1652_v2 = vadd.f32 %v3175_v61, %v1651_v52 }
0x191a   :  { %v1656_v5 = vsel %vm1655_vm10, %v3175_v61, %v1652_v2 }
0x191b   :  { %v1661_v55 = vsel %vm1658_vm11, %v1660_v38, %v1656_v5 }
0x191c   :  { %v1669_v6 = vmul.f32 %v1667_v4, %v1661_v55  ;;  %v1664_v29 = vmul.f32 0.0, %v1661_v55 }
0x191e   :  { %1671 = vrot.lane.b32.xlu0 %v1669_v6, %s3302_s27 }
0x196d   :  { %v1472_v9 = vpop.f32.mrf.mxu2 }
0x196e   :  { %v1476_v10 = vadd.f32 %v1472_v9, %v1276_v8 }
0x1970   :  { %3176 = vtanh.f32 %v1476_v10  ;;  %v2831_v14 = vmul.f32 -1.442695, %v1476_v10 }
0x1972   :  { %3178 = vpow2.f32 %v2831_v14 }
0x1975   :  { %v1474_v62 = vpop.f32.mrf.mxu2 }
0x1976   :  { %v3177_v12 = vpop.eup %3176 }
0x1977   :  { %1499 = vrot.lane.b32.xlu2 %v3177_v12, %s3301_s26 }
0x1978   :  { %v3179_v58 = vpop.eup %3178 }
0x1979   :  { %v1480_v15 = vadd.f32 1.0, %v3179_v58 }
0x197a   :  { %v1210_v13 = vpop.permute.xlu1 %1209 }
0x197b   :  { %v1212_v53 = vmul.f32 %v1210_v13, %v1193_v50  ;;  %3180 = vrcp.f32 %v1480_v15  ;;  %v1492_v22 = vand.u32 2147483648, %v1480_v15  ;;  %vm1486_vm14 = vweird.f32 %v1480_v15 }
0x197c   :  { %v1490_v23 = vand.u32 2147483647, %v1480_v15 }
0x197d   :  { %1214 = vrot.lane.b32.xlu1 %v1212_v53, %s3302_s27  ;;  %v1493_v25 = vor.u32 1.1754944e-38, %v1492_v22 }
0x197e   :  { %vm1491_vm0 = vcmp.eq.f32.partialorder %v1490_v23, 8.507059e+37 }
0x1981   :  { %v3181_v16 = vpop.eup %3180 }
0x1982   :  { %v1482_v17 = vmul.f32 %v3181_v16, %v1480_v15  ;;  %vm1487_vm13 = vweird.f32 %v3181_v16 }
0x1983   :  { %vm1488_vm15 = vmor %vm1486_vm14, %vm1487_vm13 }
0x1984   :  { %v1483_v18 = vsub.f32 1.0, %v1482_v17 }
0x1986   :  { %v1484_v19 = vmul.f32 %v3181_v16, %v1483_v18 }
0x1988   :  { %v1485_v20 = vadd.f32 %v3181_v16, %v1484_v19 }
0x198a   :  { %v1489_v24 = vsel %vm1488_vm15, %v3181_v16, %v1485_v20 }
0x198b   :  { %v1494_v27 = vsel %vm1491_vm0, %v1493_v25, %v1489_v24 }
0x198c   :  { %v1497_v40 = vmul.f32 %v1494_v27, %v3687_v21 }
0x1990   :  { %v1672_v32 = vpop.permute.xlu0 %1671 }
0x1991   :  { %v3707_v30 = vadd.f32 %v1672_v32, %v1664_v29 }
0x1993   :  { %3182 = vtanh.f32 %v3707_v30 }
0x1999   :  { %v3183_v34 = vpop.eup %3182 }
0x199a   :  { %1677 = vrot.lane.b32.xlu0 %v3183_v34, %s3301_s26 }
0x19d1   :  { %v1500_v26 = vpop.permute.xlu2 %1499 }
0x19d2   :  { %v1502_v28 = vmul.f32 %v1500_v26, %v1494_v27 }
0x19d4   :  { %1504 = vrot.lane.b32.xlu2 %v1502_v28, %s3302_s27 }
0x19ef   :  { %v1215_v33 = vpop.permute.xlu1 %1214 }
0x19f0   :  { %1217 = vst.msk [vmem:[#allocation4 + $0x20] sm:$0xff] %vm86_vm4, %v1215_v33 }
0x19f7   :  { %v1226_v35 = vld [vmem:[#allocation4 + $0x20] sm:$0xff] }
0x19f8   :  { %v1229_v37 = vpack.c.bf16 %v1226_v35, %v1226_v35 }
0x19fa   :  { %2816 = vmatmul.msk.bf16.gmra.mxu3 %vm86_vm4, %v1229_v37 }
0x1a0c   :  { %v1678_v44 = vpop.permute.xlu0 %1677 }
0x1a0d   :  { %v3718_v46 = vmul.f32 %v1678_v44, %v1661_v55 }
0x1a0f   :  { %v1681_v36 = vpack.c.bf16 %v3718_v46, %v3718_v46 }
0x1a11   :  { %1689 = vrot.lane.b32.xlu0 %v1681_v36, %s3302_s27 }
0x1a2e   :  { %v1505_v42 = vpop.permute.xlu2 %1504 }
0x1a2f   :  { %v3714_v43 = vadd.f32 %v1505_v42, %v1497_v40 }
0x1a31   :  { %3184 = vtanh.f32 %v3714_v43 }
0x1a37   :  { %v3185_v45 = vpop.eup %3184 }
0x1a38   :  { %1510 = vrot.lane.b32.xlu2 %v3185_v45, %s3301_s26 }
0x1a7d   :  { %v1278_v39 = vpop.f32.mrf.mxu3 }
0x1a7e   :  { %v1279_v31 = vadd.f32 %v3632_v11, %v1278_v39 }
0x1a83   :  { %v1690_v41 = vpop.permute.xlu0 %1689 }
0x1a85   :  { %v1280_v49 = vpop.f32.mrf.mxu3 }
0x1a92   :  { %v1511_v50 = vpop.permute.xlu2 %1510 }
0x1a93   :  { %v1513_v21 = vmul.f32 %v1511_v50, %v1494_v27  ;;  %v2844_v50 = vld [vmem:[%s4041_s5 + $0x10] sm:$0xf] }
0x1a95   :  { %v1514_v54 = vpack.c.bf16 %v1513_v21, %v1513_v21  ;;  %v2983_v21 = vld [vmem:[%s4041_s5 + $0x14] sm:$0xf0] }
0x1a97   :  { %1517 = vrot.lane.b32.xlu2 %v1514_v54, %s3302_s27  ;;  %v2982_v54 = vld [vmem:[%s4041_s5 + $0x14] sm:$0xf] }
0x1af1   :  { %v1518_v57 = vpop.permute.xlu2 %1517 }
0x1af2   :  { %2832 = vmatmul.msk.bf16.vlgmr.msra.gmra.mxu0 %vm86_vm4, %v1518_v57  ;;  %v2845_v57 = vor.u32 %v2983_v21, %v2844_v50 }
0x1af4   :  { %1616 = vmatpush.bf16.msra.mxu1 %v2845_v57 }
0x1b02   :  { %2861 = vmatmul.msk.bf16.vlgmr.msrb.gmra.mxu0 %vm86_vm4, %v1690_v41  ;;  %v2846_v41 = vld [vmem:[%s4041_s5 + $0x18] sm:$0xf0] }
0x1b6f   :  { %v1531_v59 = vpop.f32.mrf.mxu0 }
0x1b70   :  { %v1535_v56 = vadd.f32 %v1531_v59, %v1279_v31  ;;  %v2836_v31 = vld [vmem:[%s4041_s5] sm:$0xf]  ;;  %v2981_v59 = vld [vmem:[%s4041_s5 + $0x4] sm:$0xf0] }
0x1b72   :  { %3186 = vtanh.f32 %v1535_v56  ;;  %v2833_v11 = vmul.f32 -1.442695, %v1535_v56  ;;  %v2849_v56 = vor.u32 %v2982_v54, %v2846_v41 }
0x1b74   :  { %1629 = vmatpush.bf16.msra.mxu2 %v2849_v56 }
0x1b77   :  { %v1533_v60 = vpop.f32.mrf.mxu0 }
0x1b78   :  { %v3187_v61 = vpop.eup %3186  ;;  %v2980_v60 = vld [vmem:[%s4041_s5 + $0x4] sm:$0xf] }
0x1b79   :  { %1558 = vrot.lane.b32.xlu1 %v3187_v61, %s3301_s26  ;;  %v2838_v61 = vld [vmem:[%s4041_s5 + $0x8] sm:$0xf0] }
0x1b7f   :  { %v1715_v63 = vpop.f32.mrf.mxu0 }
0x1b80   :  { %v1719_v3 = vadd.f32 %v3299_v0, %v1715_v63  ;;  %v2837_v63 = vor.u32 %v2981_v59, %v2836_v31  ;;  %v2841_v0 = vor.u32 %v2980_v60, %v2838_v61 }
0x1b82   :  { %3188 = vtanh.f32 %v1719_v3  ;;  %v2862_v38 = vmul.f32 -1.442695, %v1719_v3  ;;  %1617 = vmatpush.bf16.msra.mxu1 %v2837_v63  ;;  %1630 = vmatpush.bf16.msra.mxu2 %v2841_v0  ;;  %v2988_v3 = vld [vmem:[%s4038_s2] sm:$0xff] }
0x1b84   :  { %3190 = vpow2.f32 %v2862_v38 }
0x1b85   :  { %3192 = vpow2.f32 %v2833_v11 }
0x1b86   :  { %1776 = vmatpush.bf16.msrb.mxu1 %v3727_v48  ;;  %1840 = vmatpush.bf16.msrb.mxu2 %v3727_v48  ;;  %v1578_v48 = vld [vmem:[%s4042_s6] sm:$0x3] }
0x1b87   :  { %v1717_v51 = vpop.f32.mrf.mxu0 }
0x1b88   :  { %v3189_v52 = vpop.eup %3188 }
0x1b89   :  { %1742 = vrot.lane.b32.xlu2 %v3189_v52, %s3301_s26 }
0x1b8a   :  { %v3191_v2 = vpop.eup %3190  ;;  %1777 = vmatpush.bf16.msrb.mxu1 %v3733_v47  ;;  %1841 = vmatpush.bf16.msrb.mxu2 %v3733_v47  ;;  %v1580_v47 = vperm.slane %v1578_v48, 0 }
0x1b8b   :  { %v1723_v4 = vadd.f32 1.0, %v3191_v2  ;;  %v3193_v5 = vpop.eup %3192 }
0x1b8c   :  { %v1539_v55 = vadd.f32 1.0, %v3193_v5 }
0x1b8d   :  { %3194 = vrcp.f32 %v1723_v4  ;;  %v1735_v53 = vand.u32 2147483648, %v1723_v4  ;;  %vm1729_vm2 = vweird.f32 %v1723_v4  ;;  %v1733_v14 = vand.u32 2147483647, %v1723_v4 }
0x1b8e   :  { %3196 = vrcp.f32 %v1539_v55  ;;  %v1551_v22 = vand.u32 2147483648, %v1539_v55  ;;  %vm1545_vm7 = vweird.f32 %v1539_v55  ;;  %v1549_v23 = vand.u32 2147483647, %v1539_v55 }
0x1b8f   :  { %v1736_v16 = vor.u32 1.1754944e-38, %v1735_v53  ;;  %vm1734_vm5 = vcmp.eq.f32.partialorder %v1733_v14, 8.507059e+37  ;;  %v3816_v14 = vld [vmem:[%s4039_s4] ss:$0 sm:$0xff] }
0x1b90   :  { %v1552_v25 = vor.u32 1.1754944e-38, %v1551_v22  ;;  %vm1550_vm9 = vcmp.eq.f32.partialorder %v1549_v23, 8.507059e+37 }
0x1b93   :  { %v3195_v6 = vpop.eup %3194 }
0x1b94   :  { %v1725_v7 = vmul.f32 %v3195_v6, %v1723_v4  ;;  %v3197_v9 = vpop.eup %3196  ;;  %vm1730_vm1 = vweird.f32 %v3195_v6 }
0x1b95   :  { %v1541_v62 = vmul.f32 %v3197_v9, %v1539_v55  ;;  %vm1731_vm3 = vmor %vm1729_vm2, %vm1730_vm1  ;;  %vm1546_vm6 = vweird.f32 %v3197_v9 }
0x1b96   :  { %v1726_v8 = vsub.f32 1.0, %v1725_v7  ;;  %vm1547_vm8 = vmor %vm1545_vm7, %vm1546_vm6 }
0x1b97   :  { %v1542_v13 = vsub.f32 1.0, %v1541_v62 }
0x1b98   :  { %v1727_v10 = vmul.f32 %v3195_v6, %v1726_v8 }
0x1b99   :  { %v1543_v15 = vmul.f32 %v3197_v9, %v1542_v13 }
0x1b9a   :  { %v1728_v12 = vadd.f32 %v3195_v6, %v1727_v10 }
0x1b9b   :  { %v1544_v20 = vadd.f32 %v3197_v9, %v1543_v15 }
0x1b9c   :  { %v1732_v58 = vsel %vm1731_vm3, %v3195_v6, %v1728_v12  ;;  %v1581_v6 = vperm.slane %v1578_v48, 1 }
0x1b9d   :  { %v1737_v18 = vsel %vm1734_vm5, %v1736_v16, %v1732_v58  ;;  %v1548_v24 = vsel %vm1547_vm8, %v3197_v9, %v1544_v20 }
0x1b9e   :  { %v1553_v27 = vsel %vm1550_vm9, %v1552_v25, %v1548_v24  ;;  %v1740_v29 = vmul.f32 %v1737_v18, %v3707_v30  ;;  %v2989_v30 = vld [vmem:[%s4038_s2 + $0x8] sm:$0xff] }
0x1b9f   :  { %v1556_v33 = vmul.f32 %v1553_v27, %v3714_v43  ;;  %1932 = vmatpush.bf16.msrb.mxu3 %v2989_v30 }
0x1ba3   :  { %1933 = vmatpush.bf16.msrb.mxu3 %v2988_v3 }
0x1be3   :  { %v1743_v17 = vpop.permute.xlu2 %1742 }
0x1be4   :  { %v1745_v19 = vmul.f32 %v1743_v17, %v1737_v18 }
0x1be6   :  { %1747 = vrot.lane.b32.xlu1 %v1745_v19, %s3302_s27 }
0x1beb   :  { %v1559_v26 = vpop.permute.xlu1 %1558 }
0x1bec   :  { %v1561_v28 = vmul.f32 %v1559_v26, %v1553_v27 }
0x1bee   :  { %1563 = vrot.lane.b32.xlu0 %v1561_v28, %s3302_s27 }
0x1c58   :  { %v1748_v32 = vpop.permute.xlu1 %1747 }
0x1c59   :  { %v3747_v34 = vadd.f32 %v1748_v32, %v1740_v29 }
0x1c5b   :  { %3198 = vtanh.f32 %v3747_v34 }
0x1c60   :  { %v1564_v35 = vpop.permute.xlu0 %1563 }
0x1c61   :  { %v3199_v37 = vpop.eup %3198  ;;  %v1566_v40 = vadd.f32 %v1564_v35, %v1556_v33 }
0x1c62   :  { %1753 = vrot.lane.b32.xlu0 %v3199_v37, %s3301_s26 }
0x1c63   :  { %3200 = vtanh.f32 %v1566_v40 }
0x1c69   :  { %v3201_v42 = vpop.eup %3200 }
0x1c6a   :  { %1683 = vrot.lane.b32.xlu0 %v3718_v46, %s3302_s27  ;;  %1569 = vrot.lane.b32.xlu2 %v3201_v42, %s3301_s26 }
0x1cc4   :  { %v1570_v45 = vpop.permute.xlu2 %1569 }
0x1cc5   :  { %v1572_v44 = vmul.f32 %v1570_v45, %v1553_v27 }
0x1cc7   :  { %v1573_v43 = vpack.c.bf16 %v1572_v44, %v1572_v44 }
0x1cc9   :  { %1585 = vrot.lane.b32.xlu1 %v1573_v43, %s3302_s27 }
0x1cd4   :  { %v1754_v36 = vpop.permute.xlu0 %1753 }
0x1cd5   :  { %v1756_v39 = vmul.f32 %v1754_v36, %v1737_v18 }
0x1cd7   :  { %v1757_v49 = vpack.c.bf16 %v1756_v39, %v1756_v39  ;;  %1759 = vrot.lane.b32.xlu1 %v1756_v39, %s3302_s27 }
0x1cd9   :  { %1765 = vrot.lane.b32.xlu2 %v1757_v49, %s3302_s27 }
0x1cdc   :  { %v1684_v46 = vpop.permute.xlu0 %1683 }
0x1cdd   :  { %1686 = vst.msk [vmem:[#allocation4] sm:$0xff] %vm86_vm4, %v1684_v46 }
0x1ce4   :  { %v1894_v11 = vld [vmem:[#allocation4] sm:$0xff] }
0x1d33   :  { %v1766_v38 = vpop.permute.xlu2 %1765 }
0x1d3b   :  { %v1586_v51 = vpop.permute.xlu1 %1585 }
0x1d3c   :  { %2850 = vmatmul.msk.bf16.vlgmr.msra.gmra.mxu1 %vm86_vm4, %v1586_v51  ;;  %2851 = vmatmul.msk.bf16.vlgmr.msra.gmra.mxu2 %vm86_vm4, %v1586_v51 }
0x1d49   :  { %v1760_v52 = vpop.permute.xlu1 %1759 }
0x1d4a   :  { %1762 = vst.msk [vmem:[#allocation4 + $0x8] sm:$0xff] %vm86_vm4, %v1760_v52 }
0x1d4c   :  { %2863 = vmatmul.msk.bf16.vlgmr.msrb.gmra.mxu1 %vm86_vm4, %v1766_v38 }
0x1d51   :  { %v1895_v2 = vld [vmem:[#allocation4 + $0x8] sm:$0xff] }
0x1d52   :  { %v1898_v4 = vpack.c.bf16 %v1895_v2, %v1894_v11  ;;  %v2987_v11 = vld [vmem:[%s4040_s3 + $0x8] sm:$0xff]  ;;  %v2986_v2 = vld [vmem:[%s4040_s3] sm:$0xff] }
0x1d53   :  { %2013 = vmatpush.bf16.msra.mxu0 %v2987_v11  ;;  %2072 = vmatpush.bf16.msra.mxu1 %v2987_v11 }
0x1d54   :  { %2875 = vmatmul.msk.bf16.vlgmr.msrb.gmra.mxu3 %vm86_vm4, %v1898_v4  ;;  %2131 = vmatpush.bf16.msra.mxu2 %v2987_v11 }
0x1d57   :  { %2014 = vmatpush.bf16.msra.mxu0 %v2986_v2  ;;  %2073 = vmatpush.bf16.msra.mxu1 %v2986_v2 }
0x1d58   :  { %2132 = vmatpush.bf16.msra.mxu2 %v2986_v2 }
0x1db9   :  { %v1619_v5 = vpop.f32.mrf.mxu1 }
0x1dba   :  { %v3801_v55 = vadd.f32 %v1619_v5, %v1580_v47 }
0x1dbc   :  { %1636 = vst [vmem:[%s4043_s7 + $0x10] sm:$0xff] %v3801_v55 }
0x1dbf   :  { %v1632_v7 = vpop.f32.mrf.mxu2 }
0x1dc0   :  { %v1633_v8 = vadd.f32 %v1632_v7, %v1581_v6 }
0x1dc1   :  { %v1621_v9 = vpop.f32.mrf.mxu1 }
0x1dc2   :  { %1637 = vst.msk [vmem:[%s4043_s7 + $0x18] sm:$0xff] %vm900_vm12, %v1633_v8 }
0x1dc7   :  { %v1634_v10 = vpop.f32.mrf.mxu2 }
0x1dc9   :  { %v1779_v62 = vpop.f32.mrf.mxu1 }
0x1dca   :  { %v1783_v12 = vadd.f32 %v1779_v62, %v3617_v1 }
0x1dcc   :  { %3202 = vtanh.f32 %v1783_v12  ;;  %v2864_v17 = vmul.f32 -1.442695, %v1783_v12 }
0x1dd1   :  { %v1781_v13 = vpop.f32.mrf.mxu1 }
0x1dd2   :  { %v3203_v53 = vpop.eup %3202 }
0x1dd3   :  { %1806 = vrot.lane.b32.xlu2 %v3203_v53, %s3301_s26 }
0x1dd7   :  { %v1935_v58 = vpop.f32.mrf.mxu3 }
0x1dd8   :  { %v1936_v15 = vadd.f32 %v3816_v14, %v1935_v58 }
0x1dda   :  { %3204 = vtanh.f32 %v1936_v15  ;;  %v2877_v24 = vmul.f32 -1.442695, %v1936_v15 }
0x1ddb   :  { %3206 = vpow2.f32 %v2864_v17 }
0x1ddf   :  { %v1937_v8 = vpop.f32.mrf.mxu3 }
0x1de0   :  { %v3205_v16 = vpop.eup %3204  ;;  %v1938_v9 = vadd.f32 %v3816_v14, %v1937_v8 }
0x1de1   :  { %1972 = vrot.lane.b32.xlu0 %v3205_v16, %s3301_s26  ;;  %v3207_v1 = vpop.eup %3206 }
0x1de2   :  { %v1787_v18 = vadd.f32 1.0, %v3207_v1 }
0x1de4   :  { %3208 = vrcp.f32 %v1787_v18  ;;  %v1799_v26 = vand.u32 2147483648, %v1787_v18  ;;  %vm1793_vm11 = vweird.f32 %v1787_v18  ;;  %v1797_v27 = vand.u32 2147483647, %v1787_v18 }
0x1de5   :  { %3210 = vpow2.f32 %v2877_v24 }
0x1de6   :  { %v1800_v29 = vor.u32 1.1754944e-38, %v1799_v26  ;;  %vm1798_vm14 = vcmp.eq.f32.partialorder %v1797_v27, 8.507059e+37 }
0x1dea   :  { %v3209_v19 = vpop.eup %3208 }
0x1deb   :  { %v1789_v20 = vmul.f32 %v3209_v19, %v1787_v18  ;;  %vm1794_vm10 = vweird.f32 %v3209_v19  ;;  %v3211_v37 = vpop.eup %3210 }
0x1dec   :  { %vm1795_vm13 = vmor %vm1793_vm11, %vm1794_vm10  ;;  %v1953_v40 = vadd.f32 1.0, %v3211_v37 }
0x1ded   :  { %v1790_v22 = vsub.f32 1.0, %v1789_v20 }
0x1dee   :  { %3212 = vrcp.f32 %v1953_v40  ;;  %v1965_v36 = vand.u32 2147483648, %v1953_v40  ;;  %vm1959_vm0 = vweird.f32 %v1953_v40  ;;  %v1963_v39 = vand.u32 2147483647, %v1953_v40 }
0x1def   :  { %v1791_v23 = vmul.f32 %v3209_v19, %v1790_v22 }
0x1df0   :  { %v1966_v46 = vor.u32 1.1754944e-38, %v1965_v36  ;;  %vm1964_vm2 = vcmp.eq.f32.partialorder %v1963_v39, 8.507059e+37 }
0x1df1   :  { %v1792_v25 = vadd.f32 %v3209_v19, %v1791_v23 }
0x1df3   :  { %v1796_v28 = vsel %vm1795_vm13, %v3209_v19, %v1792_v25 }
0x1df4   :  { %v1801_v33 = vsel %vm1798_vm14, %v1800_v29, %v1796_v28  ;;  %v3213_v42 = vpop.eup %3212 }
0x1df5   :  { %v1955_v30 = vmul.f32 %v3213_v42, %v1953_v40  ;;  %vm1960_vm15 = vweird.f32 %v3213_v42  ;;  %v1804_v57 = vmul.f32 %v1801_v33, %v3747_v34 }
0x1df6   :  { %vm1961_vm1 = vmor %vm1959_vm0, %vm1960_vm15 }
0x1df7   :  { %v1956_v45 = vsub.f32 1.0, %v1955_v30 }
0x1df9   :  { %v1957_v44 = vmul.f32 %v3213_v42, %v1956_v45 }
0x1dfb   :  { %v1958_v43 = vadd.f32 %v3213_v42, %v1957_v44 }
0x1dfd   :  { %v1962_v49 = vsel %vm1961_vm1, %v3213_v42, %v1958_v43 }
0x1dfe   :  { %v1967_v21 = vsel %vm1964_vm2, %v1966_v46, %v1962_v49 }
0x1dff   :  { %v1970_v56 = vmul.f32 0.0, %v1967_v21 }
0x1e2d   :  { %v1807_v32 = vpop.permute.xlu2 %1806 }
0x1e2e   :  { %v1809_v35 = vmul.f32 %v1807_v32, %v1801_v33 }
0x1e30   :  { %1811 = vrot.lane.b32.xlu1 %v1809_v35, %s3302_s27 }
0x1e53   :  { %v1973_v50 = vpop.permute.xlu0 %1972 }
0x1e54   :  { %v1975_v54 = vmul.f32 %v1973_v50, %v1967_v21 }
0x1e56   :  { %1977 = vrot.lane.b32.xlu2 %v1975_v54, %s3302_s27 }
0x1ea2   :  { %v1812_v41 = vpop.permute.xlu1 %1811 }
0x1ea3   :  { %v3823_v31 = vadd.f32 %v1812_v41, %v1804_v57 }
0x1ea5   :  { %3214 = vtanh.f32 %v3823_v31 }
0x1eab   :  { %v3215_v59 = vpop.eup %3214 }
0x1eac   :  { %1817 = vrot.lane.b32.xlu0 %v3215_v59, %s3301_s26 }
0x1eb0   :  { %v1978_v60 = vpop.permute.xlu2 %1977 }
0x1eb1   :  { %v3827_v61 = vadd.f32 %v1978_v60, %v1970_v56 }
0x1eb3   :  { %3216 = vtanh.f32 %v3827_v61 }
0x1eb9   :  { %v3217_v63 = vpop.eup %3216 }
0x1eba   :  { %1983 = vrot.lane.b32.xlu1 %v3217_v63, %s3301_s26 }
0x1f1e   :  { %v1818_v0 = vpop.permute.xlu0 %1817 }
0x1f1f   :  { %v3831_v3 = vmul.f32 %v1818_v0, %v1801_v33 }
0x1f21   :  { %v1821_v34 = vpack.c.bf16 %v3831_v3, %v3831_v3 }
0x1f23   :  { %1829 = vrot.lane.b32.xlu2 %v1821_v34, %s3302_s27 }
0x1f2c   :  { %v1984_v51 = vpop.permute.xlu1 %1983 }
0x1f2d   :  { %v1986_v52 = vmul.f32 %v1984_v51, %v1967_v21 }
0x1f2f   :  { %v1987_v38 = vpack.c.bf16 %v1986_v52, %v1986_v52 }
0x1f31   :  { %1990 = vrot.lane.b32.xlu0 %v1987_v38, %s3302_s27 }
0x1f7d   :  { %v1830_v4 = vpop.permute.xlu2 %1829 }
0x1f7e   :  { %2865 = vmatmul.msk.bf16.vlgmr.msrb.gmra.mxu2 %vm86_vm4, %v1830_v4 }
0x1fa3   :  { %v1991_v48 = vpop.permute.xlu0 %1990 }
0x1fa4   :  { %2886 = vmatmul.msk.bf16.vlgmr.msra.gmra.mxu0 %vm86_vm4, %v1991_v48 }
0x2001   :  { %v1843_v47 = vpop.f32.mrf.mxu2 }
0x2002   :  { %v1847_v5 = vadd.f32 %v1843_v47, %v3801_v55 }
0x2004   :  { %3218 = vtanh.f32 %v1847_v5  ;;  %v2866_v53 = vmul.f32 -1.442695, %v1847_v5 }
0x2009   :  { %v1845_v6 = vpop.f32.mrf.mxu2 }
0x200a   :  { %v3219_v7 = vpop.eup %3218 }
0x200b   :  { %1870 = vrot.lane.b32.xlu1 %v3219_v7, %s3301_s26 }
0x2021   :  { %v2016_v10 = vpop.f32.mrf.mxu0 }
0x2022   :  { %v2020_v62 = vadd.f32 %v2016_v10, %v1938_v9 }
0x2024   :  { %3220 = vtanh.f32 %v2020_v62  ;;  %v2887_v58 = vmul.f32 -1.442695, %v2020_v62 }
0x2025   :  { %3222 = vpow2.f32 %v2866_v53 }
0x2026   :  { %3224 = vpow2.f32 %v2887_v58 }
0x2029   :  { %v2018_v12 = vpop.f32.mrf.mxu0 }
0x202a   :  { %v3221_v13 = vpop.eup %3220 }
0x202b   :  { %2043 = vrot.lane.b32.xlu2 %v3221_v13, %s3301_s26  ;;  %v3223_v15 = vpop.eup %3222 }
0x202c   :  { %v1851_v16 = vadd.f32 1.0, %v3223_v15  ;;  %v3225_v17 = vpop.eup %3224 }
0x202d   :  { %v2024_v1 = vadd.f32 1.0, %v3225_v17 }
0x202e   :  { %3226 = vrcp.f32 %v1851_v16  ;;  %v1863_v27 = vand.u32 2147483648, %v1851_v16  ;;  %vm1857_vm5 = vweird.f32 %v1851_v16  ;;  %v1861_v28 = vand.u32 2147483647, %v1851_v16 }
0x202f   :  { %3228 = vrcp.f32 %v2024_v1  ;;  %v2036_v30 = vand.u32 2147483648, %v2024_v1  ;;  %vm2030_vm9 = vweird.f32 %v2024_v1  ;;  %v2034_v45 = vand.u32 2147483647, %v2024_v1 }
0x2030   :  { %v1864_v33 = vor.u32 1.1754944e-38, %v1863_v27  ;;  %vm1862_vm7 = vcmp.eq.f32.partialorder %v1861_v28, 8.507059e+37 }
0x2031   :  { %v2037_v43 = vor.u32 1.1754944e-38, %v2036_v30  ;;  %vm2035_vm11 = vcmp.eq.f32.partialorder %v2034_v45, 8.507059e+37 }
0x2034   :  { %v3227_v18 = vpop.eup %3226 }
0x2035   :  { %v1853_v19 = vmul.f32 %v3227_v18, %v1851_v16  ;;  %v3229_v22 = vpop.eup %3228  ;;  %vm1858_vm3 = vweird.f32 %v3227_v18 }
0x2036   :  { %v2026_v24 = vmul.f32 %v3229_v22, %v2024_v1  ;;  %vm1859_vm6 = vmor %vm1857_vm5, %vm1858_vm3  ;;  %vm2031_vm8 = vweird.f32 %v3229_v22 }
0x2037   :  { %v1854_v20 = vsub.f32 1.0, %v1853_v19  ;;  %vm2032_vm10 = vmor %vm2030_vm9, %vm2031_vm8 }
0x2038   :  { %v2027_v26 = vsub.f32 1.0, %v2026_v24 }
0x2039   :  { %v1855_v23 = vmul.f32 %v3227_v18, %v1854_v20 }
0x203a   :  { %v2028_v32 = vmul.f32 %v3229_v22, %v2027_v26 }
0x203b   :  { %v1856_v25 = vadd.f32 %v3227_v18, %v1855_v23 }
0x203c   :  { %v2029_v42 = vadd.f32 %v3229_v22, %v2028_v32 }
0x203d   :  { %v1860_v29 = vsel %vm1859_vm6, %v3227_v18, %v1856_v25 }
0x203e   :  { %v1865_v37 = vsel %vm1862_vm7, %v1864_v33, %v1860_v29  ;;  %v2033_v44 = vsel %vm2032_vm10, %v3229_v22, %v2029_v42 }
0x203f   :  { %v2038_v39 = vsel %vm2035_vm11, %v2037_v43, %v2033_v44  ;;  %v1868_v46 = vmul.f32 %v1865_v37, %v3823_v31 }
0x2040   :  { %v2041_v54 = vmul.f32 %v2038_v39, %v3827_v61  ;;  %v3300_v61 = vld [vmem:[%s4043_s7] sm:$0xff] }
0x2041   :  { %v2910_v48 = vmul.f32 -1.442695, %v3300_v61 }
0x207d   :  { %v1871_v35 = vpop.permute.xlu1 %1870 }
0x207e   :  { %v1873_v40 = vmul.f32 %v1871_v35, %v1865_v37 }
0x2080   :  { %1875 = vrot.lane.b32.xlu0 %v1873_v40, %s3302_s27 }
0x2085   :  { %v2044_v36 = vpop.permute.xlu2 %2043 }
0x2086   :  { %v2046_v49 = vmul.f32 %v2044_v36, %v2038_v39 }
0x2088   :  { %2048 = vrot.lane.b32.xlu1 %v2046_v49, %s3302_s27 }
0x2090   :  { %1823 = vrot.lane.b32.xlu1 %v3831_v3, %s3302_s27 }
0x20f2   :  { %v1876_v50 = vpop.permute.xlu0 %1875 }
0x20f3   :  { %v1878_v21 = vadd.f32 %v1876_v50, %v1868_v46 }
0x20f5   :  { %3230 = vtanh.f32 %v1878_v21 }
0x20fa   :  { %v2049_v57 = vpop.permute.xlu1 %2048 }
0x20fb   :  { %v3231_v41 = vpop.eup %3230  ;;  %v3855_v59 = vadd.f32 %v2049_v57, %v2041_v54 }
0x20fc   :  { %1881 = vrot.lane.b32.xlu2 %v3231_v41, %s3301_s26 }
0x20fd   :  { %3232 = vtanh.f32 %v3855_v59 }
0x20fe   :  { %3234 = vtanh.f32 %v3300_v61 }
0x20ff   :  { %3236 = vpow2.f32 %v2910_v48 }
0x2102   :  { %v1824_v56 = vpop.permute.xlu1 %1823 }
0x2103   :  { %v3233_v60 = vpop.eup %3232  ;;  %1826 = vst.msk [vmem:[#allocation4 + $0x10] sm:$0xff] %vm86_vm4, %v1824_v56 }
0x2104   :  { %2054 = vrot.lane.b32.xlu0 %v3233_v60, %s3301_s26  ;;  %v3235_v0 = vpop.eup %3234 }
0x2105   :  { %v3237_v47 = vpop.eup %3236 }
0x2106   :  { %v2250_v5 = vadd.f32 1.0, %v3237_v47 }
0x2108   :  { %3238 = vrcp.f32 %v2250_v5  ;;  %v2262_v16 = vand.u32 2147483648, %v2250_v5  ;;  %vm2256_vm14 = vweird.f32 %v2250_v5  ;;  %v2260_v17 = vand.u32 2147483647, %v2250_v5 }
0x210a   :  { %v1896_v38 = vld [vmem:[#allocation4 + $0x10] sm:$0xff]  ;;  %v2263_v18 = vor.u32 1.1754944e-38, %v2262_v16  ;;  %vm2261_vm0 = vcmp.eq.f32.partialorder %v2260_v17, 8.507059e+37 }
0x210e   :  { %v3239_v6 = vpop.eup %3238 }
0x210f   :  { %v2252_v7 = vmul.f32 %v3239_v6, %v2250_v5  ;;  %vm2257_vm13 = vweird.f32 %v3239_v6 }
0x2110   :  { %vm2258_vm15 = vmor %vm2256_vm14, %vm2257_vm13 }
0x2111   :  { %v2253_v10 = vsub.f32 1.0, %v2252_v7 }
0x2113   :  { %v2254_v13 = vmul.f32 %v3239_v6, %v2253_v10 }
0x2115   :  { %v2255_v53 = vadd.f32 %v3239_v6, %v2254_v13 }
0x2117   :  { %v2259_v1 = vsel %vm2258_vm15, %v3239_v6, %v2255_v53 }
0x2118   :  { %v2264_v20 = vsel %vm2261_vm0, %v2263_v18, %v2259_v1 }
0x2119   :  { %v2267_v44 = vmul.f32 0.0, %v2264_v20 }
0x2156   :  { %v1882_v31 = vpop.permute.xlu2 %1881 }
0x2157   :  { %v1884_v63 = vmul.f32 %v1882_v31, %v1865_v37 }
0x2159   :  { %1886 = vrot.lane.b32.xlu2 %v1884_v63, %s3302_s27  ;;  %v2994_v63 = vld [vmem:[%s4037_s1] sm:$0xff] }
0x2161   :  { %2269 = vrot.lane.b32.xlu2 %v3235_v0, %s3301_s26 }
0x2176   :  { %v2055_v3 = vpop.permute.xlu0 %2054 }
0x2177   :  { %v2057_v34 = vmul.f32 %v2055_v3, %v2038_v39 }
0x2179   :  { %v2058_v51 = vpack.c.bf16 %v2057_v34, %v2057_v34 }
0x217b   :  { %2061 = vrot.lane.b32.xlu0 %v2058_v51, %s3302_s27 }
0x21b3   :  { %v1887_v52 = vpop.permute.xlu2 %1886 }
0x21b4   :  { %1889 = vst.msk [vmem:[#allocation4 + $0x18] sm:$0xff] %vm86_vm4, %v1887_v52 }
0x21bb   :  { %v1897_v11 = vld [vmem:[#allocation4 + $0x18] sm:$0xff]  ;;  %v2270_v19 = vpop.permute.xlu2 %2269 }
0x21bc   :  { %v1899_v2 = vpack.c.bf16 %v1897_v11, %v1896_v38  ;;  %v2272_v22 = vmul.f32 %v2270_v19, %v2264_v20 }
0x21be   :  { %2876 = vmatmul.msk.bf16.gmra.mxu3 %vm86_vm4, %v1899_v2 }
0x21ed   :  { %v2062_v4 = vpop.permute.xlu0 %2061 }
0x21ee   :  { %2888 = vmatmul.msk.bf16.vlgmr.msra.gmra.mxu1 %vm86_vm4, %v2062_v4 }
0x2241   :  { %v1940_v8 = vpop.f32.mrf.mxu3 }
0x2242   :  { %v1941_v9 = vadd.f32 %v3816_v14, %v1940_v8 }
0x2249   :  { %v1942_v3 = vpop.f32.mrf.mxu3 }
0x224a   :  { %v1943_v34 = vadd.f32 %v3816_v14, %v1942_v3 }
0x226b   :  { %v2075_v62 = vpop.f32.mrf.mxu1 }
0x226c   :  { %v2079_v12 = vadd.f32 %v2075_v62, %v1941_v9 }
0x226e   :  { %3240 = vtanh.f32 %v2079_v12  ;;  %v2889_v23 = vmul.f32 -1.442695, %v2079_v12 }
0x2270   :  { %3242 = vpow2.f32 %v2889_v23 }
0x2273   :  { %v2077_v58 = vpop.f32.mrf.mxu1 }
0x2274   :  { %v3241_v15 = vpop.eup %3240 }
0x2275   :  { %2102 = vrot.lane.b32.xlu1 %v3241_v15, %s3301_s26 }
0x2276   :  { %v3243_v24 = vpop.eup %3242 }
0x2277   :  { %v2083_v25 = vadd.f32 1.0, %v3243_v24 }
0x2279   :  { %3244 = vrcp.f32 %v2083_v25  ;;  %v2095_v33 = vand.u32 2147483648, %v2083_v25  ;;  %vm2089_vm2 = vweird.f32 %v2083_v25  ;;  %v2093_v35 = vand.u32 2147483647, %v2083_v25 }
0x227b   :  { %v2096_v40 = vor.u32 1.1754944e-38, %v2095_v33  ;;  %vm2094_vm5 = vcmp.eq.f32.partialorder %v2093_v35, 8.507059e+37 }
0x227d   :  { %2274 = vrot.lane.b32.xlu1 %v2272_v22, %s3302_s27 }
0x227f   :  { %v3245_v26 = vpop.eup %3244 }
0x2280   :  { %v2085_v27 = vmul.f32 %v3245_v26, %v2083_v25  ;;  %vm2090_vm1 = vweird.f32 %v3245_v26 }
0x2281   :  { %vm2091_vm3 = vmor %vm2089_vm2, %vm2090_vm1 }
0x2282   :  { %v2086_v28 = vsub.f32 1.0, %v2085_v27 }
0x2284   :  { %v2087_v29 = vmul.f32 %v3245_v26, %v2086_v28 }
0x2286   :  { %v2088_v32 = vadd.f32 %v3245_v26, %v2087_v29 }
0x2288   :  { %v2092_v37 = vsel %vm2091_vm3, %v3245_v26, %v2088_v32 }
0x2289   :  { %v2097_v30 = vsel %vm2094_vm5, %v2096_v40, %v2092_v37 }
0x228a   :  { %v2100_v49 = vmul.f32 %v2097_v30, %v3855_v59  ;;  %v2995_v59 = vld [vmem:[%s4037_s1 + $0x8] sm:$0xff] }
0x228b   :  { %2315 = vmatpush.bf16.msrb.mxu2 %v2995_v59  ;;  %2379 = vmatpush.bf16.msra.mxu3 %v2995_v59 }
0x228f   :  { %2316 = vmatpush.bf16.msrb.mxu2 %v2994_v63  ;;  %2380 = vmatpush.bf16.msra.mxu3 %v2994_v63  ;;  %v2904_v63 = vld [vmem:[%s4041_s5 + $0x18] sm:$0xf0] }
0x22e7   :  { %v2103_v42 = vpop.permute.xlu1 %2102 }
0x22e8   :  { %v2105_v45 = vmul.f32 %v2103_v42, %v2097_v30 }
0x22ea   :  { %2107 = vrot.lane.b32.xlu0 %v2105_v45, %s3302_s27 }
0x22ef   :  { %v2275_v43 = vpop.permute.xlu1 %2274 }
0x22f0   :  { %v3874_v36 = vadd.f32 %v2275_v43, %v2267_v44 }
0x22f2   :  { %3246 = vtanh.f32 %v3874_v36 }
0x22f8   :  { %v3247_v39 = vpop.eup %3246 }
0x22f9   :  { %2280 = vrot.lane.b32.xlu0 %v3247_v39, %s3301_s26  ;;  %v2902_v39 = vld [vmem:[%s4041_s5 + $0x10] sm:$0xf] }
0x235c   :  { %v2108_v46 = vpop.permute.xlu0 %2107 }
0x235d   :  { %v3879_v50 = vadd.f32 %v2108_v46, %v2100_v49  ;;  %v2993_v49 = vld [vmem:[%s4041_s5 + $0x14] sm:$0xf0] }
0x235e   :  { %v2903_v46 = vor.u32 %v2993_v49, %v2902_v39 }
0x235f   :  { %3248 = vtanh.f32 %v3879_v50 }
0x2360   :  { %2219 = vmatpush.bf16.msrb.mxu0 %v2903_v46 }
0x2365   :  { %v3249_v21 = vpop.eup %3248 }
0x2366   :  { %2113 = vrot.lane.b32.xlu2 %v3249_v21, %s3301_s26 }
0x236b   :  { %v2281_v54 = vpop.permute.xlu0 %2280 }
0x236c   :  { %v3883_v57 = vmul.f32 %v2281_v54, %v2264_v20 }
0x236e   :  { %v2284_v41 = vpack.c.bf16 %v3883_v57, %v3883_v57 }
0x2370   :  { %2292 = vrot.lane.b32.xlu2 %v2284_v41, %s3302_s27 }
0x23c0   :  { %v2114_v56 = vpop.permute.xlu2 %2113 }
0x23c1   :  { %v2116_v60 = vmul.f32 %v2114_v56, %v2097_v30  ;;  %v2894_v56 = vld [vmem:[%s4041_s5] sm:$0xf] }
0x23c3   :  { %v2117_v31 = vpack.c.bf16 %v2116_v60, %v2116_v60  ;;  %v2991_v60 = vld [vmem:[%s4041_s5 + $0x4] sm:$0xf0] }
0x23c4   :  { %v2895_v59 = vor.u32 %v2991_v60, %v2894_v56 }
0x23c5   :  { %2120 = vrot.lane.b32.xlu1 %v2117_v31, %s3302_s27  ;;  %v2992_v31 = vld [vmem:[%s4041_s5 + $0x14] sm:$0xf] }
0x23c6   :  { %v2907_v3 = vor.u32 %v2992_v31, %v2904_v63  ;;  %2220 = vmatpush.bf16.msrb.mxu0 %v2895_v59 }
0x23c8   :  { %2232 = vmatpush.bf16.msrb.mxu1 %v2907_v3 }
0x23ca   :  { %v2293_v0 = vpop.permute.xlu2 %2292 }
0x2437   :  { %v2121_v61 = vpop.permute.xlu1 %2120 }
0x2438   :  { %2890 = vmatmul.msk.bf16.vlgmr.msra.gmra.mxu2 %vm86_vm4, %v2121_v61  ;;  %v2990_v61 = vld [vmem:[%s4041_s5 + $0x4] sm:$0xf] }
0x2448   :  { %2919 = vmatmul.msk.bf16.vlgmr.msrb.gmra.mxu2 %vm86_vm4, %v2293_v0  ;;  %v2896_v0 = vld [vmem:[%s4041_s5 + $0x8] sm:$0xf0] }
0x24bb   :  { %v2134_v51 = vpop.f32.mrf.mxu2 }
0x24bc   :  { %v2138_v52 = vadd.f32 %v2134_v51, %v1943_v34  ;;  %v2899_v34 = vor.u32 %v2990_v61, %v2896_v0  ;;  %v2999_v51 = vld [vmem:[%s4038_s2 + $0x8] sm:$0xff] }
0x24bd   :  { %2470 = vmatpush.bf16.msra.mxu0 %v2999_v51 }
0x24be   :  { %3250 = vtanh.f32 %v2138_v52  ;;  %v2891_v5 = vmul.f32 -1.442695, %v2138_v52  ;;  %2233 = vmatpush.bf16.msrb.mxu1 %v2899_v34  ;;  %v2998_v52 = vld [vmem:[%s4038_s2] sm:$0xff] }
0x24c1   :  { %2471 = vmatpush.bf16.msra.mxu0 %v2998_v52 }
0x24c3   :  { %v2136_v38 = vpop.f32.mrf.mxu2 }
0x24c4   :  { %v3251_v11 = vpop.eup %3250 }
0x24c5   :  { %2161 = vrot.lane.b32.xlu0 %v3251_v11, %s3301_s26 }
0x24cb   :  { %v2318_v2 = vpop.f32.mrf.mxu2 }
0x24cc   :  { %v2322_v4 = vadd.f32 %v2318_v2, %v3801_v55 }
0x24ce   :  { %3252 = vtanh.f32 %v2322_v4  ;;  %v2920_v14 = vmul.f32 -1.442695, %v2322_v4 }
0x24cf   :  { %3254 = vpow2.f32 %v2891_v5 }
0x24d3   :  { %v2320_v48 = vpop.f32.mrf.mxu2 }
0x24d4   :  { %v3253_v47 = vpop.eup %3252 }
0x24d5   :  { %2345 = vrot.lane.b32.xlu1 %v3253_v47, %s3301_s26  ;;  %v3255_v6 = vpop.eup %3254  ;;  %v2181_v47 = vld [vmem:[%s4042_s6] sm:$0x3] }
0x24d6   :  { %v2142_v7 = vadd.f32 1.0, %v3255_v6  ;;  %v2183_v5 = vperm.slane %v2181_v47, 0  ;;  %v2184_v6 = vperm.slane %v2181_v47, 1 }
0x24d8   :  { %3256 = vrcp.f32 %v2142_v7  ;;  %v2154_v58 = vand.u32 2147483648, %v2142_v7  ;;  %vm2148_vm7 = vweird.f32 %v2142_v7  ;;  %v2152_v15 = vand.u32 2147483647, %v2142_v7 }
0x24d9   :  { %3258 = vpow2.f32 %v2920_v14 }
0x24da   :  { %v2155_v1 = vor.u32 1.1754944e-38, %v2154_v58  ;;  %vm2153_vm9 = vcmp.eq.f32.partialorder %v2152_v15, 8.507059e+37 }
0x24de   :  { %v3257_v8 = vpop.eup %3256 }
0x24df   :  { %v3259_v9 = vpop.eup %3258  ;;  %v2144_v10 = vmul.f32 %v3257_v8, %v2142_v7  ;;  %vm2149_vm6 = vweird.f32 %v3257_v8 }
0x24e0   :  { %v2326_v62 = vadd.f32 1.0, %v3259_v9  ;;  %vm2150_vm8 = vmor %vm2148_vm7, %vm2149_vm6 }
0x24e1   :  { %v2145_v12 = vsub.f32 1.0, %v2144_v10 }
0x24e2   :  { %3260 = vrcp.f32 %v2326_v62  ;;  %v2338_v25 = vand.u32 2147483648, %v2326_v62  ;;  %vm2332_vm11 = vweird.f32 %v2326_v62  ;;  %v2336_v26 = vand.u32 2147483647, %v2326_v62 }
0x24e3   :  { %v2146_v13 = vmul.f32 %v3257_v8, %v2145_v12  ;;  %v3962_v12 = vld [vmem:[%s4039_s4] ss:$0 sm:$0xff] }
0x24e4   :  { %v2339_v28 = vor.u32 1.1754944e-38, %v2338_v25  ;;  %vm2337_vm14 = vcmp.eq.f32.partialorder %v2336_v26, 8.507059e+37 }
0x24e5   :  { %v2147_v55 = vadd.f32 %v3257_v8, %v2146_v13 }
0x24e7   :  { %v2151_v16 = vsel %vm2150_vm8, %v3257_v8, %v2147_v55 }
0x24e8   :  { %v3261_v53 = vpop.eup %3260  ;;  %v2156_v19 = vsel %vm2153_vm9, %v2155_v1, %v2151_v16 }
0x24e9   :  { %v2328_v17 = vmul.f32 %v3261_v53, %v2326_v62  ;;  %vm2333_vm10 = vweird.f32 %v3261_v53  ;;  %v2159_v35 = vmul.f32 %v2156_v19, %v3879_v50 }
0x24ea   :  { %vm2334_vm13 = vmor %vm2332_vm11, %vm2333_vm10 }
0x24eb   :  { %v2329_v22 = vsub.f32 1.0, %v2328_v17 }
0x24ed   :  { %v2330_v23 = vmul.f32 %v3261_v53, %v2329_v22 }
0x24ef   :  { %v2331_v24 = vadd.f32 %v3261_v53, %v2330_v23 }
0x24f1   :  { %v2335_v27 = vsel %vm2334_vm13, %v3261_v53, %v2331_v24 }
0x24f2   :  { %v2340_v32 = vsel %vm2337_vm14, %v2339_v28, %v2335_v27 }
0x24f3   :  { %v2343_v30 = vmul.f32 %v2340_v32, %v3874_v36 }
0x2537   :  { %v2162_v18 = vpop.permute.xlu0 %2161 }
0x2538   :  { %v2164_v20 = vmul.f32 %v2162_v18, %v2156_v19 }
0x253a   :  { %2166 = vrot.lane.b32.xlu2 %v2164_v20, %s3302_s27 }
0x2547   :  { %v2346_v29 = vpop.permute.xlu1 %2345 }
0x2548   :  { %v2348_v33 = vmul.f32 %v2346_v29, %v2340_v32 }
0x254a   :  { %2350 = vrot.lane.b32.xlu0 %v2348_v33, %s3302_s27 }
0x2594   :  { %v2167_v37 = vpop.permute.xlu2 %2166 }
0x2595   :  { %v2169_v40 = vadd.f32 %v2167_v37, %v2159_v35 }
0x2597   :  { %3262 = vtanh.f32 %v2169_v40 }
0x259d   :  { %v3263_v42 = vpop.eup %3262 }
0x259e   :  { %2172 = vrot.lane.b32.xlu1 %v3263_v42, %s3301_s26 }
0x25a6   :  { %2286 = vrot.lane.b32.xlu1 %v3883_v57, %s3302_s27 }
0x25bc   :  { %v2351_v45 = vpop.permute.xlu0 %2350 }
0x25bd   :  { %v3908_v44 = vadd.f32 %v2351_v45, %v2343_v30 }
0x25bf   :  { %3264 = vtanh.f32 %v3908_v44 }
0x25c5   :  { %v3265_v43 = vpop.eup %3264 }
0x25c6   :  { %2356 = vrot.lane.b32.xlu2 %v3265_v43, %s3301_s26 }
0x2610   :  { %v2173_v50 = vpop.permute.xlu1 %2172 }
0x2611   :  { %v2175_v36 = vmul.f32 %v2173_v50, %v2156_v19  ;;  %v2997_v50 = vld [vmem:[%s4040_s3 + $0x8] sm:$0xff] }
0x2612   :  { %2549 = vmatpush.bf16.msra.mxu1 %v2997_v50  ;;  %2608 = vmatpush.bf16.msra.mxu2 %v2997_v50 }
0x2613   :  { %v2176_v21 = vpack.c.bf16 %v2175_v36, %v2175_v36  ;;  %v2996_v36 = vld [vmem:[%s4040_s3] sm:$0xff] }
0x2615   :  { %2188 = vrot.lane.b32.xlu0 %v2176_v21, %s3302_s27 }
0x2616   :  { %2550 = vmatpush.bf16.msra.mxu1 %v2996_v36  ;;  %2609 = vmatpush.bf16.msra.mxu2 %v2996_v36 }
0x2618   :  { %v2287_v54 = vpop.permute.xlu1 %2286 }
0x2619   :  { %2289 = vst.msk [vmem:[#allocation4] sm:$0xff] %vm86_vm4, %v2287_v54 }
0x2620   :  { %v2357_v57 = vpop.permute.xlu2 %2356  ;;  %v2433_v4 = vld [vmem:[#allocation4] sm:$0xff] }
0x2621   :  { %v2359_v41 = vmul.f32 %v2357_v57, %v2340_v32 }
0x2623   :  { %2362 = vrot.lane.b32.xlu2 %v2359_v41, %s3302_s27  ;;  %v2360_v58 = vpack.c.bf16 %v2359_v41, %v2359_v41 }
0x267d   :  { %v2363_v38 = vpop.permute.xlu2 %2362 }
0x267e   :  { %2365 = vst.msk [vmem:[#allocation4 + $0x8] sm:$0xff] %vm86_vm4, %v2363_v38 }
0x2685   :  { %v2434_v2 = vld [vmem:[#allocation4 + $0x8] sm:$0xff] }
0x2686   :  { %v2436_v48 = vpack.c.bf16 %v2434_v2, %v2433_v4 }
0x2687   :  { %v2189_v11 = vpop.permute.xlu0 %2188 }
0x2688   :  { %2908 = vmatmul.msk.bf16.vlgmr.msrb.gmra.mxu0 %vm86_vm4, %v2189_v11  ;;  %2909 = vmatmul.msk.bf16.vlgmr.msrb.gmra.mxu1 %vm86_vm4, %v2189_v11 }
0x2698   :  { %2931 = vmatmul.msk.bf16.vlgmr.msra.gmra.mxu0 %vm86_vm4, %v2436_v48 }
0x2705   :  { %v2222_v7 = vpop.f32.mrf.mxu0  ;;  %v2235_v14 = vpop.f32.mrf.mxu1 }
0x2706   :  { %v2223_v8 = vadd.f32 %v2222_v7, %v2183_v5  ;;  %v2236_v9 = vadd.f32 %v2235_v14, %v2184_v6 }
0x2708   :  { %2239 = vst [vmem:[%s4043_s7 + $0x20] sm:$0xff] %v2223_v8 }
0x2709   :  { %2240 = vst.msk [vmem:[%s4043_s7 + $0x28] sm:$0xff] %vm900_vm12, %v2236_v9 }
0x270d   :  { %v2224_v10 = vpop.f32.mrf.mxu0  ;;  %v2237_v62 = vpop.f32.mrf.mxu1 }
0x2715   :  { %v2473_v13 = vpop.f32.mrf.mxu0 }
0x2716   :  { %v2474_v55 = vadd.f32 %v3962_v12, %v2473_v13 }
0x2718   :  { %3266 = vtanh.f32 %v2474_v55  ;;  %v2933_v15 = vmul.f32 -1.442695, %v2474_v55 }
0x271a   :  { %3268 = vpow2.f32 %v2933_v15 }
0x271d   :  { %v2475_v11 = vpop.f32.mrf.mxu0 }
0x271e   :  { %v3267_v53 = vpop.eup %3266  ;;  %v2476_v2 = vadd.f32 %v3962_v12, %v2475_v11  ;;  %v2956_v11 = vld [vmem:[%s4041_s5 + $0x10] sm:$0xf] }
0x271f   :  { %2508 = vrot.lane.b32.xlu0 %v3267_v53, %s3301_s26 }
0x2720   :  { %v3269_v16 = vpop.eup %3268 }
0x2721   :  { %v2489_v17 = vadd.f32 1.0, %v3269_v16 }
0x2723   :  { %3270 = vrcp.f32 %v2489_v17  ;;  %v2501_v23 = vand.u32 2147483648, %v2489_v17  ;;  %vm2495_vm0 = vweird.f32 %v2489_v17  ;;  %v2499_v24 = vand.u32 2147483647, %v2489_v17 }
0x2725   :  { %v2502_v26 = vor.u32 1.1754944e-38, %v2501_v23  ;;  %vm2500_vm2 = vcmp.eq.f32.partialorder %v2499_v24, 8.507059e+37 }
0x2727   :  { %2368 = vrot.lane.b32.xlu0 %v2360_v58, %s3302_s27 }
0x2729   :  { %v3271_v1 = vpop.eup %3270 }
0x272a   :  { %v2491_v18 = vmul.f32 %v3271_v1, %v2489_v17  ;;  %vm2496_vm15 = vweird.f32 %v3271_v1 }
0x272b   :  { %vm2497_vm1 = vmor %vm2495_vm0, %vm2496_vm15 }
0x272c   :  { %v2492_v19 = vsub.f32 1.0, %v2491_v18 }
0x272e   :  { %v2493_v20 = vmul.f32 %v3271_v1, %v2492_v19 }
0x2730   :  { %v2494_v22 = vadd.f32 %v3271_v1, %v2493_v20 }
0x2732   :  { %v2498_v25 = vsel %vm2497_vm1, %v3271_v1, %v2494_v22 }
0x2733   :  { %v2503_v28 = vsel %vm2500_vm2, %v2502_v26, %v2498_v25 }
0x2734   :  { %v2506_v33 = vmul.f32 0.0, %v2503_v28 }
0x2791   :  { %v2509_v27 = vpop.permute.xlu0 %2508 }
0x2792   :  { %v2511_v29 = vmul.f32 %v2509_v27, %v2503_v28 }
0x2794   :  { %2513 = vrot.lane.b32.xlu1 %v2511_v29, %s3302_s27 }
0x2799   :  { %v2369_v32 = vpop.permute.xlu0 %2368 }
0x279a   :  { %2921 = vmatmul.msk.bf16.vlgmr.msra.gmra.mxu3 %vm86_vm4, %v2369_v32 }
0x2806   :  { %v2514_v35 = vpop.permute.xlu1 %2513 }
0x2807   :  { %v3969_v37 = vadd.f32 %v2514_v35, %v2506_v33 }
0x2809   :  { %3272 = vtanh.f32 %v3969_v37 }
0x280f   :  { %v3273_v40 = vpop.eup %3272 }
0x2810   :  { %2519 = vrot.lane.b32.xlu2 %v3273_v40, %s3301_s26 }
0x281d   :  { %v2382_v42 = vpop.f32.mrf.mxu3 }
0x281e   :  { %v2386_v30 = vadd.f32 %v2382_v42, %v2223_v8 }
0x2820   :  { %3274 = vtanh.f32 %v2386_v30  ;;  %v2922_v39 = vmul.f32 -1.442695, %v2386_v30 }
0x2822   :  { %3276 = vpow2.f32 %v2922_v39 }
0x2825   :  { %v2384_v45 = vpop.f32.mrf.mxu3 }
0x2826   :  { %v3275_v43 = vpop.eup %3274 }
0x2827   :  { %2409 = vrot.lane.b32.xlu2 %v3275_v43, %s3301_s26 }
0x2828   :  { %v3277_v49 = vpop.eup %3276 }
0x2829   :  { %v2390_v46 = vadd.f32 1.0, %v3277_v49 }
0x282b   :  { %3278 = vrcp.f32 %v2390_v46  ;;  %v2402_v63 = vand.u32 2147483648, %v2390_v46  ;;  %vm2396_vm5 = vweird.f32 %v2390_v46  ;;  %v2400_v61 = vand.u32 2147483647, %v2390_v46 }
0x282d   :  { %v2403_v3 = vor.u32 1.1754944e-38, %v2402_v63  ;;  %vm2401_vm7 = vcmp.eq.f32.partialorder %v2400_v61, 8.507059e+37 }
0x2831   :  { %v3279_v54 = vpop.eup %3278 }
0x2832   :  { %v2392_v56 = vmul.f32 %v3279_v54, %v2390_v46  ;;  %vm2397_vm3 = vweird.f32 %v3279_v54 }
0x2833   :  { %vm2398_vm6 = vmor %vm2396_vm5, %vm2397_vm3 }
0x2834   :  { %v2393_v60 = vsub.f32 1.0, %v2392_v56 }
0x2836   :  { %v2394_v31 = vmul.f32 %v3279_v54, %v2393_v60 }
0x2838   :  { %v2395_v59 = vadd.f32 %v3279_v54, %v2394_v31 }
0x283a   :  { %v2399_v0 = vsel %vm2398_vm6, %v3279_v54, %v2395_v59 }
0x283b   :  { %v2404_v51 = vsel %vm2401_vm7, %v2403_v3, %v2399_v0 }
0x283c   :  { %v2407_v5 = vmul.f32 %v2404_v51, %v3908_v44 }
0x286a   :  { %v2520_v21 = vpop.permute.xlu2 %2519 }
0x286b   :  { %v2522_v57 = vmul.f32 %v2520_v21, %v2503_v28 }
0x286d   :  { %v2523_v41 = vpack.c.bf16 %v2522_v57, %v2522_v57 }
0x286f   :  { %2526 = vrot.lane.b32.xlu1 %v2523_v41, %s3302_s27 }
0x2881   :  { %v2410_v34 = vpop.permute.xlu2 %2409 }
0x2882   :  { %v2412_v52 = vmul.f32 %v2410_v34, %v2404_v51 }
0x2884   :  { %2414 = vrot.lane.b32.xlu1 %v2412_v52, %s3302_s27 }
0x28e1   :  { %v2527_v38 = vpop.permute.xlu1 %2526 }
0x28e2   :  { %2942 = vmatmul.msk.bf16.vlgmr.msra.gmra.mxu1 %vm86_vm4, %v2527_v38 }
0x28f6   :  { %v2415_v47 = vpop.permute.xlu1 %2414 }
0x28f7   :  { %v2417_v6 = vadd.f32 %v2415_v47, %v2407_v5  ;;  %v2958_v47 = vld [vmem:[%s4041_s5 + $0x18] sm:$0xf0]  ;;  %v2948_v5 = vld [vmem:[%s4041_s5] sm:$0xf] }
0x295f   :  { %v2552_v4 = vpop.f32.mrf.mxu1 }
0x2960   :  { %v2556_v48 = vadd.f32 %v2552_v4, %v2476_v2  ;;  %v3003_v2 = vld [vmem:[%s4041_s5 + $0x14] sm:$0xf0]  ;;  %v3002_v4 = vld [vmem:[%s4041_s5 + $0x14] sm:$0xf] }
0x2962   :  { %3280 = vtanh.f32 %v2556_v48  ;;  %v2943_v9 = vmul.f32 -1.442695, %v2556_v48  ;;  %v2957_v48 = vor.u32 %v3003_v2, %v2956_v11 }
0x2963   :  { %3282 = vtanh.f32 %v2417_v6  ;;  %v3001_v6 = vld [vmem:[%s4041_s5 + $0x4] sm:$0xf0] }
0x2964   :  { %3284 = vpow2.f32 %v2943_v9  ;;  %2696 = vmatpush.bf16.msrb.mxu3 %v2957_v48  ;;  %v2949_v9 = vor.u32 %v3001_v6, %v2948_v5 }
0x2967   :  { %v2554_v7 = vpop.f32.mrf.mxu1 }
0x2968   :  { %v3281_v14 = vpop.eup %3280  ;;  %v2961_v7 = vor.u32 %v3002_v4, %v2958_v47  ;;  %2697 = vmatpush.bf16.msrb.mxu3 %v2949_v9 }
0x2969   :  { %2579 = vrot.lane.b32.xlu0 %v3281_v14, %s3301_s26  ;;  %v3283_v8 = vpop.eup %3282  ;;  %v3000_v14 = vld [vmem:[%s4041_s5 + $0x4] sm:$0xf] }
0x296a   :  { %v3285_v10 = vpop.eup %3284  ;;  %2709 = vmatpush.bf16.msrb.mxu1 %v2961_v7 }
0x296b   :  { %v2560_v62 = vadd.f32 1.0, %v3285_v10 }
0x296d   :  { %3286 = vrcp.f32 %v2560_v62  ;;  %v2572_v44 = vand.u32 2147483648, %v2560_v62  ;;  %vm2566_vm9 = vweird.f32 %v2560_v62  ;;  %v2570_v16 = vand.u32 2147483647, %v2560_v62 }
0x296f   :  { %v2573_v1 = vor.u32 1.1754944e-38, %v2572_v44  ;;  %vm2571_vm11 = vcmp.eq.f32.partialorder %v2570_v16, 8.507059e+37 }
0x2971   :  { %2420 = vrot.lane.b32.xlu0 %v3283_v8, %s3301_s26  ;;  %v2950_v8 = vld [vmem:[%s4041_s5 + $0x8] sm:$0xf0] }
0x2972   :  { %v2953_v10 = vor.u32 %v3000_v14, %v2950_v8 }
0x2973   :  { %v3287_v13 = vpop.eup %3286 }
0x2974   :  { %v2562_v55 = vmul.f32 %v3287_v13, %v2560_v62  ;;  %vm2567_vm8 = vweird.f32 %v3287_v13  ;;  %2710 = vmatpush.bf16.msrb.mxu1 %v2953_v10 }
0x2975   :  { %vm2568_vm10 = vmor %vm2566_vm9, %vm2567_vm8 }
0x2976   :  { %v2563_v53 = vsub.f32 1.0, %v2562_v55 }
0x2978   :  { %v2564_v58 = vmul.f32 %v3287_v13, %v2563_v53 }
0x297a   :  { %v2565_v15 = vadd.f32 %v3287_v13, %v2564_v58  ;;  %v2658_v58 = vld [vmem:[%s4042_s6] sm:$0x3] }
0x297c   :  { %v2569_v17 = vsel %vm2568_vm10, %v3287_v13, %v2565_v15  ;;  %v2661_v15 = vperm.slane %v2658_v58, 1 }
0x297d   :  { %v2574_v19 = vsel %vm2571_vm11, %v2573_v1, %v2569_v17  ;;  %v2660_v17 = vperm.slane %v2658_v58, 0 }
0x297e   :  { %v2577_v24 = vmul.f32 %v2574_v19, %v3969_v37 }
0x29db   :  { %v2580_v18 = vpop.permute.xlu0 %2579 }
0x29dc   :  { %v2582_v20 = vmul.f32 %v2580_v18, %v2574_v19 }
0x29de   :  { %2584 = vrot.lane.b32.xlu2 %v2582_v20, %s3302_s27 }
0x29e3   :  { %v2421_v22 = vpop.permute.xlu0 %2420 }
0x29e4   :  { %v2423_v23 = vmul.f32 %v2421_v22, %v2404_v51 }
0x29e6   :  { %2425 = vrot.lane.b32.xlu2 %v2423_v23, %s3302_s27 }
0x2a38   :  { %v2585_v25 = vpop.permute.xlu2 %2584 }
0x2a39   :  { %v2587_v26 = vadd.f32 %v2585_v25, %v2577_v24 }
0x2a3b   :  { %3288 = vtanh.f32 %v2587_v26 }
0x2a40   :  { %v2426_v27 = vpop.permute.xlu2 %2425 }
0x2a41   :  { %v3289_v28 = vpop.eup %3288  ;;  %2428 = vst.msk [vmem:[#allocation4 + $0x10] sm:$0xff] %vm86_vm4, %v2426_v27 }
0x2a42   :  { %2590 = vrot.lane.b32.xlu1 %v3289_v28, %s3301_s26 }
0x2a48   :  { %v2435_v29 = vld [vmem:[#allocation4 + $0x10] sm:$0xff] }
0x2a49   :  { %v2437_v32 = vpack.c.bf16 %v2435_v29, %v2435_v29 }
0x2a4b   :  { %2932 = vmatmul.msk.bf16.gmra.mxu0 %vm86_vm4, %v2437_v32 }
0x2ab4   :  { %v2591_v33 = vpop.permute.xlu1 %2590 }
0x2ab5   :  { %v2593_v35 = vmul.f32 %v2591_v33, %v2574_v19 }
0x2ab7   :  { %v2594_v40 = vpack.c.bf16 %v2593_v35, %v2593_v35 }
0x2ab9   :  { %2597 = vrot.lane.b32.xlu0 %v2594_v40, %s3302_s27 }
0x2ac8   :  { %v2478_v42 = vpop.f32.mrf.mxu0 }
0x2ac9   :  { %v2479_v45 = vadd.f32 %v3962_v12, %v2478_v42 }
0x2ad0   :  { %v2480_v37 = vpop.f32.mrf.mxu0 }
0x2b2b   :  { %v2598_v30 = vpop.permute.xlu0 %2597 }
0x2b2c   :  { %2944 = vmatmul.msk.bf16.vlgmr.msra.gmra.mxu2 %vm86_vm4, %v2598_v30 }
0x2baf   :  { %v2611_v43 = vpop.f32.mrf.mxu2 }
0x2bb0   :  { %v2615_v39 = vadd.f32 %v2611_v43, %v2479_v45 }
0x2bb2   :  { %3290 = vtanh.f32 %v2615_v39  ;;  %v2945_v50 = vmul.f32 -1.442695, %v2615_v39 }
0x2bb4   :  { %3292 = vpow2.f32 %v2945_v50 }
0x2bb7   :  { %v2613_v49 = vpop.f32.mrf.mxu2 }
0x2bb8   :  { %v3291_v46 = vpop.eup %3290 }
0x2bb9   :  { %2638 = vrot.lane.b32.xlu1 %v3291_v46, %s3301_s26 }
0x2bba   :  { %v3293_v36 = vpop.eup %3292 }
0x2bbb   :  { %v2619_v21 = vadd.f32 1.0, %v3293_v36 }
0x2bbd   :  { %3294 = vrcp.f32 %v2619_v21  ;;  %v2631_v31 = vand.u32 2147483648, %v2619_v21  ;;  %vm2625_vm14 = vweird.f32 %v2619_v21  ;;  %v2629_v12 = vand.u32 2147483647, %v2619_v21 }
0x2bbf   :  { %v2632_v63 = vor.u32 1.1754944e-38, %v2631_v31  ;;  %vm2630_vm0 = vcmp.eq.f32.partialorder %v2629_v12, 8.507059e+37 }
0x2bc3   :  { %v3295_v54 = vpop.eup %3294 }
0x2bc4   :  { %v2621_v57 = vmul.f32 %v3295_v54, %v2619_v21  ;;  %vm2626_vm13 = vweird.f32 %v3295_v54 }
0x2bc5   :  { %vm2627_vm15 = vmor %vm2625_vm14, %vm2626_vm13 }
0x2bc6   :  { %v2622_v41 = vsub.f32 1.0, %v2621_v57 }
0x2bc8   :  { %v2623_v56 = vmul.f32 %v3295_v54, %v2622_v41 }
0x2bca   :  { %v2624_v60 = vadd.f32 %v3295_v54, %v2623_v56 }
0x2bcc   :  { %v2628_v59 = vsel %vm2627_vm15, %v3295_v54, %v2624_v60 }
0x2bcd   :  { %v2633_v0 = vsel %vm2630_vm0, %v2632_v63, %v2628_v59 }
0x2bce   :  { %v2636_v34 = vmul.f32 %v2633_v0, %v2587_v26 }
0x2c2b   :  { %v2639_v61 = vpop.permute.xlu1 %2638 }
0x2c2c   :  { %v2641_v3 = vmul.f32 %v2639_v61, %v2633_v0 }
0x2c2e   :  { %2643 = vrot.lane.b32.xlu2 %v2641_v3, %s3302_s27 }
0x2c88   :  { %v2644_v51 = vpop.permute.xlu2 %2643 }
0x2c89   :  { %v2646_v52 = vadd.f32 %v2644_v51, %v2636_v34 }
0x2c8b   :  { %3296 = vtanh.f32 %v2646_v52 }
0x2c91   :  { %v3297_v38 = vpop.eup %3296 }
0x2c92   :  { %2649 = vrot.lane.b32.xlu0 %v3297_v38, %s3301_s26 }
0x2d04   :  { %v2650_v62 = vpop.permute.xlu0 %2649 }
0x2d05   :  { %v2652_v13 = vmul.f32 %v2650_v62, %v2633_v0 }
0x2d07   :  { %v2653_v55 = vpack.c.bf16 %v2652_v13, %v2652_v13 }
0x2d09   :  { %2665 = vrot.lane.b32.xlu1 %v2653_v55, %s3302_s27 }
0x2d7b   :  { %v2666_v53 = vpop.permute.xlu1 %2665 }
0x2d7c   :  { %2962 = vmatmul.msk.bf16.vlgmr.msrb.gmra.mxu3 %vm86_vm4, %v2666_v53  ;;  %2963 = vmatmul.msk.bf16.vlgmr.msrb.gmra.mxu1 %vm86_vm4, %v2666_v53 }
0x2df9   :  { %v2712_v44 = vpop.f32.mrf.mxu1 }
0x2dfa   :  { %v2713_v16 = vadd.f32 %v2712_v44, %v2661_v15 }
0x2dfc   :  { %2717 = vst.msk [vmem:[%s4043_s7 + $0x38] sm:$0xff] %vm900_vm12, %v2713_v16 }
0x2dff   :  { %v2699_v1 = vpop.f32.mrf.mxu3 }
0x2e00   :  { %v2700_v18 = vadd.f32 %v2699_v1, %v2660_v17 }
0x2e01   :  { %v2714_v19 = vpop.f32.mrf.mxu1 }
0x2e02   :  { %2716 = vst [vmem:[%s4043_s7 + $0x30] sm:$0xff] %v2700_v18 }
0x2e07   :  { %v2701_v20 = vpop.f32.mrf.mxu3 }

</bundles_post_ra>
